<compile_context>
chip_gen: v7x
topology: tpu7x:2x2x1
jax: 0.10.0
libtpu: 0.0.40
codegen_flags: <defaults>
</compile_context>

<pallas_src>
import functools

import numpy as np

import jax
import jax.numpy as jnp
from jax.experimental import pallas as pl
from jax.experimental.pallas import tpu as pltpu


# ---------------------------------------------------------------------------
# Fused Pallas kernel: conv1+pool+relu -> conv2+pool+relu -> fc1+relu -> fc2
# ---------------------------------------------------------------------------

def _pool_max(y, slab, n_slabs):
    """Max over lane-aligned pool-offset slabs (3 cheap VPU vmax ops)."""
    m = y[:, 0:slab]
    for d in range(1, n_slabs):
        m = jnp.maximum(m, y[:, d * slab:(d + 1) * slab])
    return m


def cnn_m_fused_kernel(x_ref, w1t_ref, b1c_ref, w2t_ref, b2c_ref,
                       w1f_ref, b1f_ref, w2f_ref, b2f_ref, o_ref):
    """Whole CNN_M forward on VMEM-resident operands.

    x_ref  : (B, Cin*H*W)        bf16  NCHW-flattened image
    w1t_ref: (Cin*H*W, 4*S1)     bf16  conv1 pooled-Toeplitz (4 pool-offset slabs)
    w2t_ref: (S1, 4*S2)          bf16  conv2 pooled-Toeplitz
    w1f_ref: (S2, Hh)  w2f_ref: (Hh, 128)   bf16  fc weights (fc2 lane-padded)
    b*_ref : f32 bias rows (lane-padded to match)
    o_ref  : (B, 128) f32 lane-dense logits slab
    """
    s1 = b1c_ref.shape[1]
    n1 = w1t_ref.shape[1] // s1
    s2 = b2c_ref.shape[1]
    n2 = w2t_ref.shape[1] // s2

    # conv1 (one MXU matmul) + 2x2 maxpool (lane-slab maxes) + bias + ReLU
    y1 = jnp.dot(x_ref[...], w1t_ref[...], preferred_element_type=jnp.float32)
    a1 = jnp.maximum(_pool_max(y1, s1, n1) + b1c_ref[...], 0.0)
    a1 = a1.astype(jnp.bfloat16)                      # (B, S1) lane-dense

    # conv2 + maxpool + bias + ReLU -> flattened feature in NCHW (c2,h,w) order
    y2 = jnp.dot(a1, w2t_ref[...], preferred_element_type=jnp.float32)
    feat = jnp.maximum(_pool_max(y2, s2, n2) + b2c_ref[...], 0.0)
    feat = feat.astype(jnp.bfloat16)                  # (B, S2) lane-dense

    # fc1 + ReLU
    h = jnp.dot(feat, w1f_ref[...], preferred_element_type=jnp.float32)
    h = jnp.maximum(h + b1f_ref[...], 0.0).astype(jnp.bfloat16)
    # TODO(synk): F.dropout in training mode not implemented; inference = identity.

    # fc2 (output padded to 128 lanes for dense stores; sliced in the wrapper)
    o = jnp.dot(h, w2f_ref[...], preferred_element_type=jnp.float32)
    o_ref[...] = (o + b2f_ref[...]).astype(o_ref.dtype)


# ---------------------------------------------------------------------------
# pallas_call wrapper (the only per-step XLA glue: one reshape + cast + slice)
# ---------------------------------------------------------------------------

@functools.partial(jax.jit, static_argnames=("num_classes",))
def cnn_m_forward(x, params, *, num_classes):
    b = x.shape[0]
    # NCHW flatten (c, y, x) matches the Toeplitz row order -> no transpose.
    x_flat = x.reshape(b, -1).astype(jnp.bfloat16)
    o_pad = params["w2f"].shape[1]

    flops = 2 * b * (params["w1t"].shape[0] * params["w1t"].shape[1]
                     + params["w2t"].shape[0] * params["w2t"].shape[1]
                     + params["w1f"].shape[0] * params["w1f"].shape[1]
                     + params["w2f"].shape[0] * params["w2f"].shape[1])
    bytes_accessed = (sum(int(v.size) * v.dtype.itemsize for v in params.values())
                      + int(x_flat.size) * x_flat.dtype.itemsize
                      + b * o_pad * 4)
    cost = pl.CostEstimate(flops=flops, transcendentals=0,
                           bytes_accessed=bytes_accessed)

    vmem = pl.BlockSpec(memory_space=pltpu.MemorySpace.VMEM)
    out_pad = pl.pallas_call(
        cnn_m_fused_kernel,
        out_shape=jax.ShapeDtypeStruct((b, o_pad), jnp.float32),
        in_specs=[vmem] * 9,
        out_specs=vmem,
        cost_estimate=cost,
    )(x_flat,
      params["w1t"], params["b1c"],
      params["w2t"], params["b2c"],
      params["w1f"], params["b1f"],
      params["w2f"], params["b2f"])
    return out_pad[:, :num_classes]


# ---------------------------------------------------------------------------
# One-time parameter preparation (hoisted out of the per-call path, on host)
# ---------------------------------------------------------------------------

def _round_up(x, m):
    return ((x + m - 1) // m) * m


def _pooled_conv_toeplitz(w, h_in, w_in, pool=2, lane_pad=128):
    """Unrolled weight matrix turning a pooled 'VALID' conv into one matmul.

    Rows   : NCHW flatten of the input image (cin, y, x).
    Columns: pool*pool slabs (one per pool offset (di,dj)); each slab is the
             NCHW flatten (cout, hp, wp) of the *pooled* output, zero-padded to
             a multiple of `lane_pad` so every slab starts lane-aligned.
    Floor truncation of odd conv outputs matches PyTorch MaxPool2d floor mode.
    """
    co, ci, k, _ = w.shape
    w = np.asarray(w, np.float32)
    h_out = (h_in - k + 1) // pool
    w_out = (w_in - k + 1) // pool
    slab = co * h_out * w_out
    slab_pad = _round_up(slab, lane_pad)
    n = pool * pool

    hp = np.arange(h_out)[:, None]
    wp = np.arange(w_out)[None, :]
    tv = np.zeros((ci, co, h_in, w_in, n, h_out, w_out), np.float32)
    for di in range(pool):
        for dj in range(pool):
            d = di * pool + dj
            for ki in range(k):
                for kj in range(k):
                    ys = pool * hp + di + ki          # (h_out, 1)
                    xs = pool * wp + dj + kj          # (1, w_out)
                    tv[:, :, ys, xs, d, hp, wp] = w[:, :, ki, kj].T[:, :, None, None]
    tv = tv.transpose(0, 2, 3, 4, 1, 5, 6).reshape(ci * h_in * w_in, n, slab)
    t = np.zeros((ci * h_in * w_in, n, slab_pad), np.float32)
    t[:, :, :slab] = tv
    return t.reshape(ci * h_in * w_in, n * slab_pad), (h_out, w_out), slab, slab_pad


def prepare_params(raw, *, img_hw=(28, 28), pool=2):
    """One-time weight layout transforms: pooled-Toeplitz conv matrices (bf16),
    lane-padded per-column bias rows (f32), fc1/fc2 transposed + lane-padded
    (bf16 weights, f32 biases)."""
    h_img, w_img = img_hw
    hid = raw["fc1_w"].shape[0]
    ncls = raw["fc2_w"].shape[0]

    # conv1 over the raw image.
    t1, (ph1, pw1), slab1, slab1_pad = _pooled_conv_toeplitz(
        np.asarray(raw["conv1_w"], np.float32), h_img, w_img, pool=pool)
    b1c = np.zeros((1, slab1_pad), np.float32)
    b1c[0, :slab1] = np.repeat(np.asarray(raw["conv1_b"], np.float32), ph1 * pw1)

    # conv2 over the pooled conv1 activation (its slab order = this row order).
    t2, (ph2, pw2), slab2, slab2_pad = _pooled_conv_toeplitz(
        np.asarray(raw["conv2_w"], np.float32), ph1, pw1, pool=pool)
    t2_rows = np.zeros((slab1_pad, t2.shape[1]), np.float32)   # zero rows for lane pad
    t2_rows[:t2.shape[0], :] = t2
    b2c = np.zeros((1, slab2_pad), np.float32)
    b2c[0, :slab2] = np.repeat(np.asarray(raw["conv2_b"], np.float32), ph2 * pw2)

    # fc1: feature order = conv2 slab order = PyTorch NCHW flatten -> plain transpose.
    assert raw["fc1_w"].shape[1] == slab2, "fc1 in_features must equal C2 * pooled spatial"
    w1f = np.zeros((slab2_pad, hid), np.float32)
    w1f[:slab2, :] = np.asarray(raw["fc1_w"], np.float32).T
    b1f = np.asarray(raw["fc1_b"], np.float32).reshape(1, hid)

    # fc2: transpose + pad the tiny num_classes axis to 128 lanes.
    ncls_pad = _round_up(ncls, 128)
    w2f = np.zeros((hid, ncls_pad), np.float32)
    w2f[:, :ncls] = np.asarray(raw["fc2_w"], np.float32).T
    b2f = np.zeros((1, ncls_pad), np.float32)
    b2f[0, :ncls] = np.asarray(raw["fc2_b"], np.float32)

    return dict(
        w1t=jnp.asarray(t1, jnp.bfloat16), b1c=jnp.asarray(b1c, jnp.float32),
        w2t=jnp.asarray(t2_rows, jnp.bfloat16), b2c=jnp.asarray(b2c, jnp.float32),
        w1f=jnp.asarray(w1f, jnp.bfloat16), b1f=jnp.asarray(b1f, jnp.float32),
        w2f=jnp.asarray(w2f, jnp.bfloat16), b2f=jnp.asarray(b2f, jnp.float32),
    )


# ---------------------------------------------------------------------------
# Pure-JAX reference (PyTorch semantics, f32) + self-test
# ---------------------------------------------------------------------------

def _maxpool2_nchw(y):
    b, c, h, w = y.shape
    return y.reshape(b, c, h // 2, 2, w // 2, 2).max(axis=(3, 5))


def reference_forward(x, raw):
    dn = ("NCHW", "OIHW", "NCHW")
    y = jax.lax.conv_general_dilated(x, raw["conv1_w"], (1, 1), "VALID",
                                     dimension_numbers=dn)
    y = jnp.maximum(_maxpool2_nchw(y + raw["conv1_b"].reshape(1, -1, 1, 1)), 0.0)
    y = jax.lax.conv_general_dilated(y, raw["conv2_w"], (1, 1), "VALID",
                                     dimension_numbers=dn)
    y = jnp.maximum(_maxpool2_nchw(y + raw["conv2_b"].reshape(1, -1, 1, 1)), 0.0)
    f = y.reshape(y.shape[0], -1)
    h = jnp.maximum(f @ raw["fc1_w"].T + raw["fc1_b"], 0.0)
    return h @ raw["fc2_w"].T + raw["fc2_b"]


if __name__ == "__main__":
    key = jax.random.PRNGKey(0)
    keys = jax.random.split(key, 9)

    # fc1 in_features = dim_channels*2*4*4 forces a 28x28 input with 5x5 convs
    # and two 2x2 pools (28 -> 24 -> 12 -> 8 -> 4).
    B, Cin, Himg, Wimg = 2, 1, 28, 28
    dim_channels = 4
    dim_fc_hiddens = 32
    num_classes = 10
    C1, C2 = dim_channels, dim_channels * 2
    D = C2 * 4 * 4

    x = jax.random.normal(keys[0], (B, Cin, Himg, Wimg), jnp.float32)

    def u(k, shape, fan_in):
        bnd = 1.0 / (fan_in ** 0.5)
        return jax.random.uniform(k, shape, jnp.float32, -bnd, bnd)

    raw = dict(
        conv1_w=u(keys[1], (C1, Cin, 5, 5), Cin * 25),
        conv1_b=u(keys[2], (C1,), Cin * 25),
        conv2_w=u(keys[3], (C2, C1, 5, 5), C1 * 25),
        conv2_b=u(keys[4], (C2,), C1 * 25),
        fc1_w=u(keys[5], (dim_fc_hiddens, D), D),
        fc1_b=u(keys[6], (dim_fc_hiddens,), D),
        fc2_w=u(keys[7], (num_classes, dim_fc_hiddens), dim_fc_hiddens),
        fc2_b=u(keys[8], (num_classes,), dim_fc_hiddens),
    )

    params = prepare_params(raw, img_hw=(Himg, Wimg))       # one-time hoisted prep
    out = jax.block_until_ready(cnn_m_forward(x, params, num_classes=num_classes))

    ref = reference_forward(x, raw)
    assert out.shape == (B, num_classes)
    # bf16 matmul operands throughout (f32 accumulation) -> relaxed tolerance.
    err = float(jnp.max(jnp.abs(out - ref)))
    assert jnp.allclose(out, ref, atol=5e-2, rtol=5e-2), err

    print("KERNEL_OK")
</pallas_src>

<mosaic_0001>
module attributes {stable_mosaic.version = 11 : i64} {
  func.func @cnn_m_fused_kernel(%arg0: memref<2x784xbf16, #tpu.memory_space<vmem>>, %arg1: memref<784x2560xbf16, #tpu.memory_space<vmem>>, %arg2: memref<1x640xf32, #tpu.memory_space<vmem>>, %arg3: memref<640x512xbf16, #tpu.memory_space<vmem>>, %arg4: memref<1x128xf32, #tpu.memory_space<vmem>>, %arg5: memref<128x32xbf16, #tpu.memory_space<vmem>>, %arg6: memref<1x32xf32, #tpu.memory_space<vmem>>, %arg7: memref<32x128xbf16, #tpu.memory_space<vmem>>, %arg8: memref<1x128xf32, #tpu.memory_space<vmem>>, %arg9: memref<2x128xf32, #tpu.memory_space<vmem>>) attributes {dimension_semantics = [], scalar_prefetch = 0 : i64, scratch_operands = 0 : i64, tpu.core_type = #tpu.core_type<tc>} {
    %c0 = arith.constant 0 : index
    %c0_0 = arith.constant 0 : index
    %0 = vector.load %arg0[%c0, %c0_0] : memref<2x784xbf16, #tpu.memory_space<vmem>>, vector<2x784xbf16>
    %c0_1 = arith.constant 0 : index
    %c0_2 = arith.constant 0 : index
    %1 = vector.load %arg1[%c0_1, %c0_2] : memref<784x2560xbf16, #tpu.memory_space<vmem>>, vector<784x2560xbf16>
    %cst = arith.constant dense<0.000000e+00> : vector<2x2560xf32>
    %2 = tpu.matmul %0, %1, %cst {dimension_numbers = #tpu.dot_dimension_numbers<[1], [0], [0], [1], [0, 0, 1, 1], [], []>} : vector<2x784xbf16>, vector<784x2560xbf16>, vector<2x2560xf32> -> vector<2x2560xf32>
    %3 = vector.extract_strided_slice %2 {offsets = [0, 0], sizes = [2, 640], strides = [1, 1]} : vector<2x2560xf32> to vector<2x640xf32>
    %4 = vector.extract_strided_slice %2 {offsets = [0, 640], sizes = [2, 640], strides = [1, 1]} : vector<2x2560xf32> to vector<2x640xf32>
    %5 = arith.maximumf %3, %4 : vector<2x640xf32>
    %6 = vector.extract_strided_slice %2 {offsets = [0, 1280], sizes = [2, 640], strides = [1, 1]} : vector<2x2560xf32> to vector<2x640xf32>
    %7 = arith.maximumf %5, %6 : vector<2x640xf32>
    %8 = vector.extract_strided_slice %2 {offsets = [0, 1920], sizes = [2, 640], strides = [1, 1]} : vector<2x2560xf32> to vector<2x640xf32>
    %9 = arith.maximumf %7, %8 : vector<2x640xf32>
    %c0_3 = arith.constant 0 : index
    %c0_4 = arith.constant 0 : index
    %10 = vector.load %arg2[%c0_3, %c0_4] : memref<1x640xf32, #tpu.memory_space<vmem>>, vector<1x640xf32>
    %11 = vector.broadcast %10 : vector<1x640xf32> to vector<2x640xf32>
    %12 = arith.addf %9, %11 : vector<2x640xf32>
    %cst_5 = arith.constant 0.000000e+00 : f32
    %13 = vector.broadcast %cst_5 : f32 to vector<2x640xf32>
    %14 = arith.maximumf %12, %13 : vector<2x640xf32>
    %15 = arith.truncf %14 : vector<2x640xf32> to vector<2x640xbf16>
    %c0_6 = arith.constant 0 : index
    %c0_7 = arith.constant 0 : index
    %16 = vector.load %arg3[%c0_6, %c0_7] : memref<640x512xbf16, #tpu.memory_space<vmem>>, vector<640x512xbf16>
    %cst_8 = arith.constant dense<0.000000e+00> : vector<2x512xf32>
    %17 = tpu.matmul %15, %16, %cst_8 {dimension_numbers = #tpu.dot_dimension_numbers<[1], [0], [0], [1], [0, 0, 1, 1], [], []>} : vector<2x640xbf16>, vector<640x512xbf16>, vector<2x512xf32> -> vector<2x512xf32>
    %18 = vector.extract_strided_slice %17 {offsets = [0, 0], sizes = [2, 128], strides = [1, 1]} : vector<2x512xf32> to vector<2x128xf32>
    %19 = vector.extract_strided_slice %17 {offsets = [0, 128], sizes = [2, 128], strides = [1, 1]} : vector<2x512xf32> to vector<2x128xf32>
    %20 = arith.maximumf %18, %19 : vector<2x128xf32>
    %21 = vector.extract_strided_slice %17 {offsets = [0, 256], sizes = [2, 128], strides = [1, 1]} : vector<2x512xf32> to vector<2x128xf32>
    %22 = arith.maximumf %20, %21 : vector<2x128xf32>
    %23 = vector.extract_strided_slice %17 {offsets = [0, 384], sizes = [2, 128], strides = [1, 1]} : vector<2x512xf32> to vector<2x128xf32>
    %24 = arith.maximumf %22, %23 : vector<2x128xf32>
    %c0_9 = arith.constant 0 : index
    %c0_10 = arith.constant 0 : index
    %25 = vector.load %arg4[%c0_9, %c0_10] : memref<1x128xf32, #tpu.memory_space<vmem>>, vector<1x128xf32>
    %26 = vector.broadcast %25 : vector<1x128xf32> to vector<2x128xf32>
    %27 = arith.addf %24, %26 : vector<2x128xf32>
    %cst_11 = arith.constant 0.000000e+00 : f32
    %28 = vector.broadcast %cst_11 : f32 to vector<2x128xf32>
    %29 = arith.maximumf %27, %28 : vector<2x128xf32>
    %30 = arith.truncf %29 : vector<2x128xf32> to vector<2x128xbf16>
    %c0_12 = arith.constant 0 : index
    %c0_13 = arith.constant 0 : index
    %31 = vector.load %arg5[%c0_12, %c0_13] : memref<128x32xbf16, #tpu.memory_space<vmem>>, vector<128x32xbf16>
    %cst_14 = arith.constant dense<0.000000e+00> : vector<2x32xf32>
    %32 = tpu.matmul %30, %31, %cst_14 {dimension_numbers = #tpu.dot_dimension_numbers<[1], [0], [0], [1], [0, 0, 1, 1], [], []>} : vector<2x128xbf16>, vector<128x32xbf16>, vector<2x32xf32> -> vector<2x32xf32>
    %c0_15 = arith.constant 0 : index
    %c0_16 = arith.constant 0 : index
    %33 = vector.load %arg6[%c0_15, %c0_16] : memref<1x32xf32, #tpu.memory_space<vmem>>, vector<1x32xf32>
    %34 = vector.broadcast %33 : vector<1x32xf32> to vector<2x32xf32>
    %35 = arith.addf %32, %34 : vector<2x32xf32>
    %cst_17 = arith.constant 0.000000e+00 : f32
    %36 = vector.broadcast %cst_17 : f32 to vector<2x32xf32>
    %37 = arith.maximumf %35, %36 : vector<2x32xf32>
    %38 = arith.truncf %37 : vector<2x32xf32> to vector<2x32xbf16>
    %c0_18 = arith.constant 0 : index
    %c0_19 = arith.constant 0 : index
    %39 = vector.load %arg7[%c0_18, %c0_19] : memref<32x128xbf16, #tpu.memory_space<vmem>>, vector<32x128xbf16>
    %cst_20 = arith.constant dense<0.000000e+00> : vector<2x128xf32>
    %40 = tpu.matmul %38, %39, %cst_20 {dimension_numbers = #tpu.dot_dimension_numbers<[1], [0], [0], [1], [0, 0, 1, 1], [], []>} : vector<2x32xbf16>, vector<32x128xbf16>, vector<2x128xf32> -> vector<2x128xf32>
    %c0_21 = arith.constant 0 : index
    %c0_22 = arith.constant 0 : index
    %41 = vector.load %arg8[%c0_21, %c0_22] : memref<1x128xf32, #tpu.memory_space<vmem>>, vector<1x128xf32>
    %42 = vector.broadcast %41 : vector<1x128xf32> to vector<2x128xf32>
    %43 = arith.addf %40, %42 : vector<2x128xf32>
    %c0_23 = arith.constant 0 : index
    %c0_24 = arith.constant 0 : index
    %44 = vector.load %arg9[%c0_23, %c0_24] : memref<2x128xf32, #tpu.memory_space<vmem>>, vector<2x128xf32>
    tpu.vector_store %arg9[%c0_23, %c0_24], %43 {strides = array<i32>} : memref<2x128xf32, #tpu.memory_space<vmem>>, vector<2x128xf32>,
    return
  }
}

</mosaic_0001>

<bundles_post_ra>
// kernel: cnn_m_forward.1
= control target key start
LH: loop header
LB: loop body
LE: loop exit
PB: predicated region body
PF: predicated region fallthrough
CT: control target
= control target key end

     0   :  { %14 = vsyncpa [#allocation3], 0  ;;  %s12863_s0 = inlined_call_operand.vmem [shape: bf16[2,784], index: 0, kind: input, shape index: {}]   ;;  %s12864_s1 = inlined_call_operand.hbm [shape: bf16[784,2560], index: 1, kind: input, shape index: {}]   ;;  %s12865_s2 = inlined_call_operand.hbm [shape: f32[1,640], index: 2, kind: input, shape index: {}]   ;;  %s12866_s3 = inlined_call_operand.hbm [shape: bf16[640,512], index: 3, kind: input, shape index: {}]   ;;  %s12867_s4 = inlined_call_operand.hbm [shape: f32[1,128], index: 4, kind: input, shape index: {}]   ;;  %s12868_s5 = inlined_call_operand.vmem [shape: bf16[128,32], index: 5, kind: input, shape index: {}]   ;;  %s12869_s6 = inlined_call_operand.hbm [shape: f32[1,32], index: 6, kind: input, shape index: {}]   ;;  %s12870_s7 = inlined_call_operand.hbm [shape: bf16[32,128], index: 7, kind: input, shape index: {}]   ;;  %s12871_s8 = inlined_call_operand.hbm [shape: f32[1,128], index: 8, kind: input, shape index: {}]   ;;  %s12872_s9 = inlined_call_operand.hbm [shape: f32[2,128], index: 9, kind: output, shape index: {}]  }
   0x1   :  { %15 = vsyncpa [#allocation6], 0 }
   0x2   :  { %16 = vsyncpa [#allocation9], 0 }
   0x3   :  { %17 = vsyncpa [#allocation12], 0 }
   0x4   :  { %18 = vsyncpa [#allocation4], 0  ;;  %s12437_s30 = smov [#allocation5]   ;;  %s12438_s11 = smov [#allocation8]  }
   0x5   :  { %s39_s10 = sshll.u32 %s12437_s30, 4  ;;  %s61_s12 = sshll.u32 %s12438_s11, 4  ;;  %s40_s10 = int_to_ptr.vmem [resolvable:$true] %s39_s10  ;;  %s62_s12 = int_to_ptr.vmem [resolvable:$true] %s61_s12 }
   0x6   :  { %s12251_s15 = scalar_lea.hbm %s12865_s2, 80 }
   0x7   :  { %p12252_p0 = scmp.ne.s32.totalorder %s12865_s2, %s12251_s15  ;;  %p12255_p1 = scmp.lt.u32.totalorder %s12251_s15, %s12865_s2 }
   0x9   :  { %p12257_p2 = pnand %p12255_p1, %p12252_p0 }
   0xb   :  { %12260 = shalt.err (!%p12257_p2)
}
   0xc   :  { %s12261_s20 = scalar_lea.vmem %s40_s10, 80  ;;  %s12265_s21 = scalar_lea.vmem %s40_s10, 96 }
   0xd   :  { %p12262_p3 = scmp.ne.s32.totalorder %s40_s10, %s12261_s20  ;;  %p12266_p4 = scmp.lt.s32.totalorder %s40_s10, %s40_s10 }
   0xe   :  { %p12267_p5 = scmp.lt.s32.totalorder %s12265_s21, %s12261_s20 }
  0x10   :  { %p12268_p6 = por %p12267_p5, %p12266_p4 }
  0x12   :  { %p12269_p7 = pnand %p12268_p6, %p12262_p3 }
  0x14   :  { %12272 = shalt.err (!%p12269_p7)
}
  0x15   :  { %42 = dma.hbm_to_vmem [thread:$0]  %s12865_s2, 80, %s40_s10, [#allocation6]  }
  0x16   :  { %s12273_s26 = scalar_lea.hbm %s12867_s4, 16 }
  0x17   :  { %p12274_p8 = scmp.ne.s32.totalorder %s12867_s4, %s12273_s26  ;;  %p12277_p9 = scmp.lt.u32.totalorder %s12273_s26, %s12867_s4 }
  0x19   :  { %p12279_p10 = pnand %p12277_p9, %p12274_p8 }
  0x1b   :  { %12282 = shalt.err (!%p12279_p10)
}
  0x1c   :  { %s12283_s11 = scalar_lea.vmem %s62_s12, 16  ;;  %s12287_s13 = scalar_lea.vmem %s62_s12, 32 }
  0x1d   :  { %p12284_p11 = scmp.ne.s32.totalorder %s62_s12, %s12283_s11  ;;  %p12288_p12 = scmp.lt.s32.totalorder %s62_s12, %s62_s12 }
  0x1e   :  { %p12289_p13 = scmp.lt.s32.totalorder %s12287_s13, %s12283_s11 }
  0x20   :  { %p12290_p0 = por %p12289_p13, %p12288_p12 }
  0x22   :  { %p12291_p1 = pnand %p12290_p0, %p12284_p11 }
  0x24   :  { %12294 = shalt.err (!%p12291_p1)
}
  0x25   :  { %64 = dma.hbm_to_vmem [thread:$0]  %s12867_s4, 16, %s62_s12, [#allocation9]  }
  0x26   :  { %s12439_s14 = smov [#allocation11]   ;;  %s12295_s18 = scalar_lea.hbm %s12870_s7, 256 }
  0x27   :  { %s82_s15 = sshll.u32 %s12439_s14, 4  ;;  %p12296_p2 = scmp.ne.s32.totalorder %s12870_s7, %s12295_s18  ;;  %s83_s15 = int_to_ptr.vmem [resolvable:$true] %s82_s15 }
  0x28   :  { %p12299_p3 = scmp.lt.u32.totalorder %s12295_s18, %s12870_s7 }
  0x2a   :  { %p12301_p4 = pnand %p12299_p3, %p12296_p2 }
  0x2c   :  { %12304 = shalt.err (!%p12301_p4)
}
  0x2d   :  { %s12305_s23 = scalar_lea.vmem %s83_s15, 256  ;;  %p12310_p6 = scmp.lt.s32.totalorder %s83_s15, %s83_s15 }
  0x2e   :  { %p12306_p5 = scmp.ne.s32.totalorder %s83_s15, %s12305_s23  ;;  %p12311_p7 = scmp.lt.s32.totalorder %s12305_s23, %s12305_s23 }
  0x30   :  { %p12312_p8 = por %p12311_p7, %p12310_p6 }
  0x32   :  { %p12313_p9 = pnand %p12312_p8, %p12306_p5 }
  0x34   :  { %12316 = shalt.err (!%p12313_p9)
}
  0x35   :  { %s12440_s4 = smov 64   ;;  %s12441_s12 = smov 4  }
  0x36   :  { %88 = dma.hbm_to_vmem [thread:$0]  %s12870_s7, 256, %s83_s15, [#allocation12], %s12440_s4, %s12440_s4, %s12441_s12  }
  0x37   :  { %s12442_s26 = smov [#allocation2]   ;;  %s12317_s30 = scalar_lea.hbm %s12864_s1, 125440 }
  0x38   :  { %s26_s27 = sshll.u32 %s12442_s26, 4  ;;  %p12318_p10 = scmp.ne.s32.totalorder %s12864_s1, %s12317_s30  ;;  %s27_s27 = int_to_ptr.vmem [resolvable:$true] %s26_s27 }
  0x39   :  { %p12321_p11 = scmp.lt.u32.totalorder %s12317_s30, %s12864_s1 }
  0x3b   :  { %p12323_p12 = pnand %p12321_p11, %p12318_p10 }
  0x3d   :  { %12326 = shalt.err (!%p12323_p12)
}
  0x3e   :  { %s12327_s14 = scalar_lea.vmem %s27_s27, 125440  ;;  %p12332_p0 = scmp.lt.s32.totalorder %s27_s27, %s27_s27 }
  0x3f   :  { %p12328_p13 = scmp.ne.s32.totalorder %s27_s27, %s12327_s14  ;;  %p12333_p1 = scmp.lt.s32.totalorder %s12327_s14, %s12327_s14 }
  0x41   :  { %p12334_p2 = por %p12333_p1, %p12332_p0 }
  0x43   :  { %p12335_p3 = pnand %p12334_p2, %p12328_p13 }
  0x45   :  { %12338 = shalt.err (!%p12335_p3)
}
  0x46   :  { %s12443_s7 = smov 1280   ;;  %s12444_s15 = smov 80  }
  0x47   :  { %32 = dma.hbm_to_vmem [thread:$0]  %s12864_s1, 125440, %s27_s27, [#allocation3], %s12443_s7, %s12443_s7, %s12444_s15  }
  0x48   :  { %s12445_s18 = smov [#allocation7]   ;;  %s12339_s22 = scalar_lea.hbm %s12866_s3, 20480 }
  0x49   :  { %s48_s19 = sshll.u32 %s12445_s18, 4  ;;  %p12340_p4 = scmp.ne.s32.totalorder %s12866_s3, %s12339_s22  ;;  %s49_s19 = int_to_ptr.vmem [resolvable:$true] %s48_s19 }
  0x4a   :  { %p12343_p5 = scmp.lt.u32.totalorder %s12339_s22, %s12866_s3 }
  0x4c   :  { %p12345_p6 = pnand %p12343_p5, %p12340_p4 }
  0x4e   :  { %12348 = shalt.err (!%p12345_p6)
}
  0x4f   :  { %s12349_s25 = scalar_lea.vmem %s49_s19, 20480  ;;  %p12354_p8 = scmp.lt.s32.totalorder %s49_s19, %s49_s19 }
  0x50   :  { %p12350_p7 = scmp.ne.s32.totalorder %s49_s19, %s12349_s25  ;;  %p12355_p9 = scmp.lt.s32.totalorder %s12349_s25, %s12349_s25 }
  0x52   :  { %p12356_p10 = por %p12355_p9, %p12354_p8 }
  0x54   :  { %p12357_p11 = pnand %p12356_p10, %p12350_p7 }
  0x56   :  { %12360 = shalt.err (!%p12357_p11)
}
  0x57   :  { %s12446_s1 = smov 256   ;;  %s12447_s26 = smov 16  }
  0x58   :  { %54 = dma.hbm_to_vmem [thread:$0]  %s12866_s3, 20480, %s49_s19, [#allocation6], %s12446_s1, %s12446_s1, %s12447_s26  }
  0x59   :  { %s12448_s29 = smov [#allocation10]   ;;  %s12449_s11 = smov [#allocation13]  }
  0x5a   :  { %s73_s30 = sshll.u32 %s12448_s29, 4  ;;  %s95_s13 = sshll.u32 %s12449_s11, 4  ;;  %s74_s30 = int_to_ptr.vmem [resolvable:$true] %s73_s30  ;;  %s96_s13 = int_to_ptr.vmem [resolvable:$true] %s95_s13 }
  0x5b   :  { %s12361_s14 = scalar_lea.hbm %s12869_s6, 16 }
  0x5c   :  { %p12362_p12 = scmp.ne.s32.totalorder %s12869_s6, %s12361_s14  ;;  %p12365_p13 = scmp.lt.u32.totalorder %s12361_s14, %s12869_s6 }
  0x5e   :  { %p12367_p0 = pnand %p12365_p13, %p12362_p12 }
  0x60   :  { %12370 = shalt.err (!%p12367_p0)
}
  0x61   :  { %s12371_s3 = scalar_lea.vmem %s74_s30, 16  ;;  %s12375_s18 = scalar_lea.vmem %s74_s30, 32 }
  0x62   :  { %p12372_p1 = scmp.ne.s32.totalorder %s74_s30, %s12371_s3  ;;  %p12376_p2 = scmp.lt.s32.totalorder %s74_s30, %s74_s30 }
  0x63   :  { %p12377_p3 = scmp.lt.s32.totalorder %s12375_s18, %s12371_s3 }
  0x65   :  { %p12378_p4 = por %p12377_p3, %p12376_p2 }
  0x67   :  { %p12379_p5 = pnand %p12378_p4, %p12372_p1 }
  0x69   :  { %12382 = shalt.err (!%p12379_p5)
}
  0x6a   :  { %76 = dma.hbm_to_vmem [thread:$0]  %s12869_s6, 16, %s74_s30, [#allocation9]  }
  0x6b   :  { %s12383_s23 = scalar_lea.hbm %s12871_s8, 16 }
  0x6c   :  { %p12384_p6 = scmp.ne.s32.totalorder %s12871_s8, %s12383_s23  ;;  %p12387_p7 = scmp.lt.u32.totalorder %s12383_s23, %s12871_s8 }
  0x6e   :  { %p12389_p8 = pnand %p12387_p7, %p12384_p6 }
  0x70   :  { %12392 = shalt.err (!%p12389_p8)
}
  0x71   :  { %s12393_s1 = scalar_lea.vmem %s96_s13, 16  ;;  %s12397_s26 = scalar_lea.vmem %s96_s13, 32 }
  0x72   :  { %p12394_p9 = scmp.ne.s32.totalorder %s96_s13, %s12393_s1  ;;  %p12398_p10 = scmp.lt.s32.totalorder %s96_s13, %s96_s13 }
  0x73   :  { %p12399_p11 = scmp.lt.s32.totalorder %s12397_s26, %s12393_s1 }
  0x75   :  { %p12400_p12 = por %p12399_p11, %p12398_p10 }
  0x77   :  { %p12401_p13 = pnand %p12400_p12, %p12394_p9 }
  0x79   :  { %12404 = shalt.err (!%p12401_p13)
}
  0x7a   :  { %98 = dma.hbm_to_vmem [thread:$0]  %s12871_s8, 16, %s96_s13, [#allocation12]  }
  0x7b   :  { %12427 = dma.done.wait [#allocation3], 125440  }
  0x7c   :  { %12428 = vsyncadd [#allocation3], 4294841856 }
  0x7d   :  { %12429 = dma.done.wait [#allocation6], 20560  }
  0x7e   :  { %12430 = vsyncadd [#allocation6], 4294946736 }
  0x7f   :  { %12431 = dma.done.wait [#allocation9], 32  }
  0x80   :  { %12432 = vsyncadd [#allocation9], 4294967264 }
  0x81   :  { %12433 = dma.done.wait [#allocation12], 272  }
  0x82   :  { %12434 = vsyncadd [#allocation12], 4294967024  ;;  %v12450_v0 = vmov 0   ;;  %v12451_v1 = vmov 1966171168   ;;  %v1107_v3 = vlaneseq  ;;  %vm6057_vm0 = vcmask 130048  }
  0x83   :  { %6216 = vmatprep.mubr.bf16.mxu1 %v12450_v0  ;;  %v1105_v2 = vunpack.c.l.s4 %v12451_v1  ;;  %v10530_v4 = vld [vmem:[#allocation2 + $0x4] ss:$80 sps:$4 sm:$0xff]   ;;  %v10532_v7 = vld [vmem:[#allocation2] ss:$80 sps:$4 sm:$0xff]   ;;  %v10541_v13 = vld [vmem:[#allocation2 + $0xc] ss:$80 sps:$4 sm:$0xff]  }
  0x84   :  { %v12590_v6 = vshrl.u32 %v1107_v3, 7  ;;  %6061 = vmatprep.subr.bf16.mxu0 %v10530_v4  ;;  %v10533_v8 = vld [vmem:[#allocation2 + $0x1e04] ss:$80 sps:$4 sm:$0xff]   ;;  %v10535_v9 = vld [vmem:[#allocation2 + $0x1e00] ss:$80 sps:$4 sm:$0xff]   ;;  %vm12453_vm1 = vmmov 0  }
  0x85   :  { %v1106_v5 = vunpack.c.0.s8 %v1105_v2  ;;  %6062 = vmatpush1.bf16.msra.mxu0 %v10532_v7  ;;  %v10536_v10 = vld [vmem:[#allocation2 + $0xa4] ss:$80 sps:$4 sm:$0xff]   ;;  %v10538_v11 = vld [vmem:[#allocation2 + $0xa0] ss:$80 sps:$4 sm:$0xff]   ;;  %6184 = vmatprep.subr.bf16.mxu1 %v10533_v8  ;;  %v10539_v22 = vld [vmem:[#allocation2 + $0x8] ss:$80 sps:$4 sm:$0xff]  }
  0x86   :  { %6185 = vmatpush1.bf16.msra.mxu1 %v10535_v9  ;;  %6063 = vmatprep.subr.bf16.mxu0 %v10536_v10  ;;  %v121_v14 = vld [vmem:[%s12863_s0] sm:$0x7f]  ;;  %v10548_v24 = vld [vmem:[#allocation2 + $0xac] ss:$80 sps:$4 sm:$0xff]   ;;  %v10546_v29 = vld [vmem:[#allocation2 + $0xa8] ss:$80 sps:$4 sm:$0xff]  }
  0x87   :  { %v12593_v12 = vsub.s32 %v1106_v5, %v12590_v6  ;;  %v1103_v15 = vcombine.high %v121_v14, %v121_v14  ;;  %v10543_v16 = vld [vmem:[#allocation2 + $0x144] ss:$80 sps:$4 sm:$0xff]   ;;  %6225 = vmatprep.subr.bf16.mxu1 %v10541_v13  ;;  %v10545_v18 = vld [vmem:[#allocation2 + $0x140] ss:$80 sps:$4 sm:$0xff]   ;;  %v10554_v30 = vld [vmem:[#allocation2 + $0x14c] ss:$80 sps:$4 sm:$0xff]  }
  0x88   :  { %v10549_v21 = vld [vmem:[#allocation2 + $0x1e4] ss:$80 sps:$4 sm:$0xff]   ;;  %v10551_v26 = vld [vmem:[#allocation2 + $0x1e0] ss:$80 sps:$4 sm:$0xff]   ;;  %v10552_v33 = vld [vmem:[#allocation2 + $0x148] ss:$80 sps:$4 sm:$0xff]  }
  0x89   :  { %v12599_v17 = vrot.slane %v121_v14, %v12593_v12  ;;  %6064 = vmatpush1.bf16.msra.mxu0 %v10538_v11  ;;  %v12602_v19 = vrot.slane %v1103_v15, %v12593_v12  ;;  %v10555_v28 = vld [vmem:[#allocation2 + $0x284] ss:$80 sps:$4 sm:$0xff]   ;;  %v10557_v31 = vld [vmem:[#allocation2 + $0x280] ss:$80 sps:$4 sm:$0xff]   ;;  %v10560_v34 = vld [vmem:[#allocation2 + $0x1ec] ss:$80 sps:$4 sm:$0xff]  }
  0x8a   :  { %6065 = vmatprep.subr.bf16.mxu0 %v10543_v16  ;;  %v10561_v32 = vld [vmem:[#allocation2 + $0x324] ss:$80 sps:$4 sm:$0xff]   ;;  %v10563_v35 = vld [vmem:[#allocation2 + $0x320] ss:$80 sps:$4 sm:$0xff]   ;;  %v10558_v37 = vld [vmem:[#allocation2 + $0x1e8] ss:$80 sps:$4 sm:$0xff]  }
  0x8b   :  { %v1118_v20 = vcombine.high %v12599_v17, %v12599_v17  ;;  %v12608_v23 = vrot.slane %v12602_v19, %v12593_v12  ;;  %v10567_v36 = vld [vmem:[#allocation2 + $0x3c4] ss:$80 sps:$4 sm:$0xff]   ;;  %v10566_v38 = vld [vmem:[#allocation2 + $0x28c] ss:$80 sps:$4 sm:$0xff]   ;;  %v10569_v39 = vld [vmem:[#allocation2 + $0x3c0] ss:$80 sps:$4 sm:$0xff]  }
  0x8c   :  { %v10573_v40 = vld [vmem:[#allocation2 + $0x464] ss:$80 sps:$4 sm:$0xff]   ;;  %v10564_v41 = vld [vmem:[#allocation2 + $0x288] ss:$80 sps:$4 sm:$0xff]   ;;  %v10572_v42 = vld [vmem:[#allocation2 + $0x32c] ss:$80 sps:$4 sm:$0xff]  }
  0x8d   :  { %v12611_v25 = vrot.slane %v1118_v20, %v12593_v12  ;;  %6066 = vmatpush1.bf16.msra.mxu0 %v10545_v18  ;;  %v12615_v27 = vcombine.high %v12608_v23, %v12608_v23  ;;  %v10575_v43 = vld [vmem:[#allocation2 + $0x460] ss:$80 sps:$4 sm:$0xff]   ;;  %v10579_v44 = vld [vmem:[#allocation2 + $0x504] ss:$80 sps:$4 sm:$0xff]   ;;  %v10570_v45 = vld [vmem:[#allocation2 + $0x328] ss:$80 sps:$4 sm:$0xff]   ;;  %v12623_v20 = vrot.slane %v12599_v17, %v12593_v12  ;;  %v1119_v17 = vcombine.high %v12602_v19, %v12602_v19 }
  0x8e   :  { %6067 = vmatprep.subr.bf16.mxu0 %v10549_v21  ;;  %v10578_v46 = vld [vmem:[#allocation2 + $0x3cc] ss:$80 sps:$4 sm:$0xff]   ;;  %v10581_v47 = vld [vmem:[#allocation2 + $0x500] ss:$80 sps:$4 sm:$0xff]   ;;  %v10585_v48 = vld [vmem:[#allocation2 + $0x5a4] ss:$80 sps:$4 sm:$0xff]  }
  0x8f   :  { %6093 = vmatprep.mubr.bf16.mxu0 %v12611_v25  ;;  %10156 = vmatmul.mubr.msk.bf16.vlgmr.msra.gmra.mrb[0].mxu1 %vm6057_vm0, %v12615_v27  ;;  %v10576_v49 = vld [vmem:[#allocation2 + $0x3c8] ss:$80 sps:$4 sm:$0xff]   ;;  %v10584_v50 = vld [vmem:[#allocation2 + $0x46c] ss:$80 sps:$4 sm:$0xff]   ;;  %v10587_v51 = vld [vmem:[#allocation2 + $0x5a0] ss:$80 sps:$4 sm:$0xff]  }
  0x90   :  { %6226 = vmatpush1.bf16.msra.mxu1 %v10539_v22  ;;  %6257 = vmatprep.mubr.bf16.mxu1 %v12611_v25  ;;  %v10591_v52 = vld [vmem:[#allocation2 + $0x644] ss:$80 sps:$4 sm:$0xff]   ;;  %v10582_v53 = vld [vmem:[#allocation2 + $0x468] ss:$80 sps:$4 sm:$0xff]   ;;  %v10590_v54 = vld [vmem:[#allocation2 + $0x50c] ss:$80 sps:$4 sm:$0xff]  }
  0x91   :  { %6068 = vmatpush1.bf16.msra.mxu0 %v10551_v26  ;;  %6227 = vmatprep.subr.bf16.mxu1 %v10548_v24  ;;  %v10593_v55 = vld [vmem:[#allocation2 + $0x640] ss:$80 sps:$4 sm:$0xff]   ;;  %v10597_v56 = vld [vmem:[#allocation2 + $0x6e4] ss:$80 sps:$4 sm:$0xff]   ;;  %v10588_v57 = vld [vmem:[#allocation2 + $0x508] ss:$80 sps:$4 sm:$0xff]   ;;  %v12627_v24 = vcombine.high %v12611_v25, %v12611_v25 }
  0x92   :  { %6069 = vmatprep.subr.bf16.mxu0 %v10555_v28  ;;  %v10596_v58 = vld [vmem:[#allocation2 + $0x5ac] ss:$80 sps:$4 sm:$0xff]   ;;  %v10599_v59 = vld [vmem:[#allocation2 + $0x6e0] ss:$80 sps:$4 sm:$0xff]   ;;  %v10603_v60 = vld [vmem:[#allocation2 + $0x784] ss:$80 sps:$4 sm:$0xff]  }
  0x93   :  { %v10594_v61 = vld [vmem:[#allocation2 + $0x5a8] ss:$80 sps:$4 sm:$0xff]   ;;  %v10602_v62 = vld [vmem:[#allocation2 + $0x64c] ss:$80 sps:$4 sm:$0xff]   ;;  %v10605_v63 = vld [vmem:[#allocation2 + $0x780] ss:$80 sps:$4 sm:$0xff]  }
  0x94   :  { %6228 = vmatpush1.bf16.msra.mxu1 %v10546_v29  ;;  %v10609_v1 = vld [vmem:[#allocation2 + $0x824] ss:$80 sps:$4 sm:$0xff]   ;;  %v10600_v2 = vld [vmem:[#allocation2 + $0x648] ss:$80 sps:$4 sm:$0xff]   ;;  %v10608_v3 = vld [vmem:[#allocation2 + $0x6ec] ss:$80 sps:$4 sm:$0xff]  }
  0x95   :  { %6070 = vmatpush1.bf16.msra.mxu0 %v10557_v31  ;;  %6229 = vmatprep.subr.bf16.mxu1 %v10554_v30  ;;  %v10611_v4 = vld [vmem:[#allocation2 + $0x820] ss:$80 sps:$4 sm:$0xff]   ;;  %v10615_v5 = vld [vmem:[#allocation2 + $0x8c4] ss:$80 sps:$4 sm:$0xff]   ;;  %v10606_v7 = vld [vmem:[#allocation2 + $0x6e8] ss:$80 sps:$4 sm:$0xff]   ;;  %v12634_v31 = vrot.slane %v1119_v17, %v12593_v12 }
  0x96   :  { %6071 = vmatprep.subr.bf16.mxu0 %v10561_v32  ;;  %v10614_v8 = vld [vmem:[#allocation2 + $0x78c] ss:$80 sps:$4 sm:$0xff]   ;;  %v10617_v9 = vld [vmem:[#allocation2 + $0x8c0] ss:$80 sps:$4 sm:$0xff]   ;;  %v10621_v10 = vld [vmem:[#allocation2 + $0x964] ss:$80 sps:$4 sm:$0xff]  }
  0x97   :  { %v10612_v11 = vld [vmem:[#allocation2 + $0x788] ss:$80 sps:$4 sm:$0xff]   ;;  %v10620_v13 = vld [vmem:[#allocation2 + $0x82c] ss:$80 sps:$4 sm:$0xff]   ;;  %v10623_v14 = vld [vmem:[#allocation2 + $0x960] ss:$80 sps:$4 sm:$0xff]  }
  0x98   :  { %6230 = vmatpush1.bf16.msra.mxu1 %v10552_v33  ;;  %v10629_v15 = vld [vmem:[#allocation2 + $0xa04] ss:$80 sps:$4 sm:$0xff]   ;;  %v10618_v16 = vld [vmem:[#allocation2 + $0x828] ss:$80 sps:$4 sm:$0xff]   ;;  %v10626_v18 = vld [vmem:[#allocation2 + $0x8cc] ss:$80 sps:$4 sm:$0xff]  }
  0x99   :  { %6072 = vmatpush1.bf16.msra.mxu0 %v10563_v35  ;;  %6231 = vmatprep.subr.bf16.mxu1 %v10560_v34  ;;  %v10627_v21 = vld [vmem:[#allocation2 + $0xa00] ss:$80 sps:$4 sm:$0xff]   ;;  %v10635_v22 = vld [vmem:[#allocation2 + $0xaa4] ss:$80 sps:$4 sm:$0xff]   ;;  %v10624_v26 = vld [vmem:[#allocation2 + $0x8c8] ss:$80 sps:$4 sm:$0xff]  }
  0x9a   :  { %6073 = vmatprep.subr.bf16.mxu0 %v10567_v36  ;;  %v10632_v28 = vld [vmem:[#allocation2 + $0x96c] ss:$80 sps:$4 sm:$0xff]   ;;  %v10633_v29 = vld [vmem:[#allocation2 + $0xaa0] ss:$80 sps:$4 sm:$0xff]   ;;  %v10641_v30 = vld [vmem:[#allocation2 + $0xb44] ss:$80 sps:$4 sm:$0xff]  }
  0x9b   :  { %v10630_v32 = vld [vmem:[#allocation2 + $0x968] ss:$80 sps:$4 sm:$0xff]   ;;  %v10638_v33 = vld [vmem:[#allocation2 + $0xa0c] ss:$80 sps:$4 sm:$0xff]   ;;  %v10639_v34 = vld [vmem:[#allocation2 + $0xb40] ss:$80 sps:$4 sm:$0xff]  }
  0x9c   :  { %6232 = vmatpush1.bf16.msra.mxu1 %v10558_v37  ;;  %v10647_v35 = vld [vmem:[#allocation2 + $0xbe4] ss:$80 sps:$4 sm:$0xff]   ;;  %v10636_v36 = vld [vmem:[#allocation2 + $0xa08] ss:$80 sps:$4 sm:$0xff]   ;;  %v10644_v37 = vld [vmem:[#allocation2 + $0xaac] ss:$80 sps:$4 sm:$0xff]  }
  0x9d   :  { %6074 = vmatpush1.bf16.msra.mxu0 %v10569_v39  ;;  %6233 = vmatprep.subr.bf16.mxu1 %v10566_v38  ;;  %v10645_v19 = vld [vmem:[#allocation2 + $0xbe0] ss:$80 sps:$4 sm:$0xff]   ;;  %v10653_v38 = vld [vmem:[#allocation2 + $0xc84] ss:$80 sps:$4 sm:$0xff]   ;;  %v10642_v12 = vld [vmem:[#allocation2 + $0xaa8] ss:$80 sps:$4 sm:$0xff]  }
  0x9e   :  { %6075 = vmatprep.subr.bf16.mxu0 %v10573_v40  ;;  %v10650_v39 = vld [vmem:[#allocation2 + $0xb4c] ss:$80 sps:$4 sm:$0xff]   ;;  %v10651_v40 = vld [vmem:[#allocation2 + $0xc80] ss:$80 sps:$4 sm:$0xff]   ;;  %vm9113_vm2 = vcmask 261120  }
  0x9f   :  { %v10717_v17 = vld [vmem:[#allocation2 + $0x1360] ss:$80 sps:$4 sm:$0xff]  }
  0xa0   :  { %6234 = vmatpush1.bf16.msra.mxu1 %v10564_v41  ;;  %v10659_v41 = vld [vmem:[#allocation2 + $0xd24] ss:$80 sps:$4 sm:$0xff]  }
  0xa1   :  { %6076 = vmatpush1.bf16.msra.mxu0 %v10575_v43  ;;  %6235 = vmatprep.subr.bf16.mxu1 %v10572_v42  ;;  %v10648_v42 = vld [vmem:[#allocation2 + $0xb48] ss:$80 sps:$4 sm:$0xff]   ;;  %v10656_v43 = vld [vmem:[#allocation2 + $0xbec] ss:$80 sps:$4 sm:$0xff]  }
  0xa2   :  { %6077 = vmatprep.subr.bf16.mxu0 %v10579_v44  ;;  %v10657_v44 = vld [vmem:[#allocation2 + $0xd20] ss:$80 sps:$4 sm:$0xff]  }
  0xa4   :  { %6236 = vmatpush1.bf16.msra.mxu1 %v10570_v45  ;;  %v10665_v45 = vld [vmem:[#allocation2 + $0xdc4] ss:$80 sps:$4 sm:$0xff]  }
  0xa5   :  { %6078 = vmatpush1.bf16.msra.mxu0 %v10581_v47  ;;  %6237 = vmatprep.subr.bf16.mxu1 %v10578_v46  ;;  %v10654_v46 = vld [vmem:[#allocation2 + $0xbe8] ss:$80 sps:$4 sm:$0xff]   ;;  %v10662_v47 = vld [vmem:[#allocation2 + $0xc8c] ss:$80 sps:$4 sm:$0xff]  }
  0xa6   :  { %6079 = vmatprep.subr.bf16.mxu0 %v10585_v48  ;;  %v10663_v48 = vld [vmem:[#allocation2 + $0xdc0] ss:$80 sps:$4 sm:$0xff]  }
  0xa8   :  { %6238 = vmatpush1.bf16.msra.mxu1 %v10576_v49  ;;  %v10671_v49 = vld [vmem:[#allocation2 + $0xe64] ss:$80 sps:$4 sm:$0xff]  }
  0xa9   :  { %6080 = vmatpush1.bf16.msra.mxu0 %v10587_v51  ;;  %6239 = vmatprep.subr.bf16.mxu1 %v10584_v50  ;;  %v10660_v50 = vld [vmem:[#allocation2 + $0xc88] ss:$80 sps:$4 sm:$0xff]   ;;  %v10668_v51 = vld [vmem:[#allocation2 + $0xd2c] ss:$80 sps:$4 sm:$0xff]  }
  0xaa   :  { %6081 = vmatprep.subr.bf16.mxu0 %v10591_v52  ;;  %v10669_v52 = vld [vmem:[#allocation2 + $0xe60] ss:$80 sps:$4 sm:$0xff]  }
  0xac   :  { %6240 = vmatpush1.bf16.msra.mxu1 %v10582_v53  ;;  %v10677_v53 = vld [vmem:[#allocation2 + $0xf04] ss:$80 sps:$4 sm:$0xff]  }
  0xad   :  { %6082 = vmatpush1.bf16.msra.mxu0 %v10593_v55  ;;  %6241 = vmatprep.subr.bf16.mxu1 %v10590_v54  ;;  %v10666_v54 = vld [vmem:[#allocation2 + $0xd28] ss:$80 sps:$4 sm:$0xff]   ;;  %v10674_v55 = vld [vmem:[#allocation2 + $0xdcc] ss:$80 sps:$4 sm:$0xff]  }
  0xae   :  { %6083 = vmatprep.subr.bf16.mxu0 %v10597_v56  ;;  %v10675_v56 = vld [vmem:[#allocation2 + $0xf00] ss:$80 sps:$4 sm:$0xff]  }
  0xb0   :  { %6242 = vmatpush1.bf16.msra.mxu1 %v10588_v57  ;;  %v10683_v57 = vld [vmem:[#allocation2 + $0xfa4] ss:$80 sps:$4 sm:$0xff]  }
  0xb1   :  { %6084 = vmatpush1.bf16.msra.mxu0 %v10599_v59  ;;  %6243 = vmatprep.subr.bf16.mxu1 %v10596_v58  ;;  %v10672_v58 = vld [vmem:[#allocation2 + $0xdc8] ss:$80 sps:$4 sm:$0xff]   ;;  %v10680_v59 = vld [vmem:[#allocation2 + $0xe6c] ss:$80 sps:$4 sm:$0xff]  }
  0xb2   :  { %6085 = vmatprep.subr.bf16.mxu0 %v10603_v60  ;;  %v10681_v60 = vld [vmem:[#allocation2 + $0xfa0] ss:$80 sps:$4 sm:$0xff]  }
  0xb4   :  { %6244 = vmatpush1.bf16.msra.mxu1 %v10594_v61  ;;  %v10689_v61 = vld [vmem:[#allocation2 + $0x1044] ss:$80 sps:$4 sm:$0xff]  }
  0xb5   :  { %6086 = vmatpush1.bf16.msra.mxu0 %v10605_v63  ;;  %6245 = vmatprep.subr.bf16.mxu1 %v10602_v62  ;;  %v10678_v62 = vld [vmem:[#allocation2 + $0xe68] ss:$80 sps:$4 sm:$0xff]   ;;  %v10686_v63 = vld [vmem:[#allocation2 + $0xf0c] ss:$80 sps:$4 sm:$0xff]  }
  0xb6   :  { %6087 = vmatprep.subr.bf16.mxu0 %v10609_v1  ;;  %v10687_v1 = vld [vmem:[#allocation2 + $0x1040] ss:$80 sps:$4 sm:$0xff]  }
  0xb8   :  { %6246 = vmatpush1.bf16.msra.mxu1 %v10600_v2  ;;  %v10695_v2 = vld [vmem:[#allocation2 + $0x10e4] ss:$80 sps:$4 sm:$0xff]  }
  0xb9   :  { %6088 = vmatpush1.bf16.msra.mxu0 %v10611_v4  ;;  %6247 = vmatprep.subr.bf16.mxu1 %v10608_v3  ;;  %v10684_v3 = vld [vmem:[#allocation2 + $0xf08] ss:$80 sps:$4 sm:$0xff]   ;;  %v10692_v4 = vld [vmem:[#allocation2 + $0xfac] ss:$80 sps:$4 sm:$0xff]  }
  0xba   :  { %6089 = vmatprep.subr.bf16.mxu0 %v10615_v5  ;;  %v10693_v5 = vld [vmem:[#allocation2 + $0x10e0] ss:$80 sps:$4 sm:$0xff]  }
  0xbc   :  { %6248 = vmatpush1.bf16.msra.mxu1 %v10606_v7  ;;  %v10701_v7 = vld [vmem:[#allocation2 + $0x1184] ss:$80 sps:$4 sm:$0xff]  }
  0xbd   :  { %6090 = vmatpush1.bf16.msra.mxu0 %v10617_v9  ;;  %6249 = vmatprep.subr.bf16.mxu1 %v10614_v8  ;;  %v10690_v8 = vld [vmem:[#allocation2 + $0xfa8] ss:$80 sps:$4 sm:$0xff]   ;;  %v10698_v9 = vld [vmem:[#allocation2 + $0x104c] ss:$80 sps:$4 sm:$0xff]  }
  0xbe   :  { %6091 = vmatprep.subr.bf16.mxu0 %v10621_v10  ;;  %v10699_v10 = vld [vmem:[#allocation2 + $0x1180] ss:$80 sps:$4 sm:$0xff]  }
  0xc0   :  { %6250 = vmatpush1.bf16.msra.mxu1 %v10612_v11  ;;  %v10707_v11 = vld [vmem:[#allocation2 + $0x1224] ss:$80 sps:$4 sm:$0xff]  }
  0xc1   :  { %6092 = vmatpush1.bf16.msra.mxu0 %v10623_v14  ;;  %6251 = vmatprep.subr.bf16.mxu1 %v10620_v13  ;;  %v10696_v13 = vld [vmem:[#allocation2 + $0x1048] ss:$80 sps:$4 sm:$0xff]   ;;  %v10704_v14 = vld [vmem:[#allocation2 + $0x10ec] ss:$80 sps:$4 sm:$0xff]  }
  0xc2   :  { %6102 = vmatprep.subr.bf16.mxu0 %v10629_v15  ;;  %v10705_v15 = vld [vmem:[#allocation2 + $0x1220] ss:$80 sps:$4 sm:$0xff]  }
  0xc4   :  { %6094 = vmatmul.mubr.bf16.vlgmr.msra.gmra.mrb[0].mxu0 %v12623_v20  ;;  %6252 = vmatpush1.bf16.msra.mxu1 %v10618_v16  ;;  %v10713_v16 = vld [vmem:[#allocation2 + $0x12c4] ss:$80 sps:$4 sm:$0xff]  }
  0xc5   :  { %6103 = vmatpush1.bf16.msra.mxu0 %v10627_v21  ;;  %6253 = vmatprep.subr.bf16.mxu1 %v10626_v18  ;;  %v10702_v18 = vld [vmem:[#allocation2 + $0x10e8] ss:$80 sps:$4 sm:$0xff]   ;;  %v10710_v21 = vld [vmem:[#allocation2 + $0x118c] ss:$80 sps:$4 sm:$0xff]  }
  0xc6   :  { %6104 = vmatprep.subr.bf16.mxu0 %v10635_v22  ;;  %6134 = vmatprep.mubr.bf16.mxu0 %v12627_v24  ;;  %v10711_v22 = vld [vmem:[#allocation2 + $0x12c0] ss:$80 sps:$4 sm:$0xff]  }
  0xc8   :  { %6254 = vmatpush1.bf16.msra.mxu1 %v10624_v26  ;;  %v10719_v26 = vld [vmem:[#allocation2 + $0x1364] ss:$80 sps:$4 sm:$0xff]  }
  0xc9   :  { %6105 = vmatpush1.bf16.msra.mxu0 %v10633_v29  ;;  %6255 = vmatprep.subr.bf16.mxu1 %v10632_v28  ;;  %v10708_v28 = vld [vmem:[#allocation2 + $0x1188] ss:$80 sps:$4 sm:$0xff]   ;;  %v10716_v29 = vld [vmem:[#allocation2 + $0x122c] ss:$80 sps:$4 sm:$0xff]  }
  0xca   :  { %6106 = vmatprep.subr.bf16.mxu0 %v10641_v30  ;;  %v10725_v30 = vld [vmem:[#allocation2 + $0x1404] ss:$80 sps:$4 sm:$0xff]  }
  0xcc   :  { %6256 = vmatpush1.bf16.msra.mxu1 %v10630_v32  ;;  %v10714_v32 = vld [vmem:[#allocation2 + $0x1228] ss:$80 sps:$4 sm:$0xff]  }
  0xcd   :  { %6107 = vmatpush1.bf16.msra.mxu0 %v10639_v34  ;;  %6266 = vmatprep.subr.bf16.mxu1 %v10638_v33  ;;  %v10722_v33 = vld [vmem:[#allocation2 + $0x12cc] ss:$80 sps:$4 sm:$0xff]   ;;  %v12640_v34 = vcombine.high %v12623_v20, %v12623_v20 }
  0xce   :  { %6108 = vmatprep.subr.bf16.mxu0 %v10647_v35  ;;  %v10723_v35 = vld [vmem:[#allocation2 + $0x1400] ss:$80 sps:$4 sm:$0xff]  }
  0xcf   :  { %6258 = vmatmul.mubr.bf16.vlgmr.msra.gmra.mrb[4].mxu1 %v12623_v20 }
  0xd0   :  { %6267 = vmatpush1.bf16.msra.mxu1 %v10636_v36  ;;  %6298 = vmatprep.mubr.bf16.mxu1 %v12627_v24  ;;  %v10731_v36 = vld [vmem:[#allocation2 + $0x14a4] ss:$80 sps:$4 sm:$0xff]  }
  0xd1   :  { %6109 = vmatpush1.bf16.msra.mxu0 %v10645_v19  ;;  %6268 = vmatprep.subr.bf16.mxu1 %v10644_v37  ;;  %v10720_v37 = vld [vmem:[#allocation2 + $0x12c8] ss:$80 sps:$4 sm:$0xff]   ;;  %v10728_v19 = vld [vmem:[#allocation2 + $0x136c] ss:$80 sps:$4 sm:$0xff]  }
  0xd2   :  { %6110 = vmatprep.subr.bf16.mxu0 %v10653_v38  ;;  %v10729_v38 = vld [vmem:[#allocation2 + $0x14a0] ss:$80 sps:$4 sm:$0xff]  }
  0xd4   :  { %6269 = vmatpush1.bf16.msra.mxu1 %v10642_v12  ;;  %v10737_v12 = vld [vmem:[#allocation2 + $0x1544] ss:$80 sps:$4 sm:$0xff]  }
  0xd5   :  { %6111 = vmatpush1.bf16.msra.mxu0 %v10651_v40  ;;  %6270 = vmatprep.subr.bf16.mxu1 %v10650_v39  ;;  %v10726_v39 = vld [vmem:[#allocation2 + $0x1368] ss:$80 sps:$4 sm:$0xff]   ;;  %v10734_v40 = vld [vmem:[#allocation2 + $0x140c] ss:$80 sps:$4 sm:$0xff]  }
  0xd6   :  { %6112 = vmatprep.subr.bf16.mxu0 %v10659_v41  ;;  %v10735_v41 = vld [vmem:[#allocation2 + $0x1540] ss:$80 sps:$4 sm:$0xff]  }
  0xd8   :  { %6271 = vmatpush1.bf16.msra.mxu1 %v10648_v42  ;;  %v10743_v42 = vld [vmem:[#allocation2 + $0x15e4] ss:$80 sps:$4 sm:$0xff]  }
  0xd9   :  { %6113 = vmatpush1.bf16.msra.mxu0 %v10657_v44  ;;  %6272 = vmatprep.subr.bf16.mxu1 %v10656_v43  ;;  %v10732_v43 = vld [vmem:[#allocation2 + $0x1408] ss:$80 sps:$4 sm:$0xff]   ;;  %v10740_v44 = vld [vmem:[#allocation2 + $0x14ac] ss:$80 sps:$4 sm:$0xff]  }
  0xda   :  { %6114 = vmatprep.subr.bf16.mxu0 %v10665_v45  ;;  %v10741_v45 = vld [vmem:[#allocation2 + $0x15e0] ss:$80 sps:$4 sm:$0xff]  }
  0xdc   :  { %6273 = vmatpush1.bf16.msra.mxu1 %v10654_v46  ;;  %v10749_v46 = vld [vmem:[#allocation2 + $0x1684] ss:$80 sps:$4 sm:$0xff]  }
  0xdd   :  { %6115 = vmatpush1.bf16.msra.mxu0 %v10663_v48  ;;  %6274 = vmatprep.subr.bf16.mxu1 %v10662_v47  ;;  %v10738_v47 = vld [vmem:[#allocation2 + $0x14a8] ss:$80 sps:$4 sm:$0xff]   ;;  %v10746_v48 = vld [vmem:[#allocation2 + $0x154c] ss:$80 sps:$4 sm:$0xff]  }
  0xde   :  { %6116 = vmatprep.subr.bf16.mxu0 %v10671_v49  ;;  %v10747_v49 = vld [vmem:[#allocation2 + $0x1680] ss:$80 sps:$4 sm:$0xff]  }
  0xe0   :  { %6275 = vmatpush1.bf16.msra.mxu1 %v10660_v50  ;;  %v10755_v50 = vld [vmem:[#allocation2 + $0x1724] ss:$80 sps:$4 sm:$0xff]  }
  0xe1   :  { %6117 = vmatpush1.bf16.msra.mxu0 %v10669_v52  ;;  %6276 = vmatprep.subr.bf16.mxu1 %v10668_v51  ;;  %v10744_v51 = vld [vmem:[#allocation2 + $0x1548] ss:$80 sps:$4 sm:$0xff]   ;;  %v10752_v52 = vld [vmem:[#allocation2 + $0x15ec] ss:$80 sps:$4 sm:$0xff]  }
  0xe2   :  { %6118 = vmatprep.subr.bf16.mxu0 %v10677_v53  ;;  %v10753_v53 = vld [vmem:[#allocation2 + $0x1720] ss:$80 sps:$4 sm:$0xff]  }
  0xe4   :  { %6277 = vmatpush1.bf16.msra.mxu1 %v10666_v54  ;;  %v10761_v54 = vld [vmem:[#allocation2 + $0x17c4] ss:$80 sps:$4 sm:$0xff]  }
  0xe5   :  { %6119 = vmatpush1.bf16.msra.mxu0 %v10675_v56  ;;  %6278 = vmatprep.subr.bf16.mxu1 %v10674_v55  ;;  %v10750_v55 = vld [vmem:[#allocation2 + $0x15e8] ss:$80 sps:$4 sm:$0xff]   ;;  %v10758_v56 = vld [vmem:[#allocation2 + $0x168c] ss:$80 sps:$4 sm:$0xff]  }
  0xe6   :  { %6120 = vmatprep.subr.bf16.mxu0 %v10683_v57  ;;  %v10759_v57 = vld [vmem:[#allocation2 + $0x17c0] ss:$80 sps:$4 sm:$0xff]  }
  0xe8   :  { %6279 = vmatpush1.bf16.msra.mxu1 %v10672_v58  ;;  %v10767_v58 = vld [vmem:[#allocation2 + $0x1864] ss:$80 sps:$4 sm:$0xff]  }
  0xe9   :  { %6121 = vmatpush1.bf16.msra.mxu0 %v10681_v60  ;;  %6280 = vmatprep.subr.bf16.mxu1 %v10680_v59  ;;  %v10756_v59 = vld [vmem:[#allocation2 + $0x1688] ss:$80 sps:$4 sm:$0xff]   ;;  %v10764_v60 = vld [vmem:[#allocation2 + $0x172c] ss:$80 sps:$4 sm:$0xff]  }
  0xea   :  { %6122 = vmatprep.subr.bf16.mxu0 %v10689_v61  ;;  %v10765_v61 = vld [vmem:[#allocation2 + $0x1860] ss:$80 sps:$4 sm:$0xff]  }
  0xec   :  { %6281 = vmatpush1.bf16.msra.mxu1 %v10678_v62  ;;  %v10773_v62 = vld [vmem:[#allocation2 + $0x1904] ss:$80 sps:$4 sm:$0xff]  }
  0xed   :  { %6123 = vmatpush1.bf16.msra.mxu0 %v10687_v1  ;;  %6282 = vmatprep.subr.bf16.mxu1 %v10686_v63  ;;  %v10762_v63 = vld [vmem:[#allocation2 + $0x1728] ss:$80 sps:$4 sm:$0xff]   ;;  %v10770_v1 = vld [vmem:[#allocation2 + $0x17cc] ss:$80 sps:$4 sm:$0xff]  }
  0xee   :  { %6124 = vmatprep.subr.bf16.mxu0 %v10695_v2  ;;  %v10771_v2 = vld [vmem:[#allocation2 + $0x1900] ss:$80 sps:$4 sm:$0xff]  }
  0xf0   :  { %6283 = vmatpush1.bf16.msra.mxu1 %v10684_v3  ;;  %v10779_v3 = vld [vmem:[#allocation2 + $0x19a4] ss:$80 sps:$4 sm:$0xff]  }
  0xf1   :  { %6125 = vmatpush1.bf16.msra.mxu0 %v10693_v5  ;;  %6284 = vmatprep.subr.bf16.mxu1 %v10692_v4  ;;  %v10768_v4 = vld [vmem:[#allocation2 + $0x17c8] ss:$80 sps:$4 sm:$0xff]   ;;  %v10776_v5 = vld [vmem:[#allocation2 + $0x186c] ss:$80 sps:$4 sm:$0xff]  }
  0xf2   :  { %6126 = vmatprep.subr.bf16.mxu0 %v10701_v7  ;;  %v10777_v7 = vld [vmem:[#allocation2 + $0x19a0] ss:$80 sps:$4 sm:$0xff]  }
  0xf4   :  { %6285 = vmatpush1.bf16.msra.mxu1 %v10690_v8  ;;  %v10785_v8 = vld [vmem:[#allocation2 + $0x1a44] ss:$80 sps:$4 sm:$0xff]  }
  0xf5   :  { %6127 = vmatpush1.bf16.msra.mxu0 %v10699_v10  ;;  %6286 = vmatprep.subr.bf16.mxu1 %v10698_v9  ;;  %v10774_v9 = vld [vmem:[#allocation2 + $0x1868] ss:$80 sps:$4 sm:$0xff]   ;;  %v10782_v10 = vld [vmem:[#allocation2 + $0x190c] ss:$80 sps:$4 sm:$0xff]  }
  0xf6   :  { %6128 = vmatprep.subr.bf16.mxu0 %v10707_v11  ;;  %v10783_v11 = vld [vmem:[#allocation2 + $0x1a40] ss:$80 sps:$4 sm:$0xff]  }
  0xf8   :  { %6287 = vmatpush1.bf16.msra.mxu1 %v10696_v13  ;;  %v10791_v13 = vld [vmem:[#allocation2 + $0x1ae4] ss:$80 sps:$4 sm:$0xff]  }
  0xf9   :  { %6129 = vmatpush1.bf16.msra.mxu0 %v10705_v15  ;;  %6288 = vmatprep.subr.bf16.mxu1 %v10704_v14  ;;  %v10780_v14 = vld [vmem:[#allocation2 + $0x1908] ss:$80 sps:$4 sm:$0xff]   ;;  %v10788_v15 = vld [vmem:[#allocation2 + $0x19ac] ss:$80 sps:$4 sm:$0xff]  }
  0xfa   :  { %6130 = vmatprep.subr.bf16.mxu0 %v10713_v16  ;;  %v10789_v16 = vld [vmem:[#allocation2 + $0x1ae0] ss:$80 sps:$4 sm:$0xff]  }
  0xfc   :  { %6289 = vmatpush1.bf16.msra.mxu1 %v10702_v18  ;;  %v10797_v18 = vld [vmem:[#allocation2 + $0x1b84] ss:$80 sps:$4 sm:$0xff]  }
  0xfd   :  { %6131 = vmatpush1.bf16.msra.mxu0 %v10711_v22  ;;  %6290 = vmatprep.subr.bf16.mxu1 %v10710_v21  ;;  %v10786_v21 = vld [vmem:[#allocation2 + $0x19a8] ss:$80 sps:$4 sm:$0xff]   ;;  %v10794_v22 = vld [vmem:[#allocation2 + $0x1a4c] ss:$80 sps:$4 sm:$0xff]  }
  0xfe   :  { %6132 = vmatprep.subr.bf16.mxu0 %v10719_v26  ;;  %v10795_v26 = vld [vmem:[#allocation2 + $0x1b80] ss:$80 sps:$4 sm:$0xff]  }
 0x100   :  { %6291 = vmatpush1.bf16.msra.mxu1 %v10708_v28  ;;  %v10803_v28 = vld [vmem:[#allocation2 + $0x1c24] ss:$80 sps:$4 sm:$0xff]  }
 0x101   :  { %6133 = vmatpush1.bf16.msra.mxu0 %v10717_v17  ;;  %6292 = vmatprep.subr.bf16.mxu1 %v10716_v29  ;;  %v10792_v29 = vld [vmem:[#allocation2 + $0x1a48] ss:$80 sps:$4 sm:$0xff]   ;;  %v10800_v17 = vld [vmem:[#allocation2 + $0x1aec] ss:$80 sps:$4 sm:$0xff]  }
 0x102   :  { %6143 = vmatprep.subr.bf16.mxu0 %v10725_v30  ;;  %v10801_v30 = vld [vmem:[#allocation2 + $0x1c20] ss:$80 sps:$4 sm:$0xff]  }
 0x104   :  { %6135 = vmatmul.mubr.bf16.vlgmr.msra.gmra.mrb[0].mxu0 %v12640_v34  ;;  %6293 = vmatpush1.bf16.msra.mxu1 %v10714_v32  ;;  %v10809_v32 = vld [vmem:[#allocation2 + $0x1cc4] ss:$80 sps:$4 sm:$0xff]  }
 0x105   :  { %6144 = vmatpush1.bf16.msra.mxu0 %v10723_v35  ;;  %6294 = vmatprep.subr.bf16.mxu1 %v10722_v33  ;;  %v10798_v33 = vld [vmem:[#allocation2 + $0x1ae8] ss:$80 sps:$4 sm:$0xff]   ;;  %v10806_v35 = vld [vmem:[#allocation2 + $0x1b8c] ss:$80 sps:$4 sm:$0xff]  }
 0x106   :  { %6145 = vmatprep.subr.bf16.mxu0 %v10731_v36  ;;  %6175 = vmatprep.mubr.bf16.mxu0 %v12634_v31  ;;  %v10807_v36 = vld [vmem:[#allocation2 + $0x1cc0] ss:$80 sps:$4 sm:$0xff]  }
 0x108   :  { %6295 = vmatpush1.bf16.msra.mxu1 %v10720_v37  ;;  %v10815_v37 = vld [vmem:[#allocation2 + $0x1d64] ss:$80 sps:$4 sm:$0xff]  }
 0x109   :  { %6146 = vmatpush1.bf16.msra.mxu0 %v10729_v38  ;;  %6296 = vmatprep.subr.bf16.mxu1 %v10728_v19  ;;  %v10804_v19 = vld [vmem:[#allocation2 + $0x1b88] ss:$80 sps:$4 sm:$0xff]   ;;  %v10812_v38 = vld [vmem:[#allocation2 + $0x1c2c] ss:$80 sps:$4 sm:$0xff]  }
 0x10a   :  { %6147 = vmatprep.subr.bf16.mxu0 %v10737_v12  ;;  %v10813_v12 = vld [vmem:[#allocation2 + $0x1d60] ss:$80 sps:$4 sm:$0xff]  }
 0x10c   :  { %6297 = vmatpush1.bf16.msra.mxu1 %v10726_v39  ;;  %v10821_v39 = vld [vmem:[#allocation2 + $0x14] ss:$80 sps:$4 sm:$0xff]  }
 0x10d   :  { %6148 = vmatpush1.bf16.msra.mxu0 %v10735_v41  ;;  %6307 = vmatprep.subr.bf16.mxu1 %v10734_v40  ;;  %v10810_v40 = vld [vmem:[#allocation2 + $0x1c28] ss:$80 sps:$4 sm:$0xff]   ;;  %v10818_v41 = vld [vmem:[#allocation2 + $0x1ccc] ss:$80 sps:$4 sm:$0xff]  }
 0x10e   :  { %6149 = vmatprep.subr.bf16.mxu0 %v10743_v42  ;;  %v10819_v42 = vld [vmem:[#allocation2 + $0x10] ss:$80 sps:$4 sm:$0xff]  }
 0x10f   :  { %6299 = vmatmul.mubr.bf16.vlgmr.msra.gmra.mrb[4].mxu1 %v12640_v34 }
 0x110   :  { %6308 = vmatpush1.bf16.msra.mxu1 %v10732_v43  ;;  %6339 = vmatprep.mubr.bf16.mxu1 %v12634_v31  ;;  %v10827_v43 = vld [vmem:[#allocation2 + $0xb4] ss:$80 sps:$4 sm:$0xff]  }
 0x111   :  { %6150 = vmatpush1.bf16.msra.mxu0 %v10741_v45  ;;  %6309 = vmatprep.subr.bf16.mxu1 %v10740_v44  ;;  %v10816_v44 = vld [vmem:[#allocation2 + $0x1cc8] ss:$80 sps:$4 sm:$0xff]   ;;  %v10824_v45 = vld [vmem:[#allocation2 + $0x1d6c] ss:$80 sps:$4 sm:$0xff]  }
 0x112   :  { %6151 = vmatprep.subr.bf16.mxu0 %v10749_v46  ;;  %v10825_v46 = vld [vmem:[#allocation2 + $0xb0] ss:$80 sps:$4 sm:$0xff]  }
 0x114   :  { %6310 = vmatpush1.bf16.msra.mxu1 %v10738_v47  ;;  %v10830_v47 = vld [vmem:[#allocation2 + $0x154] ss:$80 sps:$4 sm:$0xff]  }
 0x115   :  { %6152 = vmatpush1.bf16.msra.mxu0 %v10747_v49  ;;  %6311 = vmatprep.subr.bf16.mxu1 %v10746_v48  ;;  %v10822_v48 = vld [vmem:[#allocation2 + $0x1d68] ss:$80 sps:$4 sm:$0xff]   ;;  %v10828_v49 = vld [vmem:[#allocation2 + $0x150] ss:$80 sps:$4 sm:$0xff]  }
 0x116   :  { %6153 = vmatprep.subr.bf16.mxu0 %v10755_v50  ;;  %v10833_v50 = vld [vmem:[#allocation2 + $0x1f4] ss:$80 sps:$4 sm:$0xff]  }
 0x118   :  { %6312 = vmatpush1.bf16.msra.mxu1 %v10744_v51  ;;  %v10836_v51 = vld [vmem:[#allocation2 + $0x1e0c] ss:$80 sps:$4 sm:$0xff]  }
 0x119   :  { %6154 = vmatpush1.bf16.msra.mxu0 %v10753_v53  ;;  %6313 = vmatprep.subr.bf16.mxu1 %v10752_v52  ;;  %v10831_v52 = vld [vmem:[#allocation2 + $0x1f0] ss:$80 sps:$4 sm:$0xff]   ;;  %v10834_v53 = vld [vmem:[#allocation2 + $0x1e08] ss:$80 sps:$4 sm:$0xff]  }
 0x11a   :  { %6155 = vmatprep.subr.bf16.mxu0 %v10761_v54  ;;  %v10839_v54 = vld [vmem:[#allocation2 + $0x294] ss:$80 sps:$4 sm:$0xff]  }
 0x11c   :  { %6314 = vmatpush1.bf16.msra.mxu1 %v10750_v55  ;;  %v10845_v55 = vld [vmem:[#allocation2 + $0x1e14] ss:$80 sps:$4 sm:$0xff]  }
 0x11d   :  { %6156 = vmatpush1.bf16.msra.mxu0 %v10759_v57  ;;  %6315 = vmatprep.subr.bf16.mxu1 %v10758_v56  ;;  %v10837_v56 = vld [vmem:[#allocation2 + $0x290] ss:$80 sps:$4 sm:$0xff]   ;;  %v10842_v57 = vld [vmem:[#allocation2 + $0x334] ss:$80 sps:$4 sm:$0xff]  }
 0x11e   :  { %6157 = vmatprep.subr.bf16.mxu0 %v10767_v58  ;;  %v10840_v58 = vld [vmem:[#allocation2 + $0x330] ss:$80 sps:$4 sm:$0xff]  }
 0x120   :  { %6316 = vmatpush1.bf16.msra.mxu1 %v10756_v59  ;;  %v10848_v59 = vld [vmem:[#allocation2 + $0x3d4] ss:$80 sps:$4 sm:$0xff]  }
 0x121   :  { %6158 = vmatpush1.bf16.msra.mxu0 %v10765_v61  ;;  %6317 = vmatprep.subr.bf16.mxu1 %v10764_v60  ;;  %v10843_v60 = vld [vmem:[#allocation2 + $0x1e10] ss:$80 sps:$4 sm:$0xff]  }
 0x122   :  { %6159 = vmatprep.subr.bf16.mxu0 %v10773_v62  ;;  %v10846_v61 = vld [vmem:[#allocation2 + $0x3d0] ss:$80 sps:$4 sm:$0xff]   ;;  %v10851_v62 = vld [vmem:[#allocation2 + $0x1c] ss:$80 sps:$4 sm:$0xff]  }
 0x124   :  { %6318 = vmatpush1.bf16.msra.mxu1 %v10762_v63  ;;  %v10854_v63 = vld [vmem:[#allocation2 + $0x474] ss:$80 sps:$4 sm:$0xff]  }
 0x125   :  { %6160 = vmatpush1.bf16.msra.mxu0 %v10771_v2  ;;  %6319 = vmatprep.subr.bf16.mxu1 %v10770_v1  ;;  %v10852_v1 = vld [vmem:[#allocation2 + $0x470] ss:$80 sps:$4 sm:$0xff]   ;;  %v10860_v2 = vld [vmem:[#allocation2 + $0x514] ss:$80 sps:$4 sm:$0xff]  }
 0x126   :  { %6161 = vmatprep.subr.bf16.mxu0 %v10779_v3  ;;  %v10849_v3 = vld [vmem:[#allocation2 + $0x18] ss:$80 sps:$4 sm:$0xff]  }
 0x128   :  { %6320 = vmatpush1.bf16.msra.mxu1 %v10768_v4  ;;  %v10857_v4 = vld [vmem:[#allocation2 + $0xbc] ss:$80 sps:$4 sm:$0xff]  }
 0x129   :  { %6162 = vmatpush1.bf16.msra.mxu0 %v10777_v7  ;;  %6321 = vmatprep.subr.bf16.mxu1 %v10776_v5  ;;  %v10858_v5 = vld [vmem:[#allocation2 + $0x510] ss:$80 sps:$4 sm:$0xff]   ;;  %v10866_v7 = vld [vmem:[#allocation2 + $0x5b4] ss:$80 sps:$4 sm:$0xff]  }
 0x12a   :  { %6163 = vmatprep.subr.bf16.mxu0 %v10785_v8 }
 0x12c   :  { %6322 = vmatpush1.bf16.msra.mxu1 %v10774_v9  ;;  %v10855_v9 = vld [vmem:[#allocation2 + $0xb8] ss:$80 sps:$4 sm:$0xff]  }
 0x12d   :  { %6164 = vmatpush1.bf16.msra.mxu0 %v10783_v11  ;;  %6323 = vmatprep.subr.bf16.mxu1 %v10782_v10  ;;  %v10863_v11 = vld [vmem:[#allocation2 + $0x15c] ss:$80 sps:$4 sm:$0xff]  }
 0x12e   :  { %6165 = vmatprep.subr.bf16.mxu0 %v10791_v13 }
 0x130   :  { %6324 = vmatpush1.bf16.msra.mxu1 %v10780_v14  ;;  %v10864_v14 = vld [vmem:[#allocation2 + $0x5b0] ss:$80 sps:$4 sm:$0xff]  }
 0x131   :  { %6166 = vmatpush1.bf16.msra.mxu0 %v10789_v16  ;;  %6325 = vmatprep.subr.bf16.mxu1 %v10788_v15  ;;  %v10872_v16 = vld [vmem:[#allocation2 + $0x654] ss:$80 sps:$4 sm:$0xff]  }
 0x132   :  { %6167 = vmatprep.subr.bf16.mxu0 %v10797_v18  ;;  %v10861_v18 = vld [vmem:[#allocation2 + $0x158] ss:$80 sps:$4 sm:$0xff]  }
 0x134   :  { %6326 = vmatpush1.bf16.msra.mxu1 %v10786_v21  ;;  %v10869_v21 = vld [vmem:[#allocation2 + $0x1fc] ss:$80 sps:$4 sm:$0xff]  }
 0x135   :  { %6168 = vmatpush1.bf16.msra.mxu0 %v10795_v26  ;;  %6327 = vmatprep.subr.bf16.mxu1 %v10794_v22  ;;  %v10870_v22 = vld [vmem:[#allocation2 + $0x650] ss:$80 sps:$4 sm:$0xff]   ;;  %v10878_v26 = vld [vmem:[#allocation2 + $0x6f4] ss:$80 sps:$4 sm:$0xff]  }
 0x136   :  { %6169 = vmatprep.subr.bf16.mxu0 %v10803_v28  ;;  %v10867_v28 = vld [vmem:[#allocation2 + $0x1f8] ss:$80 sps:$4 sm:$0xff]  }
 0x138   :  { %6328 = vmatpush1.bf16.msra.mxu1 %v10792_v29  ;;  %v10875_v29 = vld [vmem:[#allocation2 + $0x29c] ss:$80 sps:$4 sm:$0xff]  }
 0x139   :  { %6170 = vmatpush1.bf16.msra.mxu0 %v10801_v30  ;;  %6329 = vmatprep.subr.bf16.mxu1 %v10800_v17  ;;  %v10876_v17 = vld [vmem:[#allocation2 + $0x6f0] ss:$80 sps:$4 sm:$0xff]   ;;  %v10884_v30 = vld [vmem:[#allocation2 + $0x794] ss:$80 sps:$4 sm:$0xff]  }
 0x13a   :  { %6171 = vmatprep.subr.bf16.mxu0 %v10809_v32  ;;  %v10873_v32 = vld [vmem:[#allocation2 + $0x298] ss:$80 sps:$4 sm:$0xff]  }
 0x13c   :  { %6330 = vmatpush1.bf16.msra.mxu1 %v10798_v33  ;;  %v10881_v33 = vld [vmem:[#allocation2 + $0x33c] ss:$80 sps:$4 sm:$0xff]  }
 0x13d   :  { %6172 = vmatpush1.bf16.msra.mxu0 %v10807_v36  ;;  %6331 = vmatprep.subr.bf16.mxu1 %v10806_v35  ;;  %v10882_v35 = vld [vmem:[#allocation2 + $0x790] ss:$80 sps:$4 sm:$0xff]   ;;  %v10890_v36 = vld [vmem:[#allocation2 + $0x834] ss:$80 sps:$4 sm:$0xff]  }
 0x13e   :  { %6173 = vmatprep.subr.bf16.mxu0 %v10815_v37  ;;  %v10879_v37 = vld [vmem:[#allocation2 + $0x338] ss:$80 sps:$4 sm:$0xff]  }
 0x140   :  { %6332 = vmatpush1.bf16.msra.mxu1 %v10804_v19  ;;  %v10887_v19 = vld [vmem:[#allocation2 + $0x3dc] ss:$80 sps:$4 sm:$0xff]  }
 0x141   :  { %6174 = vmatpush1.bf16.msra.mxu0 %v10813_v12  ;;  %6333 = vmatprep.subr.bf16.mxu1 %v10812_v38  ;;  %v10888_v38 = vld [vmem:[#allocation2 + $0x830] ss:$80 sps:$4 sm:$0xff]   ;;  %v10896_v12 = vld [vmem:[#allocation2 + $0x8d4] ss:$80 sps:$4 sm:$0xff]  }
 0x142   :  { %6389 = vmatprep.subr.bf16.mxu0 %v10821_v39  ;;  %v10885_v39 = vld [vmem:[#allocation2 + $0x3d8] ss:$80 sps:$4 sm:$0xff]  }
 0x144   :  { %6176 = vmatmul.mubr.bf16.vlgmr.msra.gmra.mrb[0].mxu0 %v12608_v23  ;;  %6334 = vmatpush1.bf16.msra.mxu1 %v10810_v40  ;;  %v10893_v40 = vld [vmem:[#allocation2 + $0x47c] ss:$80 sps:$4 sm:$0xff]  }
 0x145   :  { %6390 = vmatpush1.bf16.msra.mxu0 %v10819_v42  ;;  %6335 = vmatprep.subr.bf16.mxu1 %v10818_v41  ;;  %v10894_v41 = vld [vmem:[#allocation2 + $0x8d0] ss:$80 sps:$4 sm:$0xff]   ;;  %v10902_v42 = vld [vmem:[#allocation2 + $0x974] ss:$80 sps:$4 sm:$0xff]  }
 0x146   :  { %6391 = vmatprep.subr.bf16.mxu0 %v10827_v43  ;;  %6421 = vmatprep.mubr.bf16.mxu0 %v12611_v25  ;;  %v10891_v43 = vld [vmem:[#allocation2 + $0x478] ss:$80 sps:$4 sm:$0xff]  }
 0x148   :  { %6336 = vmatpush1.bf16.msra.mxu1 %v10816_v44  ;;  %v10899_v44 = vld [vmem:[#allocation2 + $0x51c] ss:$80 sps:$4 sm:$0xff]  }
 0x149   :  { %6392 = vmatpush1.bf16.msra.mxu0 %v10825_v46  ;;  %6337 = vmatprep.subr.bf16.mxu1 %v10824_v45  ;;  %v10900_v45 = vld [vmem:[#allocation2 + $0x970] ss:$80 sps:$4 sm:$0xff]   ;;  %v10908_v46 = vld [vmem:[#allocation2 + $0xa14] ss:$80 sps:$4 sm:$0xff]  }
 0x14a   :  { %6393 = vmatprep.subr.bf16.mxu0 %v10830_v47  ;;  %v10897_v47 = vld [vmem:[#allocation2 + $0x518] ss:$80 sps:$4 sm:$0xff]  }
 0x14c   :  { %6338 = vmatpush1.bf16.msra.mxu1 %v10822_v48  ;;  %v10905_v48 = vld [vmem:[#allocation2 + $0x5bc] ss:$80 sps:$4 sm:$0xff]  }
 0x14d   :  { %6394 = vmatpush1.bf16.msra.mxu0 %v10828_v49  ;;  %6348 = vmatprep.subr.bf16.mxu1 %v10836_v51  ;;  %v10906_v49 = vld [vmem:[#allocation2 + $0xa10] ss:$80 sps:$4 sm:$0xff]   ;;  %v10903_v51 = vld [vmem:[#allocation2 + $0x5b8] ss:$80 sps:$4 sm:$0xff]  }
 0x14e   :  { %6395 = vmatprep.subr.bf16.mxu0 %v10833_v50  ;;  %v10914_v50 = vld [vmem:[#allocation2 + $0xab4] ss:$80 sps:$4 sm:$0xff]  }
 0x14f   :  { %6340 = vmatmul.mubr.bf16.vlgmr.msra.gmra.mrb[4].mxu1 %v12608_v23 }
 0x150   :  { %6349 = vmatpush1.bf16.msra.mxu1 %v10834_v53  ;;  %6380 = vmatprep.mubr.bf16.mxu1 %v12450_v0  ;;  %v10912_v53 = vld [vmem:[#allocation2 + $0xab0] ss:$80 sps:$4 sm:$0xff]  }
 0x151   :  { %6396 = vmatpush1.bf16.msra.mxu0 %v10831_v52  ;;  %6512 = vmatprep.subr.bf16.mxu1 %v10845_v55  ;;  %v10911_v52 = vld [vmem:[#allocation2 + $0x65c] ss:$80 sps:$4 sm:$0xff]   ;;  %v10909_v55 = vld [vmem:[#allocation2 + $0x658] ss:$80 sps:$4 sm:$0xff]  }
 0x152   :  { %6397 = vmatprep.subr.bf16.mxu0 %v10839_v54  ;;  %v10920_v54 = vld [vmem:[#allocation2 + $0xb54] ss:$80 sps:$4 sm:$0xff]  }
 0x155   :  { %6398 = vmatpush1.bf16.msra.mxu0 %v10837_v56  ;;  %v10917_v56 = vld [vmem:[#allocation2 + $0x6fc] ss:$80 sps:$4 sm:$0xff]  }
 0x156   :  { %6399 = vmatprep.subr.bf16.mxu0 %v10842_v57  ;;  %v10918_v57 = vld [vmem:[#allocation2 + $0xb50] ss:$80 sps:$4 sm:$0xff]  }
 0x159   :  { %6400 = vmatpush1.bf16.msra.mxu0 %v10840_v58  ;;  %v10926_v58 = vld [vmem:[#allocation2 + $0xbf4] ss:$80 sps:$4 sm:$0xff]  }
 0x15a   :  { %6401 = vmatprep.subr.bf16.mxu0 %v10848_v59  ;;  %v10915_v59 = vld [vmem:[#allocation2 + $0x6f8] ss:$80 sps:$4 sm:$0xff]  }
 0x15b   :  { %10157 = vmatmul.mubr.msk.bf16.vlgmr.msra.gmra.mrb[4].mxu1 %vm6057_vm0, %v12615_v27 }
 0x15c   :  { %6513 = vmatpush1.bf16.msra.mxu1 %v10843_v60  ;;  %6544 = vmatprep.mubr.bf16.mxu1 %v12450_v0  ;;  %v10923_v60 = vld [vmem:[#allocation2 + $0x79c] ss:$80 sps:$4 sm:$0xff]  }
 0x15d   :  { %6553 = vmatprep.subr.bf16.mxu1 %v10851_v62  ;;  %6402 = vmatpush1.bf16.msra.mxu0 %v10846_v61  ;;  %v10924_v61 = vld [vmem:[#allocation2 + $0xbf0] ss:$80 sps:$4 sm:$0xff]   ;;  %v10932_v62 = vld [vmem:[#allocation2 + $0xc94] ss:$80 sps:$4 sm:$0xff]  }
 0x15e   :  { %6403 = vmatprep.subr.bf16.mxu0 %v10854_v63  ;;  %v10921_v63 = vld [vmem:[#allocation2 + $0x798] ss:$80 sps:$4 sm:$0xff]  }
 0x161   :  { %6404 = vmatpush1.bf16.msra.mxu0 %v10852_v1  ;;  %v10929_v1 = vld [vmem:[#allocation2 + $0x83c] ss:$80 sps:$4 sm:$0xff]  }
 0x162   :  { %6405 = vmatprep.subr.bf16.mxu0 %v10860_v2  ;;  %v12653_v8 = vpop.f32.mrb[0].mxu1  ;;  %v10930_v2 = vld [vmem:[#allocation2 + $0xc90] ss:$80 sps:$4 sm:$0xff]  }
 0x163   :  { %10158 = vmatmul.mubr.msk.bf16.vlgmr.msra.gmra.mrb[8].mxu1 %vm6057_vm0, %v12615_v27  ;;  %v12657_v10 = vpop.f32.mrb[1].mxu1 }
 0x164   :  { %6554 = vmatpush1.bf16.msra.mxu1 %v10849_v3  ;;  %v6222_v13 = vpop.f32.mrb[2].mxu1  ;;  %6585 = vmatprep.mubr.bf16.mxu1 %v12611_v25  ;;  %v10938_v3 = vld [vmem:[#allocation2 + $0xd34] ss:$80 sps:$4 sm:$0xff]  }
 0x165   :  { %6555 = vmatprep.subr.bf16.mxu1 %v10857_v4  ;;  %6406 = vmatpush1.bf16.msra.mxu0 %v10858_v5  ;;  %v6223_v15 = vpop.f32.mrb[3].mxu1  ;;  %v10927_v4 = vld [vmem:[#allocation2 + $0x838] ss:$80 sps:$4 sm:$0xff]   ;;  %v10935_v5 = vld [vmem:[#allocation2 + $0x8dc] ss:$80 sps:$4 sm:$0xff]  }
 0x166   :  { %6407 = vmatprep.subr.bf16.mxu0 %v10866_v7  ;;  %v10936_v7 = vld [vmem:[#allocation2 + $0xd30] ss:$80 sps:$4 sm:$0xff]   ;;  %v10941_v13 = vld [vmem:[#allocation2 + $0x97c] ss:$80 sps:$4 sm:$0xff]   ;;  %v10950_v15 = vld [vmem:[#allocation2 + $0xe74] ss:$80 sps:$4 sm:$0xff]  }
 0x168   :  { %6556 = vmatpush1.bf16.msra.mxu1 %v10855_v9  ;;  %v10944_v9 = vld [vmem:[#allocation2 + $0xdd4] ss:$80 sps:$4 sm:$0xff]  }
 0x169   :  { %6557 = vmatprep.subr.bf16.mxu1 %v10863_v11  ;;  %6408 = vmatpush1.bf16.msra.mxu0 %v10864_v14  ;;  %v10933_v11 = vld [vmem:[#allocation2 + $0x8d8] ss:$80 sps:$4 sm:$0xff]   ;;  %v10942_v14 = vld [vmem:[#allocation2 + $0xdd0] ss:$80 sps:$4 sm:$0xff]  }
 0x16a   :  { %6409 = vmatprep.subr.bf16.mxu0 %v10872_v16  ;;  %v10939_v16 = vld [vmem:[#allocation2 + $0x978] ss:$80 sps:$4 sm:$0xff]  }
 0x16c   :  { %6558 = vmatpush1.bf16.msra.mxu1 %v10861_v18  ;;  %v10947_v18 = vld [vmem:[#allocation2 + $0xa1c] ss:$80 sps:$4 sm:$0xff]  }
 0x16d   :  { %6559 = vmatprep.subr.bf16.mxu1 %v10869_v21  ;;  %6410 = vmatpush1.bf16.msra.mxu0 %v10870_v22  ;;  %v10948_v21 = vld [vmem:[#allocation2 + $0xe70] ss:$80 sps:$4 sm:$0xff]   ;;  %v10956_v22 = vld [vmem:[#allocation2 + $0xf14] ss:$80 sps:$4 sm:$0xff]  }
 0x16e   :  { %6411 = vmatprep.subr.bf16.mxu0 %v10878_v26  ;;  %v10945_v26 = vld [vmem:[#allocation2 + $0xa18] ss:$80 sps:$4 sm:$0xff]  }
 0x170   :  { %6560 = vmatpush1.bf16.msra.mxu1 %v10867_v28  ;;  %v10953_v28 = vld [vmem:[#allocation2 + $0xabc] ss:$80 sps:$4 sm:$0xff]  }
 0x171   :  { %6561 = vmatprep.subr.bf16.mxu1 %v10875_v29  ;;  %6412 = vmatpush1.bf16.msra.mxu0 %v10876_v17  ;;  %v10954_v29 = vld [vmem:[#allocation2 + $0xf10] ss:$80 sps:$4 sm:$0xff]   ;;  %v10962_v17 = vld [vmem:[#allocation2 + $0xfb4] ss:$80 sps:$4 sm:$0xff]  }
 0x172   :  { %6413 = vmatprep.subr.bf16.mxu0 %v10884_v30  ;;  %v10951_v30 = vld [vmem:[#allocation2 + $0xab8] ss:$80 sps:$4 sm:$0xff]  }
 0x174   :  { %6562 = vmatpush1.bf16.msra.mxu1 %v10873_v32  ;;  %v10959_v32 = vld [vmem:[#allocation2 + $0xb5c] ss:$80 sps:$4 sm:$0xff]  }
 0x175   :  { %6563 = vmatprep.subr.bf16.mxu1 %v10881_v33  ;;  %6414 = vmatpush1.bf16.msra.mxu0 %v10882_v35  ;;  %v10960_v33 = vld [vmem:[#allocation2 + $0xfb0] ss:$80 sps:$4 sm:$0xff]   ;;  %v10968_v35 = vld [vmem:[#allocation2 + $0x1054] ss:$80 sps:$4 sm:$0xff]  }
 0x176   :  { %6415 = vmatprep.subr.bf16.mxu0 %v10890_v36  ;;  %v10957_v36 = vld [vmem:[#allocation2 + $0xb58] ss:$80 sps:$4 sm:$0xff]  }
 0x178   :  { %6564 = vmatpush1.bf16.msra.mxu1 %v10879_v37  ;;  %v10965_v37 = vld [vmem:[#allocation2 + $0xbfc] ss:$80 sps:$4 sm:$0xff]  }
 0x179   :  { %6565 = vmatprep.subr.bf16.mxu1 %v10887_v19  ;;  %6416 = vmatpush1.bf16.msra.mxu0 %v10888_v38  ;;  %v10966_v19 = vld [vmem:[#allocation2 + $0x1050] ss:$80 sps:$4 sm:$0xff]   ;;  %v10974_v38 = vld [vmem:[#allocation2 + $0x10f4] ss:$80 sps:$4 sm:$0xff]  }
 0x17a   :  { %6417 = vmatprep.subr.bf16.mxu0 %v10896_v12  ;;  %v10963_v12 = vld [vmem:[#allocation2 + $0xbf8] ss:$80 sps:$4 sm:$0xff]  }
 0x17c   :  { %6566 = vmatpush1.bf16.msra.mxu1 %v10885_v39  ;;  %v10971_v39 = vld [vmem:[#allocation2 + $0xc9c] ss:$80 sps:$4 sm:$0xff]  }
 0x17d   :  { %6567 = vmatprep.subr.bf16.mxu1 %v10893_v40  ;;  %6418 = vmatpush1.bf16.msra.mxu0 %v10894_v41  ;;  %v10972_v40 = vld [vmem:[#allocation2 + $0x10f0] ss:$80 sps:$4 sm:$0xff]   ;;  %v10980_v41 = vld [vmem:[#allocation2 + $0x1194] ss:$80 sps:$4 sm:$0xff]  }
 0x17e   :  { %6419 = vmatprep.subr.bf16.mxu0 %v10902_v42  ;;  %v10969_v42 = vld [vmem:[#allocation2 + $0xc98] ss:$80 sps:$4 sm:$0xff]  }
 0x180   :  { %6568 = vmatpush1.bf16.msra.mxu1 %v10891_v43  ;;  %v10977_v43 = vld [vmem:[#allocation2 + $0xd3c] ss:$80 sps:$4 sm:$0xff]  }
 0x181   :  { %6569 = vmatprep.subr.bf16.mxu1 %v10899_v44  ;;  %6420 = vmatpush1.bf16.msra.mxu0 %v10900_v45  ;;  %v10978_v44 = vld [vmem:[#allocation2 + $0x1190] ss:$80 sps:$4 sm:$0xff]   ;;  %v10986_v45 = vld [vmem:[#allocation2 + $0x1234] ss:$80 sps:$4 sm:$0xff]  }
 0x182   :  { %6430 = vmatprep.subr.bf16.mxu0 %v10908_v46  ;;  %v10975_v46 = vld [vmem:[#allocation2 + $0xd38] ss:$80 sps:$4 sm:$0xff]  }
 0x184   :  { %6570 = vmatpush1.bf16.msra.mxu1 %v10897_v47  ;;  %6422 = vmatmul.mubr.bf16.vlgmr.msra.gmra.mrb[4].mxu0 %v12623_v20  ;;  %v10983_v47 = vld [vmem:[#allocation2 + $0xddc] ss:$80 sps:$4 sm:$0xff]  }
 0x185   :  { %6571 = vmatprep.subr.bf16.mxu1 %v10905_v48  ;;  %6431 = vmatpush1.bf16.msra.mxu0 %v10906_v49  ;;  %v10984_v48 = vld [vmem:[#allocation2 + $0x1230] ss:$80 sps:$4 sm:$0xff]   ;;  %v10992_v49 = vld [vmem:[#allocation2 + $0x12d4] ss:$80 sps:$4 sm:$0xff]  }
 0x186   :  { %6432 = vmatprep.subr.bf16.mxu0 %v10914_v50  ;;  %6462 = vmatprep.mubr.bf16.mxu0 %v12627_v24  ;;  %v10981_v50 = vld [vmem:[#allocation2 + $0xdd8] ss:$80 sps:$4 sm:$0xff]  }
 0x188   :  { %6572 = vmatpush1.bf16.msra.mxu1 %v10903_v51  ;;  %v10989_v51 = vld [vmem:[#allocation2 + $0xe7c] ss:$80 sps:$4 sm:$0xff]  }
 0x189   :  { %6573 = vmatprep.subr.bf16.mxu1 %v10911_v52  ;;  %6433 = vmatpush1.bf16.msra.mxu0 %v10912_v53  ;;  %v10990_v52 = vld [vmem:[#allocation2 + $0x12d0] ss:$80 sps:$4 sm:$0xff]   ;;  %v10998_v53 = vld [vmem:[#allocation2 + $0x1374] ss:$80 sps:$4 sm:$0xff]  }
 0x18a   :  { %6434 = vmatprep.subr.bf16.mxu0 %v10920_v54  ;;  %v10987_v54 = vld [vmem:[#allocation2 + $0xe78] ss:$80 sps:$4 sm:$0xff]  }
 0x18c   :  { %6574 = vmatpush1.bf16.msra.mxu1 %v10909_v55  ;;  %v10995_v55 = vld [vmem:[#allocation2 + $0xf1c] ss:$80 sps:$4 sm:$0xff]  }
 0x18d   :  { %6575 = vmatprep.subr.bf16.mxu1 %v10917_v56  ;;  %6435 = vmatpush1.bf16.msra.mxu0 %v10918_v57  ;;  %v10996_v56 = vld [vmem:[#allocation2 + $0x1370] ss:$80 sps:$4 sm:$0xff]   ;;  %v11004_v57 = vld [vmem:[#allocation2 + $0x1414] ss:$80 sps:$4 sm:$0xff]  }
 0x18e   :  { %6436 = vmatprep.subr.bf16.mxu0 %v10926_v58  ;;  %v10993_v58 = vld [vmem:[#allocation2 + $0xf18] ss:$80 sps:$4 sm:$0xff]  }
 0x190   :  { %6576 = vmatpush1.bf16.msra.mxu1 %v10915_v59  ;;  %v11001_v59 = vld [vmem:[#allocation2 + $0xfbc] ss:$80 sps:$4 sm:$0xff]  }
 0x191   :  { %6577 = vmatprep.subr.bf16.mxu1 %v10923_v60  ;;  %6437 = vmatpush1.bf16.msra.mxu0 %v10924_v61  ;;  %v11002_v60 = vld [vmem:[#allocation2 + $0x1410] ss:$80 sps:$4 sm:$0xff]   ;;  %v11010_v61 = vld [vmem:[#allocation2 + $0x14b4] ss:$80 sps:$4 sm:$0xff]  }
 0x192   :  { %6438 = vmatprep.subr.bf16.mxu0 %v10932_v62  ;;  %v10999_v62 = vld [vmem:[#allocation2 + $0xfb8] ss:$80 sps:$4 sm:$0xff]  }
 0x194   :  { %6578 = vmatpush1.bf16.msra.mxu1 %v10921_v63  ;;  %v11007_v63 = vld [vmem:[#allocation2 + $0x105c] ss:$80 sps:$4 sm:$0xff]  }
 0x195   :  { %6579 = vmatprep.subr.bf16.mxu1 %v10929_v1  ;;  %6439 = vmatpush1.bf16.msra.mxu0 %v10930_v2  ;;  %v11008_v1 = vld [vmem:[#allocation2 + $0x14b0] ss:$80 sps:$4 sm:$0xff]   ;;  %v11016_v2 = vld [vmem:[#allocation2 + $0x1554] ss:$80 sps:$4 sm:$0xff]  }
 0x196   :  { %6440 = vmatprep.subr.bf16.mxu0 %v10938_v3  ;;  %v11005_v3 = vld [vmem:[#allocation2 + $0x1058] ss:$80 sps:$4 sm:$0xff]  }
 0x198   :  { %6580 = vmatpush1.bf16.msra.mxu1 %v10927_v4  ;;  %v11013_v4 = vld [vmem:[#allocation2 + $0x10fc] ss:$80 sps:$4 sm:$0xff]  }
 0x199   :  { %6581 = vmatprep.subr.bf16.mxu1 %v10935_v5  ;;  %6441 = vmatpush1.bf16.msra.mxu0 %v10936_v7  ;;  %v11014_v5 = vld [vmem:[#allocation2 + $0x1550] ss:$80 sps:$4 sm:$0xff]   ;;  %v11022_v7 = vld [vmem:[#allocation2 + $0x15f4] ss:$80 sps:$4 sm:$0xff]  }
 0x19a   :  { %6442 = vmatprep.subr.bf16.mxu0 %v10944_v9  ;;  %v11011_v9 = vld [vmem:[#allocation2 + $0x10f8] ss:$80 sps:$4 sm:$0xff]  }
 0x19c   :  { %6582 = vmatpush1.bf16.msra.mxu1 %v10933_v11  ;;  %v11019_v11 = vld [vmem:[#allocation2 + $0x119c] ss:$80 sps:$4 sm:$0xff]  }
 0x19d   :  { %6583 = vmatprep.subr.bf16.mxu1 %v10941_v13  ;;  %6443 = vmatpush1.bf16.msra.mxu0 %v10942_v14  ;;  %v11020_v13 = vld [vmem:[#allocation2 + $0x15f0] ss:$80 sps:$4 sm:$0xff]   ;;  %v11028_v14 = vld [vmem:[#allocation2 + $0x1694] ss:$80 sps:$4 sm:$0xff]  }
 0x19e   :  { %6444 = vmatprep.subr.bf16.mxu0 %v10950_v15  ;;  %v11017_v15 = vld [vmem:[#allocation2 + $0x1198] ss:$80 sps:$4 sm:$0xff]  }
 0x1a0   :  { %6584 = vmatpush1.bf16.msra.mxu1 %v10939_v16  ;;  %v11025_v16 = vld [vmem:[#allocation2 + $0x123c] ss:$80 sps:$4 sm:$0xff]  }
 0x1a1   :  { %6594 = vmatprep.subr.bf16.mxu1 %v10947_v18  ;;  %6445 = vmatpush1.bf16.msra.mxu0 %v10948_v21  ;;  %v11026_v18 = vld [vmem:[#allocation2 + $0x1690] ss:$80 sps:$4 sm:$0xff]   ;;  %v11034_v21 = vld [vmem:[#allocation2 + $0x1734] ss:$80 sps:$4 sm:$0xff]  }
 0x1a2   :  { %6446 = vmatprep.subr.bf16.mxu0 %v10956_v22  ;;  %v11023_v22 = vld [vmem:[#allocation2 + $0x1238] ss:$80 sps:$4 sm:$0xff]  }
 0x1a3   :  { %6586 = vmatmul.mubr.bf16.vlgmr.msra.gmra.mrb[12].mxu1 %v12623_v20 }
 0x1a4   :  { %6595 = vmatpush1.bf16.msra.mxu1 %v10945_v26  ;;  %6626 = vmatprep.mubr.bf16.mxu1 %v12627_v24  ;;  %v11031_v26 = vld [vmem:[#allocation2 + $0x12dc] ss:$80 sps:$4 sm:$0xff]  }
 0x1a5   :  { %6596 = vmatprep.subr.bf16.mxu1 %v10953_v28  ;;  %6447 = vmatpush1.bf16.msra.mxu0 %v10954_v29  ;;  %v11032_v28 = vld [vmem:[#allocation2 + $0x1730] ss:$80 sps:$4 sm:$0xff]   ;;  %v11040_v29 = vld [vmem:[#allocation2 + $0x17d4] ss:$80 sps:$4 sm:$0xff]  }
 0x1a6   :  { %6448 = vmatprep.subr.bf16.mxu0 %v10962_v17  ;;  %v11029_v17 = vld [vmem:[#allocation2 + $0x12d8] ss:$80 sps:$4 sm:$0xff]  }
 0x1a8   :  { %6597 = vmatpush1.bf16.msra.mxu1 %v10951_v30  ;;  %v11037_v30 = vld [vmem:[#allocation2 + $0x137c] ss:$80 sps:$4 sm:$0xff]  }
 0x1a9   :  { %6598 = vmatprep.subr.bf16.mxu1 %v10959_v32  ;;  %6449 = vmatpush1.bf16.msra.mxu0 %v10960_v33  ;;  %v11038_v32 = vld [vmem:[#allocation2 + $0x17d0] ss:$80 sps:$4 sm:$0xff]   ;;  %v11046_v33 = vld [vmem:[#allocation2 + $0x1874] ss:$80 sps:$4 sm:$0xff]  }
 0x1aa   :  { %6450 = vmatprep.subr.bf16.mxu0 %v10968_v35  ;;  %v11035_v35 = vld [vmem:[#allocation2 + $0x1378] ss:$80 sps:$4 sm:$0xff]  }
 0x1ac   :  { %6599 = vmatpush1.bf16.msra.mxu1 %v10957_v36  ;;  %v11043_v36 = vld [vmem:[#allocation2 + $0x141c] ss:$80 sps:$4 sm:$0xff]  }
 0x1ad   :  { %6600 = vmatprep.subr.bf16.mxu1 %v10965_v37  ;;  %6451 = vmatpush1.bf16.msra.mxu0 %v10966_v19  ;;  %v11044_v37 = vld [vmem:[#allocation2 + $0x1870] ss:$80 sps:$4 sm:$0xff]   ;;  %v11052_v19 = vld [vmem:[#allocation2 + $0x1914] ss:$80 sps:$4 sm:$0xff]  }
 0x1ae   :  { %6452 = vmatprep.subr.bf16.mxu0 %v10974_v38  ;;  %v11041_v38 = vld [vmem:[#allocation2 + $0x1418] ss:$80 sps:$4 sm:$0xff]  }
 0x1b0   :  { %6601 = vmatpush1.bf16.msra.mxu1 %v10963_v12  ;;  %v11049_v12 = vld [vmem:[#allocation2 + $0x14bc] ss:$80 sps:$4 sm:$0xff]  }
 0x1b1   :  { %6602 = vmatprep.subr.bf16.mxu1 %v10971_v39  ;;  %6453 = vmatpush1.bf16.msra.mxu0 %v10972_v40  ;;  %v11050_v39 = vld [vmem:[#allocation2 + $0x1910] ss:$80 sps:$4 sm:$0xff]   ;;  %v11058_v40 = vld [vmem:[#allocation2 + $0x19b4] ss:$80 sps:$4 sm:$0xff]  }
 0x1b2   :  { %6454 = vmatprep.subr.bf16.mxu0 %v10980_v41  ;;  %v11047_v41 = vld [vmem:[#allocation2 + $0x14b8] ss:$80 sps:$4 sm:$0xff]  }
 0x1b4   :  { %6603 = vmatpush1.bf16.msra.mxu1 %v10969_v42  ;;  %v11055_v42 = vld [vmem:[#allocation2 + $0x155c] ss:$80 sps:$4 sm:$0xff]  }
 0x1b5   :  { %6604 = vmatprep.subr.bf16.mxu1 %v10977_v43  ;;  %6455 = vmatpush1.bf16.msra.mxu0 %v10978_v44  ;;  %v11056_v43 = vld [vmem:[#allocation2 + $0x19b0] ss:$80 sps:$4 sm:$0xff]   ;;  %v11064_v44 = vld [vmem:[#allocation2 + $0x1a54] ss:$80 sps:$4 sm:$0xff]  }
 0x1b6   :  { %6456 = vmatprep.subr.bf16.mxu0 %v10986_v45  ;;  %v11053_v45 = vld [vmem:[#allocation2 + $0x1558] ss:$80 sps:$4 sm:$0xff]  }
 0x1b8   :  { %6605 = vmatpush1.bf16.msra.mxu1 %v10975_v46  ;;  %v11061_v46 = vld [vmem:[#allocation2 + $0x15fc] ss:$80 sps:$4 sm:$0xff]  }
 0x1b9   :  { %6606 = vmatprep.subr.bf16.mxu1 %v10983_v47  ;;  %6457 = vmatpush1.bf16.msra.mxu0 %v10984_v48  ;;  %v11062_v47 = vld [vmem:[#allocation2 + $0x1a50] ss:$80 sps:$4 sm:$0xff]   ;;  %v11070_v48 = vld [vmem:[#allocation2 + $0x1af4] ss:$80 sps:$4 sm:$0xff]  }
 0x1ba   :  { %6458 = vmatprep.subr.bf16.mxu0 %v10992_v49  ;;  %v11059_v49 = vld [vmem:[#allocation2 + $0x15f8] ss:$80 sps:$4 sm:$0xff]  }
 0x1bc   :  { %6607 = vmatpush1.bf16.msra.mxu1 %v10981_v50  ;;  %v11067_v50 = vld [vmem:[#allocation2 + $0x169c] ss:$80 sps:$4 sm:$0xff]  }
 0x1bd   :  { %6608 = vmatprep.subr.bf16.mxu1 %v10989_v51  ;;  %6459 = vmatpush1.bf16.msra.mxu0 %v10990_v52  ;;  %v11068_v51 = vld [vmem:[#allocation2 + $0x1af0] ss:$80 sps:$4 sm:$0xff]   ;;  %v11076_v52 = vld [vmem:[#allocation2 + $0x1b94] ss:$80 sps:$4 sm:$0xff]  }
 0x1be   :  { %6460 = vmatprep.subr.bf16.mxu0 %v10998_v53  ;;  %v11065_v53 = vld [vmem:[#allocation2 + $0x1698] ss:$80 sps:$4 sm:$0xff]  }
 0x1c0   :  { %6609 = vmatpush1.bf16.msra.mxu1 %v10987_v54  ;;  %v11073_v54 = vld [vmem:[#allocation2 + $0x173c] ss:$80 sps:$4 sm:$0xff]  }
 0x1c1   :  { %6610 = vmatprep.subr.bf16.mxu1 %v10995_v55  ;;  %6461 = vmatpush1.bf16.msra.mxu0 %v10996_v56  ;;  %v11074_v55 = vld [vmem:[#allocation2 + $0x1b90] ss:$80 sps:$4 sm:$0xff]   ;;  %v11082_v56 = vld [vmem:[#allocation2 + $0x1c34] ss:$80 sps:$4 sm:$0xff]  }
 0x1c2   :  { %6471 = vmatprep.subr.bf16.mxu0 %v11004_v57  ;;  %v11071_v57 = vld [vmem:[#allocation2 + $0x1738] ss:$80 sps:$4 sm:$0xff]  }
 0x1c4   :  { %6611 = vmatpush1.bf16.msra.mxu1 %v10993_v58  ;;  %6463 = vmatmul.mubr.bf16.vlgmr.msra.gmra.mrb[4].mxu0 %v12640_v34  ;;  %v11079_v58 = vld [vmem:[#allocation2 + $0x17dc] ss:$80 sps:$4 sm:$0xff]  }
 0x1c5   :  { %6612 = vmatprep.subr.bf16.mxu1 %v11001_v59  ;;  %6472 = vmatpush1.bf16.msra.mxu0 %v11002_v60  ;;  %v11080_v59 = vld [vmem:[#allocation2 + $0x1c30] ss:$80 sps:$4 sm:$0xff]   ;;  %v11088_v60 = vld [vmem:[#allocation2 + $0x1cd4] ss:$80 sps:$4 sm:$0xff]  }
 0x1c6   :  { %6473 = vmatprep.subr.bf16.mxu0 %v11010_v61  ;;  %6503 = vmatprep.mubr.bf16.mxu0 %v12634_v31  ;;  %v11077_v61 = vld [vmem:[#allocation2 + $0x17d8] ss:$80 sps:$4 sm:$0xff]  }
 0x1c8   :  { %6613 = vmatpush1.bf16.msra.mxu1 %v10999_v62  ;;  %v11085_v62 = vld [vmem:[#allocation2 + $0x187c] ss:$80 sps:$4 sm:$0xff]  }
 0x1c9   :  { %6614 = vmatprep.subr.bf16.mxu1 %v11007_v63  ;;  %6474 = vmatpush1.bf16.msra.mxu0 %v11008_v1  ;;  %v11086_v63 = vld [vmem:[#allocation2 + $0x1cd0] ss:$80 sps:$4 sm:$0xff]   ;;  %v11094_v1 = vld [vmem:[#allocation2 + $0x1d74] ss:$80 sps:$4 sm:$0xff]  }
 0x1ca   :  { %6475 = vmatprep.subr.bf16.mxu0 %v11016_v2  ;;  %v11083_v2 = vld [vmem:[#allocation2 + $0x1878] ss:$80 sps:$4 sm:$0xff]  }
 0x1cc   :  { %6615 = vmatpush1.bf16.msra.mxu1 %v11005_v3  ;;  %v11091_v3 = vld [vmem:[#allocation2 + $0x191c] ss:$80 sps:$4 sm:$0xff]  }
 0x1cd   :  { %6616 = vmatprep.subr.bf16.mxu1 %v11013_v4  ;;  %6476 = vmatpush1.bf16.msra.mxu0 %v11014_v5  ;;  %v11092_v4 = vld [vmem:[#allocation2 + $0x1d70] ss:$80 sps:$4 sm:$0xff]   ;;  %v11103_v5 = vld [vmem:[#allocation2 + $0x24] ss:$80 sps:$4 sm:$0xff]  }
 0x1ce   :  { %6477 = vmatprep.subr.bf16.mxu0 %v11022_v7  ;;  %v11089_v7 = vld [vmem:[#allocation2 + $0x1918] ss:$80 sps:$4 sm:$0xff]  }
 0x1d0   :  { %6617 = vmatpush1.bf16.msra.mxu1 %v11011_v9  ;;  %v11097_v9 = vld [vmem:[#allocation2 + $0x19bc] ss:$80 sps:$4 sm:$0xff]  }
 0x1d1   :  { %6618 = vmatprep.subr.bf16.mxu1 %v11019_v11  ;;  %6478 = vmatpush1.bf16.msra.mxu0 %v11020_v13  ;;  %v11101_v11 = vld [vmem:[#allocation2 + $0x20] ss:$80 sps:$4 sm:$0xff]   ;;  %v11109_v13 = vld [vmem:[#allocation2 + $0xc4] ss:$80 sps:$4 sm:$0xff]  }
 0x1d2   :  { %6479 = vmatprep.subr.bf16.mxu0 %v11028_v14  ;;  %v11095_v14 = vld [vmem:[#allocation2 + $0x19b8] ss:$80 sps:$4 sm:$0xff]  }
 0x1d4   :  { %6619 = vmatpush1.bf16.msra.mxu1 %v11017_v15  ;;  %v11100_v15 = vld [vmem:[#allocation2 + $0x1a5c] ss:$80 sps:$4 sm:$0xff]  }
 0x1d5   :  { %6620 = vmatprep.subr.bf16.mxu1 %v11025_v16  ;;  %6480 = vmatpush1.bf16.msra.mxu0 %v11026_v18  ;;  %v11107_v16 = vld [vmem:[#allocation2 + $0xc0] ss:$80 sps:$4 sm:$0xff]   ;;  %v11115_v18 = vld [vmem:[#allocation2 + $0x164] ss:$80 sps:$4 sm:$0xff]  }
 0x1d6   :  { %6481 = vmatprep.subr.bf16.mxu0 %v11034_v21  ;;  %v11098_v21 = vld [vmem:[#allocation2 + $0x1a58] ss:$80 sps:$4 sm:$0xff]  }
 0x1d8   :  { %6621 = vmatpush1.bf16.msra.mxu1 %v11023_v22  ;;  %v11106_v22 = vld [vmem:[#allocation2 + $0x1afc] ss:$80 sps:$4 sm:$0xff]  }
 0x1d9   :  { %6622 = vmatprep.subr.bf16.mxu1 %v11031_v26  ;;  %6482 = vmatpush1.bf16.msra.mxu0 %v11032_v28  ;;  %v11113_v26 = vld [vmem:[#allocation2 + $0x160] ss:$80 sps:$4 sm:$0xff]   ;;  %v11121_v28 = vld [vmem:[#allocation2 + $0x204] ss:$80 sps:$4 sm:$0xff]  }
 0x1da   :  { %6483 = vmatprep.subr.bf16.mxu0 %v11040_v29  ;;  %v11104_v29 = vld [vmem:[#allocation2 + $0x1af8] ss:$80 sps:$4 sm:$0xff]  }
 0x1dc   :  { %6623 = vmatpush1.bf16.msra.mxu1 %v11029_v17  ;;  %v11112_v17 = vld [vmem:[#allocation2 + $0x1b9c] ss:$80 sps:$4 sm:$0xff]  }
 0x1dd   :  { %6624 = vmatprep.subr.bf16.mxu1 %v11037_v30  ;;  %6484 = vmatpush1.bf16.msra.mxu0 %v11038_v32  ;;  %v11119_v30 = vld [vmem:[#allocation2 + $0x200] ss:$80 sps:$4 sm:$0xff]   ;;  %v11127_v32 = vld [vmem:[#allocation2 + $0x2a4] ss:$80 sps:$4 sm:$0xff]  }
 0x1de   :  { %6485 = vmatprep.subr.bf16.mxu0 %v11046_v33  ;;  %v11110_v33 = vld [vmem:[#allocation2 + $0x1b98] ss:$80 sps:$4 sm:$0xff]  }
 0x1e0   :  { %6625 = vmatpush1.bf16.msra.mxu1 %v11035_v35  ;;  %v11118_v35 = vld [vmem:[#allocation2 + $0x1c3c] ss:$80 sps:$4 sm:$0xff]  }
 0x1e1   :  { %6635 = vmatprep.subr.bf16.mxu1 %v11043_v36  ;;  %6486 = vmatpush1.bf16.msra.mxu0 %v11044_v37  ;;  %v11125_v36 = vld [vmem:[#allocation2 + $0x2a0] ss:$80 sps:$4 sm:$0xff]   ;;  %v11133_v37 = vld [vmem:[#allocation2 + $0x344] ss:$80 sps:$4 sm:$0xff]  }
 0x1e2   :  { %6487 = vmatprep.subr.bf16.mxu0 %v11052_v19  ;;  %v11116_v19 = vld [vmem:[#allocation2 + $0x1c38] ss:$80 sps:$4 sm:$0xff]  }
 0x1e3   :  { %6627 = vmatmul.mubr.bf16.vlgmr.msra.gmra.mrb[12].mxu1 %v12640_v34 }
 0x1e4   :  { %6636 = vmatpush1.bf16.msra.mxu1 %v11041_v38  ;;  %6667 = vmatprep.mubr.bf16.mxu1 %v12634_v31  ;;  %v11124_v38 = vld [vmem:[#allocation2 + $0x1cdc] ss:$80 sps:$4 sm:$0xff]  }
 0x1e5   :  { %6637 = vmatprep.subr.bf16.mxu1 %v11049_v12  ;;  %6488 = vmatpush1.bf16.msra.mxu0 %v11050_v39  ;;  %v11131_v12 = vld [vmem:[#allocation2 + $0x340] ss:$80 sps:$4 sm:$0xff]   ;;  %v11136_v39 = vld [vmem:[#allocation2 + $0x3e4] ss:$80 sps:$4 sm:$0xff]  }
 0x1e6   :  { %6489 = vmatprep.subr.bf16.mxu0 %v11058_v40 }
 0x1e8   :  { %6638 = vmatpush1.bf16.msra.mxu1 %v11047_v41 }
 0x1e9   :  { %6639 = vmatprep.subr.bf16.mxu1 %v11055_v42  ;;  %6490 = vmatpush1.bf16.msra.mxu0 %v11056_v43  ;;  %v11122_v43 = vld [vmem:[#allocation2 + $0x1cd8] ss:$80 sps:$4 sm:$0xff]  }
 0x1ea   :  { %6491 = vmatprep.subr.bf16.mxu0 %v11064_v44 }
 0x1ec   :  { %6640 = vmatpush1.bf16.msra.mxu1 %v11053_v45  ;;  %v11130_v45 = vld [vmem:[#allocation2 + $0x1d7c] ss:$80 sps:$4 sm:$0xff]  }
 0x1ed   :  { %6641 = vmatprep.subr.bf16.mxu1 %v11061_v46  ;;  %6492 = vmatpush1.bf16.msra.mxu0 %v11062_v47 }
 0x1ee   :  { %6493 = vmatprep.subr.bf16.mxu0 %v11070_v48  ;;  %v11134_v48 = vld [vmem:[#allocation2 + $0x3e0] ss:$80 sps:$4 sm:$0xff]  }
 0x1f0   :  { %6642 = vmatpush1.bf16.msra.mxu1 %v11059_v49  ;;  %v11139_v49 = vld [vmem:[#allocation2 + $0x484] ss:$80 sps:$4 sm:$0xff]  }
 0x1f1   :  { %6643 = vmatprep.subr.bf16.mxu1 %v11067_v50  ;;  %6494 = vmatpush1.bf16.msra.mxu0 %v11068_v51  ;;  %v11128_v50 = vld [vmem:[#allocation2 + $0x1d78] ss:$80 sps:$4 sm:$0xff]   ;;  %v11137_v51 = vld [vmem:[#allocation2 + $0x480] ss:$80 sps:$4 sm:$0xff]  }
 0x1f2   :  { %6495 = vmatprep.subr.bf16.mxu0 %v11076_v52  ;;  %v11145_v52 = vld [vmem:[#allocation2 + $0x524] ss:$80 sps:$4 sm:$0xff]  }
 0x1f4   :  { %6644 = vmatpush1.bf16.msra.mxu1 %v11065_v53  ;;  %v11140_v53 = vld [vmem:[#allocation2 + $0x1e18] ss:$80 sps:$4 sm:$0xff]  }
 0x1f5   :  { %6645 = vmatprep.subr.bf16.mxu1 %v11073_v54  ;;  %6496 = vmatpush1.bf16.msra.mxu0 %v11074_v55  ;;  %v11148_v54 = vld [vmem:[#allocation2 + $0x2c] ss:$80 sps:$4 sm:$0xff]   ;;  %v11151_v55 = vld [vmem:[#allocation2 + $0x5c4] ss:$80 sps:$4 sm:$0xff]  }
 0x1f6   :  { %6497 = vmatprep.subr.bf16.mxu0 %v11082_v56  ;;  %v11149_v56 = vld [vmem:[#allocation2 + $0x5c0] ss:$80 sps:$4 sm:$0xff]  }
 0x1f8   :  { %6646 = vmatpush1.bf16.msra.mxu1 %v11071_v57  ;;  %v11157_v57 = vld [vmem:[#allocation2 + $0x664] ss:$80 sps:$4 sm:$0xff]  }
 0x1f9   :  { %6647 = vmatprep.subr.bf16.mxu1 %v11079_v58  ;;  %6498 = vmatpush1.bf16.msra.mxu0 %v11080_v59  ;;  %v11155_v58 = vld [vmem:[#allocation2 + $0x660] ss:$80 sps:$4 sm:$0xff]   ;;  %v11163_v59 = vld [vmem:[#allocation2 + $0x704] ss:$80 sps:$4 sm:$0xff]  }
 0x1fa   :  { %6499 = vmatprep.subr.bf16.mxu0 %v11088_v60  ;;  %v11146_v60 = vld [vmem:[#allocation2 + $0x28] ss:$80 sps:$4 sm:$0xff]  }
 0x1fc   :  { %6648 = vmatpush1.bf16.msra.mxu1 %v11077_v61  ;;  %v11154_v61 = vld [vmem:[#allocation2 + $0xcc] ss:$80 sps:$4 sm:$0xff]  }
 0x1fd   :  { %6649 = vmatprep.subr.bf16.mxu1 %v11085_v62  ;;  %6500 = vmatpush1.bf16.msra.mxu0 %v11086_v63  ;;  %v11161_v62 = vld [vmem:[#allocation2 + $0x700] ss:$80 sps:$4 sm:$0xff]   ;;  %v11169_v63 = vld [vmem:[#allocation2 + $0x7a4] ss:$80 sps:$4 sm:$0xff]  }
 0x1fe   :  { %6501 = vmatprep.subr.bf16.mxu0 %v11094_v1 }
 0x200   :  { %6650 = vmatpush1.bf16.msra.mxu1 %v11083_v2 }
 0x201   :  { %6651 = vmatprep.subr.bf16.mxu1 %v11091_v3  ;;  %6502 = vmatpush1.bf16.msra.mxu0 %v11092_v4  ;;  %v11152_v4 = vld [vmem:[#allocation2 + $0xc8] ss:$80 sps:$4 sm:$0xff]  }
 0x202   :  { %6717 = vmatprep.subr.bf16.mxu0 %v11103_v5  ;;  %v11160_v5 = vld [vmem:[#allocation2 + $0x16c] ss:$80 sps:$4 sm:$0xff]  }
 0x204   :  { %6652 = vmatpush1.bf16.msra.mxu1 %v11089_v7  ;;  %6504 = vmatmul.mubr.bf16.vlgmr.msra.gmra.mrb[4].mxu0 %v12608_v23 }
 0x205   :  { %6653 = vmatprep.subr.bf16.mxu1 %v11097_v9  ;;  %6718 = vmatpush1.bf16.msra.mxu0 %v11101_v11  ;;  %v11167_v9 = vld [vmem:[#allocation2 + $0x7a0] ss:$80 sps:$4 sm:$0xff]   ;;  %v11175_v11 = vld [vmem:[#allocation2 + $0x844] ss:$80 sps:$4 sm:$0xff]  }
 0x206   :  { %6719 = vmatprep.subr.bf16.mxu0 %v11109_v13  ;;  %6749 = vmatprep.mubr.bf16.mxu0 %v12611_v25  ;;  %v11158_v13 = vld [vmem:[#allocation2 + $0x168] ss:$80 sps:$4 sm:$0xff]  }
 0x208   :  { %6654 = vmatpush1.bf16.msra.mxu1 %v11095_v14  ;;  %v11166_v14 = vld [vmem:[#allocation2 + $0x20c] ss:$80 sps:$4 sm:$0xff]  }
 0x209   :  { %6655 = vmatprep.subr.bf16.mxu1 %v11100_v15  ;;  %6720 = vmatpush1.bf16.msra.mxu0 %v11107_v16  ;;  %v11173_v15 = vld [vmem:[#allocation2 + $0x840] ss:$80 sps:$4 sm:$0xff]   ;;  %v11181_v16 = vld [vmem:[#allocation2 + $0x8e4] ss:$80 sps:$4 sm:$0xff]  }
 0x20a   :  { %6721 = vmatprep.subr.bf16.mxu0 %v11115_v18 }
 0x20c   :  { %6656 = vmatpush1.bf16.msra.mxu1 %v11098_v21 }
 0x20d   :  { %6657 = vmatprep.subr.bf16.mxu1 %v11106_v22  ;;  %6722 = vmatpush1.bf16.msra.mxu0 %v11113_v26  ;;  %v11164_v22 = vld [vmem:[#allocation2 + $0x208] ss:$80 sps:$4 sm:$0xff]   ;;  %v11172_v26 = vld [vmem:[#allocation2 + $0x2ac] ss:$80 sps:$4 sm:$0xff]  }
 0x20e   :  { %6723 = vmatprep.subr.bf16.mxu0 %v11121_v28 }
 0x210   :  { %6658 = vmatpush1.bf16.msra.mxu1 %v11104_v29  ;;  %v11179_v29 = vld [vmem:[#allocation2 + $0x8e0] ss:$80 sps:$4 sm:$0xff]  }
 0x211   :  { %6659 = vmatprep.subr.bf16.mxu1 %v11112_v17  ;;  %6724 = vmatpush1.bf16.msra.mxu0 %v11119_v30  ;;  %v11187_v17 = vld [vmem:[#allocation2 + $0x984] ss:$80 sps:$4 sm:$0xff]  }
 0x212   :  { %6725 = vmatprep.subr.bf16.mxu0 %v11127_v32  ;;  %v11170_v32 = vld [vmem:[#allocation2 + $0x2a8] ss:$80 sps:$4 sm:$0xff]  }
 0x214   :  { %6660 = vmatpush1.bf16.msra.mxu1 %v11110_v33  ;;  %v11178_v33 = vld [vmem:[#allocation2 + $0x34c] ss:$80 sps:$4 sm:$0xff]  }
 0x215   :  { %6661 = vmatprep.subr.bf16.mxu1 %v11118_v35  ;;  %6726 = vmatpush1.bf16.msra.mxu0 %v11125_v36  ;;  %v11185_v35 = vld [vmem:[#allocation2 + $0x980] ss:$80 sps:$4 sm:$0xff]   ;;  %v11193_v36 = vld [vmem:[#allocation2 + $0xa24] ss:$80 sps:$4 sm:$0xff]  }
 0x216   :  { %6727 = vmatprep.subr.bf16.mxu0 %v11133_v37  ;;  %v11176_v37 = vld [vmem:[#allocation2 + $0x348] ss:$80 sps:$4 sm:$0xff]  }
 0x217   :  { %v6177_v40 = vpop.f32.mrb[0].mxu0 }
 0x218   :  { %v12671_v41 = vadd.f32 %v12653_v8, %v6177_v40  ;;  %v6179_v42 = vpop.f32.mrb[1].mxu0  ;;  %6662 = vmatpush1.bf16.msra.mxu1 %v11116_v19  ;;  %v11142_v8 = vld [vmem:[#allocation2 + $0x1e1c] ss:$80 sps:$4 sm:$0xff]  }
 0x219   :  { %v12674_v44 = vadd.f32 %v12657_v10, %v6179_v42  ;;  %v6181_v46 = vpop.f32.mrb[2].mxu0  ;;  %6663 = vmatprep.subr.bf16.mxu1 %v11124_v38  ;;  %6728 = vmatpush1.bf16.msra.mxu0 %v11131_v12  ;;  %v11143_v10 = vld [vmem:[#allocation2 + $0x520] ss:$80 sps:$4 sm:$0xff]   ;;  %v11184_v19 = vld [vmem:[#allocation2 + $0x3ec] ss:$80 sps:$4 sm:$0xff]  }
 0x21a   :  { %v6182_v47 = vpop.f32.mrb[3].mxu0  ;;  %6729 = vmatprep.subr.bf16.mxu0 %v11136_v39  ;;  %v11191_v38 = vld [vmem:[#allocation2 + $0xa20] ss:$80 sps:$4 sm:$0xff]   ;;  %v11199_v12 = vld [vmem:[#allocation2 + $0xac4] ss:$80 sps:$4 sm:$0xff]  }
 0x21b   :  { %v11182_v39 = vld [vmem:[#allocation2 + $0x3e8] ss:$80 sps:$4 sm:$0xff]   ;;  %v11190_v40 = vld [vmem:[#allocation2 + $0x48c] ss:$80 sps:$4 sm:$0xff]   ;;  %v11197_v42 = vld [vmem:[#allocation2 + $0xac0] ss:$80 sps:$4 sm:$0xff]  }
 0x21c   :  { %6664 = vmatpush1.bf16.msra.mxu1 %v11122_v43  ;;  %v11205_v43 = vld [vmem:[#allocation2 + $0xb64] ss:$80 sps:$4 sm:$0xff]   ;;  %v11196_v46 = vld [vmem:[#allocation2 + $0x52c] ss:$80 sps:$4 sm:$0xff]   ;;  %v11203_v47 = vld [vmem:[#allocation2 + $0xb60] ss:$80 sps:$4 sm:$0xff]  }
 0x21d   :  { %6665 = vmatprep.subr.bf16.mxu1 %v11130_v45  ;;  %6730 = vmatpush1.bf16.msra.mxu0 %v11134_v48  ;;  %v11188_v45 = vld [vmem:[#allocation2 + $0x488] ss:$80 sps:$4 sm:$0xff]   ;;  %v11211_v48 = vld [vmem:[#allocation2 + $0xc04] ss:$80 sps:$4 sm:$0xff]  }
 0x21e   :  { %6731 = vmatprep.subr.bf16.mxu0 %v11139_v49  ;;  %v11194_v49 = vld [vmem:[#allocation2 + $0x528] ss:$80 sps:$4 sm:$0xff]  }
 0x220   :  { %6666 = vmatpush1.bf16.msra.mxu1 %v11128_v50  ;;  %v11202_v50 = vld [vmem:[#allocation2 + $0x5cc] ss:$80 sps:$4 sm:$0xff]  }
 0x221   :  { %6732 = vmatpush1.bf16.msra.mxu0 %v11137_v51  ;;  %6676 = vmatprep.subr.bf16.mxu1 %v11142_v8  ;;  %v11209_v51 = vld [vmem:[#allocation2 + $0xc00] ss:$80 sps:$4 sm:$0xff]   ;;  %v11217_v8 = vld [vmem:[#allocation2 + $0xca4] ss:$80 sps:$4 sm:$0xff]  }
 0x222   :  { %6733 = vmatprep.subr.bf16.mxu0 %v11145_v52  ;;  %v11200_v52 = vld [vmem:[#allocation2 + $0x5c8] ss:$80 sps:$4 sm:$0xff]  }
 0x223   :  { %6668 = vmatmul.mubr.bf16.vlgmr.msra.gmra.mrb[12].mxu1 %v12608_v23 }
 0x224   :  { %6677 = vmatpush1.bf16.msra.mxu1 %v11140_v53  ;;  %6708 = vmatprep.mubr.bf16.mxu1 %v12450_v0  ;;  %v11208_v53 = vld [vmem:[#allocation2 + $0x66c] ss:$80 sps:$4 sm:$0xff]  }
 0x225   :  { %6734 = vmatpush1.bf16.msra.mxu0 %v11143_v10  ;;  %6881 = vmatprep.subr.bf16.mxu1 %v11148_v54  ;;  %v11215_v10 = vld [vmem:[#allocation2 + $0xca0] ss:$80 sps:$4 sm:$0xff]   ;;  %v11223_v54 = vld [vmem:[#allocation2 + $0xd44] ss:$80 sps:$4 sm:$0xff]  }
 0x226   :  { %6735 = vmatprep.subr.bf16.mxu0 %v11151_v55  ;;  %v11206_v55 = vld [vmem:[#allocation2 + $0x668] ss:$80 sps:$4 sm:$0xff]  }
 0x229   :  { %6736 = vmatpush1.bf16.msra.mxu0 %v11149_v56  ;;  %v11214_v56 = vld [vmem:[#allocation2 + $0x70c] ss:$80 sps:$4 sm:$0xff]  }
 0x22a   :  { %6737 = vmatprep.subr.bf16.mxu0 %v11157_v57  ;;  %v11221_v57 = vld [vmem:[#allocation2 + $0xd40] ss:$80 sps:$4 sm:$0xff]  }
 0x22d   :  { %6738 = vmatpush1.bf16.msra.mxu0 %v11155_v58  ;;  %v11229_v58 = vld [vmem:[#allocation2 + $0xde4] ss:$80 sps:$4 sm:$0xff]  }
 0x22e   :  { %v12678_v1 = vpop.f32.mrb[4].mxu1  ;;  %6739 = vmatprep.subr.bf16.mxu0 %v11163_v59  ;;  %v11212_v59 = vld [vmem:[#allocation2 + $0x708] ss:$80 sps:$4 sm:$0xff]  }
 0x22f   :  { %10159 = vmatmul.mubr.msk.bf16.vlgmr.msra.gmra.mrb[12].mxu1 %vm6057_vm0, %v12615_v27  ;;  %v12682_v2 = vpop.f32.mrb[5].mxu1 }
 0x230   :  { %6882 = vmatpush1.bf16.msra.mxu1 %v11146_v60  ;;  %v6386_v3 = vpop.f32.mrb[6].mxu1  ;;  %6913 = vmatprep.mubr.bf16.mxu1 %v12611_v25  ;;  %v11220_v60 = vld [vmem:[#allocation2 + $0x7ac] ss:$80 sps:$4 sm:$0xff]  }
 0x231   :  { %v6387_v7 = vpop.f32.mrb[7].mxu1  ;;  %6883 = vmatprep.subr.bf16.mxu1 %v11154_v61  ;;  %6740 = vmatpush1.bf16.msra.mxu0 %v11161_v62  ;;  %v11227_v61 = vld [vmem:[#allocation2 + $0xde0] ss:$80 sps:$4 sm:$0xff]   ;;  %v11235_v62 = vld [vmem:[#allocation2 + $0xe84] ss:$80 sps:$4 sm:$0xff]  }
 0x232   :  { %6741 = vmatprep.subr.bf16.mxu0 %v11169_v63  ;;  %v11218_v63 = vld [vmem:[#allocation2 + $0x7a8] ss:$80 sps:$4 sm:$0xff]   ;;  %v11226_v3 = vld [vmem:[#allocation2 + $0x84c] ss:$80 sps:$4 sm:$0xff]  }
 0x233   :  { %v11224_v7 = vld [vmem:[#allocation2 + $0x848] ss:$80 sps:$4 sm:$0xff]  }
 0x234   :  { %6884 = vmatpush1.bf16.msra.mxu1 %v11152_v4  ;;  %v11233_v4 = vld [vmem:[#allocation2 + $0xe80] ss:$80 sps:$4 sm:$0xff]  }
 0x235   :  { %6885 = vmatprep.subr.bf16.mxu1 %v11160_v5  ;;  %6742 = vmatpush1.bf16.msra.mxu0 %v11167_v9  ;;  %v11241_v5 = vld [vmem:[#allocation2 + $0xf24] ss:$80 sps:$4 sm:$0xff]   ;;  %v11232_v9 = vld [vmem:[#allocation2 + $0x8ec] ss:$80 sps:$4 sm:$0xff]  }
 0x236   :  { %6743 = vmatprep.subr.bf16.mxu0 %v11175_v11  ;;  %v12685_v18 = vpop.f32.mrb[8].mxu1  ;;  %v11239_v11 = vld [vmem:[#allocation2 + $0xf20] ss:$80 sps:$4 sm:$0xff]  }
 0x237   :  { %v12687_v21 = vpop.f32.mrb[9].mxu1 }
 0x238   :  { %6886 = vmatpush1.bf16.msra.mxu1 %v11158_v13  ;;  %v6550_v28 = vpop.f32.mrb[10].mxu1  ;;  %v11247_v13 = vld [vmem:[#allocation2 + $0xfc4] ss:$80 sps:$4 sm:$0xff]  }
 0x239   :  { %6887 = vmatprep.subr.bf16.mxu1 %v11166_v14  ;;  %6744 = vmatpush1.bf16.msra.mxu0 %v11173_v15  ;;  %v6551_v30 = vpop.f32.mrb[11].mxu1  ;;  %v11230_v14 = vld [vmem:[#allocation2 + $0x8e8] ss:$80 sps:$4 sm:$0xff]   ;;  %v11238_v15 = vld [vmem:[#allocation2 + $0x98c] ss:$80 sps:$4 sm:$0xff]  }
 0x23a   :  { %6745 = vmatprep.subr.bf16.mxu0 %v11181_v16  ;;  %v11245_v16 = vld [vmem:[#allocation2 + $0xfc0] ss:$80 sps:$4 sm:$0xff]   ;;  %v11244_v28 = vld [vmem:[#allocation2 + $0xa2c] ss:$80 sps:$4 sm:$0xff]   ;;  %v11242_v30 = vld [vmem:[#allocation2 + $0xa28] ss:$80 sps:$4 sm:$0xff]  }
 0x23c   :  { %6888 = vmatpush1.bf16.msra.mxu1 %v11164_v22  ;;  %v11253_v22 = vld [vmem:[#allocation2 + $0x1064] ss:$80 sps:$4 sm:$0xff]  }
 0x23d   :  { %6889 = vmatprep.subr.bf16.mxu1 %v11172_v26  ;;  %6746 = vmatpush1.bf16.msra.mxu0 %v11179_v29  ;;  %v11236_v26 = vld [vmem:[#allocation2 + $0x988] ss:$80 sps:$4 sm:$0xff]   ;;  %v11251_v29 = vld [vmem:[#allocation2 + $0x1060] ss:$80 sps:$4 sm:$0xff]  }
 0x23e   :  { %6747 = vmatprep.subr.bf16.mxu0 %v11187_v17  ;;  %v11259_v17 = vld [vmem:[#allocation2 + $0x1104] ss:$80 sps:$4 sm:$0xff]  }
 0x240   :  { %6890 = vmatpush1.bf16.msra.mxu1 %v11170_v32  ;;  %v11250_v32 = vld [vmem:[#allocation2 + $0xacc] ss:$80 sps:$4 sm:$0xff]  }
 0x241   :  { %6891 = vmatprep.subr.bf16.mxu1 %v11178_v33  ;;  %6748 = vmatpush1.bf16.msra.mxu0 %v11185_v35  ;;  %v11257_v33 = vld [vmem:[#allocation2 + $0x1100] ss:$80 sps:$4 sm:$0xff]   ;;  %v11265_v35 = vld [vmem:[#allocation2 + $0x11a4] ss:$80 sps:$4 sm:$0xff]  }
 0x242   :  { %6758 = vmatprep.subr.bf16.mxu0 %v11193_v36  ;;  %v11248_v36 = vld [vmem:[#allocation2 + $0xac8] ss:$80 sps:$4 sm:$0xff]  }
 0x244   :  { %6892 = vmatpush1.bf16.msra.mxu1 %v11176_v37  ;;  %6750 = vmatmul.mubr.bf16.vlgmr.msra.gmra.mrb[8].mxu0 %v12623_v20  ;;  %v11256_v37 = vld [vmem:[#allocation2 + $0xb6c] ss:$80 sps:$4 sm:$0xff]  }
 0x245   :  { %6893 = vmatprep.subr.bf16.mxu1 %v11184_v19  ;;  %6759 = vmatpush1.bf16.msra.mxu0 %v11191_v38  ;;  %v11263_v19 = vld [vmem:[#allocation2 + $0x11a0] ss:$80 sps:$4 sm:$0xff]   ;;  %v11271_v38 = vld [vmem:[#allocation2 + $0x1244] ss:$80 sps:$4 sm:$0xff]  }
 0x246   :  { %6760 = vmatprep.subr.bf16.mxu0 %v11199_v12  ;;  %6790 = vmatprep.mubr.bf16.mxu0 %v12627_v24  ;;  %v11254_v12 = vld [vmem:[#allocation2 + $0xb68] ss:$80 sps:$4 sm:$0xff]  }
 0x248   :  { %6894 = vmatpush1.bf16.msra.mxu1 %v11182_v39  ;;  %v11262_v39 = vld [vmem:[#allocation2 + $0xc0c] ss:$80 sps:$4 sm:$0xff]  }
 0x249   :  { %6895 = vmatprep.subr.bf16.mxu1 %v11190_v40  ;;  %6761 = vmatpush1.bf16.msra.mxu0 %v11197_v42  ;;  %v11269_v40 = vld [vmem:[#allocation2 + $0x1240] ss:$80 sps:$4 sm:$0xff]   ;;  %v11277_v42 = vld [vmem:[#allocation2 + $0x12e4] ss:$80 sps:$4 sm:$0xff]  }
 0x24a   :  { %6762 = vmatprep.subr.bf16.mxu0 %v11205_v43  ;;  %v11260_v43 = vld [vmem:[#allocation2 + $0xc08] ss:$80 sps:$4 sm:$0xff]  }
 0x24c   :  { %6896 = vmatpush1.bf16.msra.mxu1 %v11188_v45  ;;  %v11268_v45 = vld [vmem:[#allocation2 + $0xcac] ss:$80 sps:$4 sm:$0xff]  }
 0x24d   :  { %6897 = vmatprep.subr.bf16.mxu1 %v11196_v46  ;;  %6763 = vmatpush1.bf16.msra.mxu0 %v11203_v47  ;;  %v11275_v46 = vld [vmem:[#allocation2 + $0x12e0] ss:$80 sps:$4 sm:$0xff]   ;;  %v11283_v47 = vld [vmem:[#allocation2 + $0x1384] ss:$80 sps:$4 sm:$0xff]  }
 0x24e   :  { %6764 = vmatprep.subr.bf16.mxu0 %v11211_v48  ;;  %v11266_v48 = vld [vmem:[#allocation2 + $0xca8] ss:$80 sps:$4 sm:$0xff]  }
 0x250   :  { %6898 = vmatpush1.bf16.msra.mxu1 %v11194_v49  ;;  %v11274_v49 = vld [vmem:[#allocation2 + $0xd4c] ss:$80 sps:$4 sm:$0xff]  }
 0x251   :  { %6899 = vmatprep.subr.bf16.mxu1 %v11202_v50  ;;  %6765 = vmatpush1.bf16.msra.mxu0 %v11209_v51  ;;  %v11281_v50 = vld [vmem:[#allocation2 + $0x1380] ss:$80 sps:$4 sm:$0xff]   ;;  %v11289_v51 = vld [vmem:[#allocation2 + $0x1424] ss:$80 sps:$4 sm:$0xff]  }
 0x252   :  { %6766 = vmatprep.subr.bf16.mxu0 %v11217_v8  ;;  %v11272_v8 = vld [vmem:[#allocation2 + $0xd48] ss:$80 sps:$4 sm:$0xff]  }
 0x254   :  { %6900 = vmatpush1.bf16.msra.mxu1 %v11200_v52  ;;  %v11280_v52 = vld [vmem:[#allocation2 + $0xdec] ss:$80 sps:$4 sm:$0xff]  }
 0x255   :  { %6901 = vmatprep.subr.bf16.mxu1 %v11208_v53  ;;  %6767 = vmatpush1.bf16.msra.mxu0 %v11215_v10  ;;  %v11287_v53 = vld [vmem:[#allocation2 + $0x1420] ss:$80 sps:$4 sm:$0xff]   ;;  %v11278_v10 = vld [vmem:[#allocation2 + $0xde8] ss:$80 sps:$4 sm:$0xff]  }
 0x256   :  { %6768 = vmatprep.subr.bf16.mxu0 %v11223_v54  ;;  %v11295_v54 = vld [vmem:[#allocation2 + $0x14c4] ss:$80 sps:$4 sm:$0xff]  }
 0x258   :  { %6902 = vmatpush1.bf16.msra.mxu1 %v11206_v55  ;;  %v11286_v55 = vld [vmem:[#allocation2 + $0xe8c] ss:$80 sps:$4 sm:$0xff]  }
 0x259   :  { %6903 = vmatprep.subr.bf16.mxu1 %v11214_v56  ;;  %6769 = vmatpush1.bf16.msra.mxu0 %v11221_v57  ;;  %v11293_v56 = vld [vmem:[#allocation2 + $0x14c0] ss:$80 sps:$4 sm:$0xff]   ;;  %v11301_v57 = vld [vmem:[#allocation2 + $0x1564] ss:$80 sps:$4 sm:$0xff]  }
 0x25a   :  { %6770 = vmatprep.subr.bf16.mxu0 %v11229_v58  ;;  %v11284_v58 = vld [vmem:[#allocation2 + $0xe88] ss:$80 sps:$4 sm:$0xff]  }
 0x25c   :  { %6904 = vmatpush1.bf16.msra.mxu1 %v11212_v59  ;;  %v11292_v59 = vld [vmem:[#allocation2 + $0xf2c] ss:$80 sps:$4 sm:$0xff]  }
 0x25d   :  { %6905 = vmatprep.subr.bf16.mxu1 %v11220_v60  ;;  %6771 = vmatpush1.bf16.msra.mxu0 %v11227_v61  ;;  %v11299_v60 = vld [vmem:[#allocation2 + $0x1560] ss:$80 sps:$4 sm:$0xff]   ;;  %v11307_v61 = vld [vmem:[#allocation2 + $0x1604] ss:$80 sps:$4 sm:$0xff]  }
 0x25e   :  { %6772 = vmatprep.subr.bf16.mxu0 %v11235_v62  ;;  %v11290_v62 = vld [vmem:[#allocation2 + $0xf28] ss:$80 sps:$4 sm:$0xff]  }
 0x260   :  { %6906 = vmatpush1.bf16.msra.mxu1 %v11218_v63  ;;  %v11298_v63 = vld [vmem:[#allocation2 + $0xfcc] ss:$80 sps:$4 sm:$0xff]  }
 0x261   :  { %6907 = vmatprep.subr.bf16.mxu1 %v11226_v3  ;;  %6773 = vmatpush1.bf16.msra.mxu0 %v11233_v4  ;;  %v11305_v3 = vld [vmem:[#allocation2 + $0x1600] ss:$80 sps:$4 sm:$0xff]   ;;  %v11313_v4 = vld [vmem:[#allocation2 + $0x16a4] ss:$80 sps:$4 sm:$0xff]  }
 0x262   :  { %6774 = vmatprep.subr.bf16.mxu0 %v11241_v5  ;;  %v11296_v5 = vld [vmem:[#allocation2 + $0xfc8] ss:$80 sps:$4 sm:$0xff]  }
 0x264   :  { %6908 = vmatpush1.bf16.msra.mxu1 %v11224_v7  ;;  %v11304_v7 = vld [vmem:[#allocation2 + $0x106c] ss:$80 sps:$4 sm:$0xff]  }
 0x265   :  { %6909 = vmatprep.subr.bf16.mxu1 %v11232_v9  ;;  %6775 = vmatpush1.bf16.msra.mxu0 %v11239_v11  ;;  %v11311_v9 = vld [vmem:[#allocation2 + $0x16a0] ss:$80 sps:$4 sm:$0xff]   ;;  %v11319_v11 = vld [vmem:[#allocation2 + $0x1744] ss:$80 sps:$4 sm:$0xff]  }
 0x266   :  { %6776 = vmatprep.subr.bf16.mxu0 %v11247_v13  ;;  %v11302_v13 = vld [vmem:[#allocation2 + $0x1068] ss:$80 sps:$4 sm:$0xff]  }
 0x268   :  { %6910 = vmatpush1.bf16.msra.mxu1 %v11230_v14  ;;  %v11310_v14 = vld [vmem:[#allocation2 + $0x110c] ss:$80 sps:$4 sm:$0xff]  }
 0x269   :  { %6911 = vmatprep.subr.bf16.mxu1 %v11238_v15  ;;  %6777 = vmatpush1.bf16.msra.mxu0 %v11245_v16  ;;  %v11317_v15 = vld [vmem:[#allocation2 + $0x1740] ss:$80 sps:$4 sm:$0xff]   ;;  %v11325_v16 = vld [vmem:[#allocation2 + $0x17e4] ss:$80 sps:$4 sm:$0xff]  }
 0x26a   :  { %6778 = vmatprep.subr.bf16.mxu0 %v11253_v22  ;;  %v11308_v22 = vld [vmem:[#allocation2 + $0x1108] ss:$80 sps:$4 sm:$0xff]  }
 0x26c   :  { %6912 = vmatpush1.bf16.msra.mxu1 %v11236_v26  ;;  %v11316_v26 = vld [vmem:[#allocation2 + $0x11ac] ss:$80 sps:$4 sm:$0xff]  }
 0x26d   :  { %6922 = vmatprep.subr.bf16.mxu1 %v11244_v28  ;;  %6779 = vmatpush1.bf16.msra.mxu0 %v11251_v29  ;;  %v11323_v28 = vld [vmem:[#allocation2 + $0x17e0] ss:$80 sps:$4 sm:$0xff]   ;;  %v11331_v29 = vld [vmem:[#allocation2 + $0x1884] ss:$80 sps:$4 sm:$0xff]  }
 0x26e   :  { %6780 = vmatprep.subr.bf16.mxu0 %v11259_v17  ;;  %v11314_v17 = vld [vmem:[#allocation2 + $0x11a8] ss:$80 sps:$4 sm:$0xff]  }
 0x26f   :  { %6914 = vmatmul.mubr.bf16.vlgmr.msra.gmra.mrb[16].mxu1 %v12623_v20 }
 0x270   :  { %6923 = vmatpush1.bf16.msra.mxu1 %v11242_v30  ;;  %6954 = vmatprep.mubr.bf16.mxu1 %v12627_v24  ;;  %v11322_v30 = vld [vmem:[#allocation2 + $0x124c] ss:$80 sps:$4 sm:$0xff]  }
 0x271   :  { %6924 = vmatprep.subr.bf16.mxu1 %v11250_v32  ;;  %6781 = vmatpush1.bf16.msra.mxu0 %v11257_v33  ;;  %v11329_v32 = vld [vmem:[#allocation2 + $0x1880] ss:$80 sps:$4 sm:$0xff]   ;;  %v11337_v33 = vld [vmem:[#allocation2 + $0x1924] ss:$80 sps:$4 sm:$0xff]  }
 0x272   :  { %6782 = vmatprep.subr.bf16.mxu0 %v11265_v35  ;;  %v11320_v35 = vld [vmem:[#allocation2 + $0x1248] ss:$80 sps:$4 sm:$0xff]  }
 0x274   :  { %6925 = vmatpush1.bf16.msra.mxu1 %v11248_v36  ;;  %v11328_v36 = vld [vmem:[#allocation2 + $0x12ec] ss:$80 sps:$4 sm:$0xff]  }
 0x275   :  { %6926 = vmatprep.subr.bf16.mxu1 %v11256_v37  ;;  %6783 = vmatpush1.bf16.msra.mxu0 %v11263_v19  ;;  %v11335_v37 = vld [vmem:[#allocation2 + $0x1920] ss:$80 sps:$4 sm:$0xff]   ;;  %v11343_v19 = vld [vmem:[#allocation2 + $0x19c4] ss:$80 sps:$4 sm:$0xff]  }
 0x276   :  { %6784 = vmatprep.subr.bf16.mxu0 %v11271_v38  ;;  %v11326_v38 = vld [vmem:[#allocation2 + $0x12e8] ss:$80 sps:$4 sm:$0xff]  }
 0x278   :  { %6927 = vmatpush1.bf16.msra.mxu1 %v11254_v12  ;;  %v11334_v12 = vld [vmem:[#allocation2 + $0x138c] ss:$80 sps:$4 sm:$0xff]  }
 0x279   :  { %6928 = vmatprep.subr.bf16.mxu1 %v11262_v39  ;;  %6785 = vmatpush1.bf16.msra.mxu0 %v11269_v40  ;;  %v11341_v39 = vld [vmem:[#allocation2 + $0x19c0] ss:$80 sps:$4 sm:$0xff]   ;;  %v11349_v40 = vld [vmem:[#allocation2 + $0x1a64] ss:$80 sps:$4 sm:$0xff]  }
 0x27a   :  { %6786 = vmatprep.subr.bf16.mxu0 %v11277_v42  ;;  %v11332_v42 = vld [vmem:[#allocation2 + $0x1388] ss:$80 sps:$4 sm:$0xff]  }
 0x27c   :  { %6929 = vmatpush1.bf16.msra.mxu1 %v11260_v43  ;;  %v11340_v43 = vld [vmem:[#allocation2 + $0x142c] ss:$80 sps:$4 sm:$0xff]  }
 0x27d   :  { %6930 = vmatprep.subr.bf16.mxu1 %v11268_v45  ;;  %6787 = vmatpush1.bf16.msra.mxu0 %v11275_v46  ;;  %v11347_v45 = vld [vmem:[#allocation2 + $0x1a60] ss:$80 sps:$4 sm:$0xff]   ;;  %v11355_v46 = vld [vmem:[#allocation2 + $0x1b04] ss:$80 sps:$4 sm:$0xff]  }
 0x27e   :  { %6788 = vmatprep.subr.bf16.mxu0 %v11283_v47  ;;  %v11338_v47 = vld [vmem:[#allocation2 + $0x1428] ss:$80 sps:$4 sm:$0xff]  }
 0x280   :  { %6931 = vmatpush1.bf16.msra.mxu1 %v11266_v48  ;;  %v11346_v48 = vld [vmem:[#allocation2 + $0x14cc] ss:$80 sps:$4 sm:$0xff]  }
 0x281   :  { %6932 = vmatprep.subr.bf16.mxu1 %v11274_v49  ;;  %6789 = vmatpush1.bf16.msra.mxu0 %v11281_v50  ;;  %v11353_v49 = vld [vmem:[#allocation2 + $0x1b00] ss:$80 sps:$4 sm:$0xff]   ;;  %v11361_v50 = vld [vmem:[#allocation2 + $0x1ba4] ss:$80 sps:$4 sm:$0xff]  }
 0x282   :  { %6799 = vmatprep.subr.bf16.mxu0 %v11289_v51  ;;  %v11344_v51 = vld [vmem:[#allocation2 + $0x14c8] ss:$80 sps:$4 sm:$0xff]  }
 0x284   :  { %6933 = vmatpush1.bf16.msra.mxu1 %v11272_v8  ;;  %6791 = vmatmul.mubr.bf16.vlgmr.msra.gmra.mrb[8].mxu0 %v12640_v34  ;;  %v11352_v8 = vld [vmem:[#allocation2 + $0x156c] ss:$80 sps:$4 sm:$0xff]  }
 0x285   :  { %6934 = vmatprep.subr.bf16.mxu1 %v11280_v52  ;;  %6800 = vmatpush1.bf16.msra.mxu0 %v11287_v53  ;;  %v11359_v52 = vld [vmem:[#allocation2 + $0x1ba0] ss:$80 sps:$4 sm:$0xff]   ;;  %v11367_v53 = vld [vmem:[#allocation2 + $0x1c44] ss:$80 sps:$4 sm:$0xff]  }
 0x286   :  { %6801 = vmatprep.subr.bf16.mxu0 %v11295_v54  ;;  %6831 = vmatprep.mubr.bf16.mxu0 %v12634_v31  ;;  %v11358_v54 = vld [vmem:[#allocation2 + $0x160c] ss:$80 sps:$4 sm:$0xff]  }
 0x288   :  { %6935 = vmatpush1.bf16.msra.mxu1 %v11278_v10  ;;  %v11350_v10 = vld [vmem:[#allocation2 + $0x1568] ss:$80 sps:$4 sm:$0xff]  }
 0x289   :  { %6936 = vmatprep.subr.bf16.mxu1 %v11286_v55  ;;  %6802 = vmatpush1.bf16.msra.mxu0 %v11293_v56  ;;  %v11365_v55 = vld [vmem:[#allocation2 + $0x1c40] ss:$80 sps:$4 sm:$0xff]   ;;  %v11373_v56 = vld [vmem:[#allocation2 + $0x1ce4] ss:$80 sps:$4 sm:$0xff]  }
 0x28a   :  { %6803 = vmatprep.subr.bf16.mxu0 %v11301_v57  ;;  %v11356_v57 = vld [vmem:[#allocation2 + $0x1608] ss:$80 sps:$4 sm:$0xff]  }
 0x28c   :  { %6937 = vmatpush1.bf16.msra.mxu1 %v11284_v58  ;;  %v11364_v58 = vld [vmem:[#allocation2 + $0x16ac] ss:$80 sps:$4 sm:$0xff]  }
 0x28d   :  { %6938 = vmatprep.subr.bf16.mxu1 %v11292_v59  ;;  %6804 = vmatpush1.bf16.msra.mxu0 %v11299_v60  ;;  %v11371_v59 = vld [vmem:[#allocation2 + $0x1ce0] ss:$80 sps:$4 sm:$0xff]   ;;  %v11379_v60 = vld [vmem:[#allocation2 + $0x1d84] ss:$80 sps:$4 sm:$0xff]  }
 0x28e   :  { %6805 = vmatprep.subr.bf16.mxu0 %v11307_v61  ;;  %v11362_v61 = vld [vmem:[#allocation2 + $0x16a8] ss:$80 sps:$4 sm:$0xff]  }
 0x290   :  { %6939 = vmatpush1.bf16.msra.mxu1 %v11290_v62  ;;  %v11370_v62 = vld [vmem:[#allocation2 + $0x174c] ss:$80 sps:$4 sm:$0xff]  }
 0x291   :  { %6940 = vmatprep.subr.bf16.mxu1 %v11298_v63  ;;  %6806 = vmatpush1.bf16.msra.mxu0 %v11305_v3  ;;  %v11377_v63 = vld [vmem:[#allocation2 + $0x1d80] ss:$80 sps:$4 sm:$0xff]   ;;  %v11385_v3 = vld [vmem:[#allocation2 + $0x1e24] ss:$80 sps:$4 sm:$0xff]  }
 0x292   :  { %6807 = vmatprep.subr.bf16.mxu0 %v11313_v4  ;;  %v11368_v4 = vld [vmem:[#allocation2 + $0x1748] ss:$80 sps:$4 sm:$0xff]  }
 0x294   :  { %6941 = vmatpush1.bf16.msra.mxu1 %v11296_v5  ;;  %v11376_v5 = vld [vmem:[#allocation2 + $0x17ec] ss:$80 sps:$4 sm:$0xff]  }
 0x295   :  { %6942 = vmatprep.subr.bf16.mxu1 %v11304_v7  ;;  %6808 = vmatpush1.bf16.msra.mxu0 %v11311_v9  ;;  %v11383_v7 = vld [vmem:[#allocation2 + $0x1e20] ss:$80 sps:$4 sm:$0xff]   ;;  %v11397_v9 = vld [vmem:[#allocation2 + $0x34] ss:$80 sps:$4 sm:$0xff]  }
 0x296   :  { %6809 = vmatprep.subr.bf16.mxu0 %v11319_v11  ;;  %v11374_v11 = vld [vmem:[#allocation2 + $0x17e8] ss:$80 sps:$4 sm:$0xff]  }
 0x298   :  { %6943 = vmatpush1.bf16.msra.mxu1 %v11302_v13  ;;  %v11382_v13 = vld [vmem:[#allocation2 + $0x188c] ss:$80 sps:$4 sm:$0xff]  }
 0x299   :  { %6944 = vmatprep.subr.bf16.mxu1 %v11310_v14  ;;  %6810 = vmatpush1.bf16.msra.mxu0 %v11317_v15  ;;  %v11380_v14 = vld [vmem:[#allocation2 + $0x1888] ss:$80 sps:$4 sm:$0xff]   ;;  %v11388_v15 = vld [vmem:[#allocation2 + $0x192c] ss:$80 sps:$4 sm:$0xff]  }
 0x29a   :  { %6811 = vmatprep.subr.bf16.mxu0 %v11325_v16  ;;  %v11386_v16 = vld [vmem:[#allocation2 + $0x1928] ss:$80 sps:$4 sm:$0xff]  }
 0x29c   :  { %6945 = vmatpush1.bf16.msra.mxu1 %v11308_v22  ;;  %v11391_v22 = vld [vmem:[#allocation2 + $0x19cc] ss:$80 sps:$4 sm:$0xff]  }
 0x29d   :  { %6946 = vmatprep.subr.bf16.mxu1 %v11316_v26  ;;  %6812 = vmatpush1.bf16.msra.mxu0 %v11323_v28  ;;  %v11395_v26 = vld [vmem:[#allocation2 + $0x30] ss:$80 sps:$4 sm:$0xff]   ;;  %v11403_v28 = vld [vmem:[#allocation2 + $0xd4] ss:$80 sps:$4 sm:$0xff]  }
 0x29e   :  { %6813 = vmatprep.subr.bf16.mxu0 %v11331_v29  ;;  %v11389_v29 = vld [vmem:[#allocation2 + $0x19c8] ss:$80 sps:$4 sm:$0xff]  }
 0x2a0   :  { %6947 = vmatpush1.bf16.msra.mxu1 %v11314_v17  ;;  %v11394_v17 = vld [vmem:[#allocation2 + $0x1a6c] ss:$80 sps:$4 sm:$0xff]  }
 0x2a1   :  { %6948 = vmatprep.subr.bf16.mxu1 %v11322_v30  ;;  %6814 = vmatpush1.bf16.msra.mxu0 %v11329_v32  ;;  %v11401_v30 = vld [vmem:[#allocation2 + $0xd0] ss:$80 sps:$4 sm:$0xff]   ;;  %v11409_v32 = vld [vmem:[#allocation2 + $0x174] ss:$80 sps:$4 sm:$0xff]  }
 0x2a2   :  { %6815 = vmatprep.subr.bf16.mxu0 %v11337_v33  ;;  %v11392_v33 = vld [vmem:[#allocation2 + $0x1a68] ss:$80 sps:$4 sm:$0xff]  }
 0x2a4   :  { %6949 = vmatpush1.bf16.msra.mxu1 %v11320_v35  ;;  %v11400_v35 = vld [vmem:[#allocation2 + $0x1b0c] ss:$80 sps:$4 sm:$0xff]  }
 0x2a5   :  { %6950 = vmatprep.subr.bf16.mxu1 %v11328_v36  ;;  %6816 = vmatpush1.bf16.msra.mxu0 %v11335_v37  ;;  %v11407_v36 = vld [vmem:[#allocation2 + $0x170] ss:$80 sps:$4 sm:$0xff]   ;;  %v11415_v37 = vld [vmem:[#allocation2 + $0x214] ss:$80 sps:$4 sm:$0xff]  }
 0x2a6   :  { %6817 = vmatprep.subr.bf16.mxu0 %v11343_v19 }
 0x2a8   :  { %6951 = vmatpush1.bf16.msra.mxu1 %v11326_v38  ;;  %v11398_v38 = vld [vmem:[#allocation2 + $0x1b08] ss:$80 sps:$4 sm:$0xff]  }
 0x2a9   :  { %6952 = vmatprep.subr.bf16.mxu1 %v11334_v12  ;;  %6818 = vmatpush1.bf16.msra.mxu0 %v11341_v39  ;;  %v11406_v39 = vld [vmem:[#allocation2 + $0x1bac] ss:$80 sps:$4 sm:$0xff]  }
 0x2aa   :  { %6819 = vmatprep.subr.bf16.mxu0 %v11349_v40 }
 0x2ac   :  { %6953 = vmatpush1.bf16.msra.mxu1 %v11332_v42 }
 0x2ad   :  { %6963 = vmatprep.subr.bf16.mxu1 %v11340_v43  ;;  %6820 = vmatpush1.bf16.msra.mxu0 %v11347_v45  ;;  %v11413_v45 = vld [vmem:[#allocation2 + $0x210] ss:$80 sps:$4 sm:$0xff]  }
 0x2ae   :  { %6821 = vmatprep.subr.bf16.mxu0 %v11355_v46  ;;  %v11421_v46 = vld [vmem:[#allocation2 + $0x2b4] ss:$80 sps:$4 sm:$0xff]  }
 0x2af   :  { %6955 = vmatmul.mubr.bf16.vlgmr.msra.gmra.mrb[16].mxu1 %v12640_v34 }
 0x2b0   :  { %6964 = vmatpush1.bf16.msra.mxu1 %v11338_v47  ;;  %6995 = vmatprep.mubr.bf16.mxu1 %v12634_v31 }
 0x2b1   :  { %6965 = vmatprep.subr.bf16.mxu1 %v11346_v48  ;;  %6822 = vmatpush1.bf16.msra.mxu0 %v11353_v49  ;;  %v11404_v49 = vld [vmem:[#allocation2 + $0x1ba8] ss:$80 sps:$4 sm:$0xff]  }
 0x2b2   :  { %6823 = vmatprep.subr.bf16.mxu0 %v11361_v50  ;;  %v11412_v50 = vld [vmem:[#allocation2 + $0x1c4c] ss:$80 sps:$4 sm:$0xff]  }
 0x2b4   :  { %6966 = vmatpush1.bf16.msra.mxu1 %v11344_v51  ;;  %v11427_v51 = vld [vmem:[#allocation2 + $0x354] ss:$80 sps:$4 sm:$0xff]  }
 0x2b5   :  { %6967 = vmatprep.subr.bf16.mxu1 %v11352_v8  ;;  %6824 = vmatpush1.bf16.msra.mxu0 %v11359_v52  ;;  %v11418_v8 = vld [vmem:[#allocation2 + $0x1cec] ss:$80 sps:$4 sm:$0xff]   ;;  %v11425_v52 = vld [vmem:[#allocation2 + $0x350] ss:$80 sps:$4 sm:$0xff]  }
 0x2b6   :  { %6825 = vmatprep.subr.bf16.mxu0 %v11367_v53  ;;  %v11430_v53 = vld [vmem:[#allocation2 + $0x3f4] ss:$80 sps:$4 sm:$0xff]  }
 0x2b8   :  { %6968 = vmatpush1.bf16.msra.mxu1 %v11350_v10  ;;  %v11416_v10 = vld [vmem:[#allocation2 + $0x1ce8] ss:$80 sps:$4 sm:$0xff]  }
 0x2b9   :  { %6969 = vmatprep.subr.bf16.mxu1 %v11358_v54  ;;  %6826 = vmatpush1.bf16.msra.mxu0 %v11365_v55  ;;  %v11424_v54 = vld [vmem:[#allocation2 + $0x1d8c] ss:$80 sps:$4 sm:$0xff]   ;;  %v11428_v55 = vld [vmem:[#allocation2 + $0x3f0] ss:$80 sps:$4 sm:$0xff]  }
 0x2ba   :  { %6827 = vmatprep.subr.bf16.mxu0 %v11373_v56  ;;  %v11433_v56 = vld [vmem:[#allocation2 + $0x494] ss:$80 sps:$4 sm:$0xff]  }
 0x2bc   :  { %6970 = vmatpush1.bf16.msra.mxu1 %v11356_v57  ;;  %v11422_v57 = vld [vmem:[#allocation2 + $0x1d88] ss:$80 sps:$4 sm:$0xff]  }
 0x2bd   :  { %6971 = vmatprep.subr.bf16.mxu1 %v11364_v58  ;;  %6828 = vmatpush1.bf16.msra.mxu0 %v11371_v59  ;;  %v11431_v58 = vld [vmem:[#allocation2 + $0x490] ss:$80 sps:$4 sm:$0xff]   ;;  %v11436_v59 = vld [vmem:[#allocation2 + $0x1e2c] ss:$80 sps:$4 sm:$0xff]  }
 0x2be   :  { %6829 = vmatprep.subr.bf16.mxu0 %v11379_v60  ;;  %v11439_v60 = vld [vmem:[#allocation2 + $0x534] ss:$80 sps:$4 sm:$0xff]  }
 0x2c0   :  { %6972 = vmatpush1.bf16.msra.mxu1 %v11362_v61  ;;  %v11434_v61 = vld [vmem:[#allocation2 + $0x1e28] ss:$80 sps:$4 sm:$0xff]  }
 0x2c1   :  { %6973 = vmatprep.subr.bf16.mxu1 %v11370_v62  ;;  %6830 = vmatpush1.bf16.msra.mxu0 %v11377_v63  ;;  %v11437_v62 = vld [vmem:[#allocation2 + $0x530] ss:$80 sps:$4 sm:$0xff]   ;;  %v11442_v63 = vld [vmem:[#allocation2 + $0x3c] ss:$80 sps:$4 sm:$0xff]  }
 0x2c2   :  { %6840 = vmatprep.subr.bf16.mxu0 %v11385_v3  ;;  %v11445_v3 = vld [vmem:[#allocation2 + $0x5d4] ss:$80 sps:$4 sm:$0xff]  }
 0x2c4   :  { %6974 = vmatpush1.bf16.msra.mxu1 %v11368_v4  ;;  %6832 = vmatmul.mubr.bf16.vlgmr.msra.gmra.mrb[8].mxu0 %v12608_v23  ;;  %v11443_v4 = vld [vmem:[#allocation2 + $0x5d0] ss:$80 sps:$4 sm:$0xff]  }
 0x2c5   :  { %6975 = vmatprep.subr.bf16.mxu1 %v11376_v5  ;;  %6841 = vmatpush1.bf16.msra.mxu0 %v11383_v7  ;;  %v11451_v5 = vld [vmem:[#allocation2 + $0x674] ss:$80 sps:$4 sm:$0xff]   ;;  %v11449_v7 = vld [vmem:[#allocation2 + $0x670] ss:$80 sps:$4 sm:$0xff]  }
 0x2c6   :  { %6872 = vmatprep.mubr.bf16.mxu0 %v12450_v0  ;;  %7045 = vmatprep.subr.bf16.mxu0 %v11397_v9  ;;  %v11457_v9 = vld [vmem:[#allocation2 + $0x714] ss:$80 sps:$4 sm:$0xff]  }
 0x2c8   :  { %6976 = vmatpush1.bf16.msra.mxu1 %v11374_v11  ;;  %v11440_v11 = vld [vmem:[#allocation2 + $0x38] ss:$80 sps:$4 sm:$0xff]  }
 0x2c9   :  { %6977 = vmatprep.subr.bf16.mxu1 %v11382_v13  ;;  %v11448_v13 = vld [vmem:[#allocation2 + $0xdc] ss:$80 sps:$4 sm:$0xff]  }
 0x2cc   :  { %6978 = vmatpush1.bf16.msra.mxu1 %v11380_v14  ;;  %v11455_v14 = vld [vmem:[#allocation2 + $0x710] ss:$80 sps:$4 sm:$0xff]  }
 0x2cd   :  { %6979 = vmatprep.subr.bf16.mxu1 %v11388_v15  ;;  %v11463_v15 = vld [vmem:[#allocation2 + $0x7b4] ss:$80 sps:$4 sm:$0xff]  }
 0x2d0   :  { %6980 = vmatpush1.bf16.msra.mxu1 %v11386_v16  ;;  %10160 = vmatmul.mubr.msk.bf16.vlgmr.msra.gmra.mrb[8].mxu0 %vm6057_vm0, %v12615_v27  ;;  %v11446_v16 = vld [vmem:[#allocation2 + $0xd8] ss:$80 sps:$4 sm:$0xff]  }
 0x2d1   :  { %6981 = vmatprep.subr.bf16.mxu1 %v11391_v22  ;;  %7046 = vmatpush1.bf16.msra.mxu0 %v11395_v26  ;;  %v11454_v22 = vld [vmem:[#allocation2 + $0x17c] ss:$80 sps:$4 sm:$0xff]   ;;  %v11461_v26 = vld [vmem:[#allocation2 + $0x7b0] ss:$80 sps:$4 sm:$0xff]  }
 0x2d2   :  { %7047 = vmatprep.subr.bf16.mxu0 %v11403_v28  ;;  %7077 = vmatprep.mubr.bf16.mxu0 %v12611_v25  ;;  %v11469_v28 = vld [vmem:[#allocation2 + $0x854] ss:$80 sps:$4 sm:$0xff]  }
 0x2d4   :  { %6982 = vmatpush1.bf16.msra.mxu1 %v11389_v29  ;;  %v11452_v29 = vld [vmem:[#allocation2 + $0x178] ss:$80 sps:$4 sm:$0xff]  }
 0x2d5   :  { %6983 = vmatprep.subr.bf16.mxu1 %v11394_v17  ;;  %7048 = vmatpush1.bf16.msra.mxu0 %v11401_v30  ;;  %v11460_v17 = vld [vmem:[#allocation2 + $0x21c] ss:$80 sps:$4 sm:$0xff]   ;;  %v11467_v30 = vld [vmem:[#allocation2 + $0x850] ss:$80 sps:$4 sm:$0xff]  }
 0x2d6   :  { %7049 = vmatprep.subr.bf16.mxu0 %v11409_v32 }
 0x2d7   :  { %v6505_v19 = vpop.f32.mrb[4].mxu0 }
 0x2d8   :  { %6984 = vmatpush1.bf16.msra.mxu1 %v11392_v33  ;;  %v12703_v12 = vadd.f32 %v12685_v18, %v6505_v19  ;;  %v6507_v40 = vpop.f32.mrb[5].mxu0  ;;  %v11419_v18 = vld [vmem:[#allocation2 + $0x2b0] ss:$80 sps:$4 sm:$0xff]   ;;  %v11475_v33 = vld [vmem:[#allocation2 + $0x8f4] ss:$80 sps:$4 sm:$0xff]  }
 0x2d9   :  { %6985 = vmatprep.subr.bf16.mxu1 %v11400_v35  ;;  %v12706_v42 = vadd.f32 %v12687_v21, %v6507_v40  ;;  %7050 = vmatpush1.bf16.msra.mxu0 %v11407_v36  ;;  %v6509_v43 = vpop.f32.mrb[6].mxu0  ;;  %v11410_v21 = vld [vmem:[#allocation2 + $0x1c48] ss:$80 sps:$4 sm:$0xff]   ;;  %v11466_v40 = vld [vmem:[#allocation2 + $0x2bc] ss:$80 sps:$4 sm:$0xff]  }
 0x2da   :  { %v6510_v47 = vpop.f32.mrb[7].mxu0  ;;  %7051 = vmatprep.subr.bf16.mxu0 %v11415_v37  ;;  %v11473_v43 = vld [vmem:[#allocation2 + $0x8f0] ss:$80 sps:$4 sm:$0xff]  }
 0x2db   :  { %v7701_v48 = vmax.f32 %v12671_v41, %v12706_v42  ;;  %v11472_v47 = vld [vmem:[#allocation2 + $0x35c] ss:$80 sps:$4 sm:$0xff]   ;;  %v11758_v41 = vld [vmem:[#allocation2 + $0x2c8] ss:$80 sps:$4 sm:$0xff]  }
 0x2dc   :  { %6986 = vmatpush1.bf16.msra.mxu1 %v11398_v38  ;;  %v11458_v38 = vld [vmem:[#allocation2 + $0x218] ss:$80 sps:$4 sm:$0xff]   ;;  %v11766_v42 = vld [vmem:[#allocation2 + $0x36c] ss:$80 sps:$4 sm:$0xff]  }
 0x2dd   :  { %6987 = vmatprep.subr.bf16.mxu1 %v11406_v39  ;;  %7052 = vmatpush1.bf16.msra.mxu0 %v11413_v45  ;;  %v11481_v45 = vld [vmem:[#allocation2 + $0x994] ss:$80 sps:$4 sm:$0xff]  }
 0x2de   :  { %7053 = vmatprep.subr.bf16.mxu0 %v11421_v46  ;;  %v11464_v46 = vld [vmem:[#allocation2 + $0x2b8] ss:$80 sps:$4 sm:$0xff]  }
 0x2e0   :  { %6988 = vmatpush1.bf16.msra.mxu1 %v11404_v49  ;;  %v11479_v49 = vld [vmem:[#allocation2 + $0x990] ss:$80 sps:$4 sm:$0xff]  }
 0x2e1   :  { %6989 = vmatprep.subr.bf16.mxu1 %v11412_v50  ;;  %7054 = vmatpush1.bf16.msra.mxu0 %v11419_v18  ;;  %v11487_v50 = vld [vmem:[#allocation2 + $0xa34] ss:$80 sps:$4 sm:$0xff]   ;;  %v11470_v18 = vld [vmem:[#allocation2 + $0x358] ss:$80 sps:$4 sm:$0xff]  }
 0x2e2   :  { %7055 = vmatprep.subr.bf16.mxu0 %v11427_v51  ;;  %v11478_v51 = vld [vmem:[#allocation2 + $0x3fc] ss:$80 sps:$4 sm:$0xff]  }
 0x2e4   :  { %6990 = vmatpush1.bf16.msra.mxu1 %v11410_v21  ;;  %v11485_v21 = vld [vmem:[#allocation2 + $0xa30] ss:$80 sps:$4 sm:$0xff]  }
 0x2e5   :  { %6991 = vmatprep.subr.bf16.mxu1 %v11418_v8  ;;  %7056 = vmatpush1.bf16.msra.mxu0 %v11425_v52  ;;  %v11493_v8 = vld [vmem:[#allocation2 + $0xad4] ss:$80 sps:$4 sm:$0xff]   ;;  %v11476_v52 = vld [vmem:[#allocation2 + $0x3f8] ss:$80 sps:$4 sm:$0xff]  }
 0x2e6   :  { %7057 = vmatprep.subr.bf16.mxu0 %v11430_v53  ;;  %v11484_v53 = vld [vmem:[#allocation2 + $0x49c] ss:$80 sps:$4 sm:$0xff]  }
 0x2e8   :  { %6992 = vmatpush1.bf16.msra.mxu1 %v11416_v10  ;;  %v11491_v10 = vld [vmem:[#allocation2 + $0xad0] ss:$80 sps:$4 sm:$0xff]  }
 0x2e9   :  { %6993 = vmatprep.subr.bf16.mxu1 %v11424_v54  ;;  %7058 = vmatpush1.bf16.msra.mxu0 %v11428_v55  ;;  %v11499_v54 = vld [vmem:[#allocation2 + $0xb74] ss:$80 sps:$4 sm:$0xff]   ;;  %v11482_v55 = vld [vmem:[#allocation2 + $0x498] ss:$80 sps:$4 sm:$0xff]  }
 0x2ea   :  { %7059 = vmatprep.subr.bf16.mxu0 %v11433_v56  ;;  %v11490_v56 = vld [vmem:[#allocation2 + $0x53c] ss:$80 sps:$4 sm:$0xff]  }
 0x2ec   :  { %6994 = vmatpush1.bf16.msra.mxu1 %v11422_v57  ;;  %v11497_v57 = vld [vmem:[#allocation2 + $0xb70] ss:$80 sps:$4 sm:$0xff]  }
 0x2ed   :  { %7060 = vmatpush1.bf16.msra.mxu0 %v11431_v58  ;;  %7004 = vmatprep.subr.bf16.mxu1 %v11436_v59  ;;  %v11505_v58 = vld [vmem:[#allocation2 + $0xc14] ss:$80 sps:$4 sm:$0xff]   ;;  %v11488_v59 = vld [vmem:[#allocation2 + $0x538] ss:$80 sps:$4 sm:$0xff]  }
 0x2ee   :  { %7061 = vmatprep.subr.bf16.mxu0 %v11439_v60  ;;  %v11496_v60 = vld [vmem:[#allocation2 + $0x5dc] ss:$80 sps:$4 sm:$0xff]  }
 0x2ef   :  { %6996 = vmatmul.mubr.bf16.vlgmr.msra.gmra.mrb[16].mxu1 %v12608_v23 }
 0x2f0   :  { %7005 = vmatpush1.bf16.msra.mxu1 %v11434_v61  ;;  %7036 = vmatprep.mubr.bf16.mxu1 %v12450_v0  ;;  %v11503_v61 = vld [vmem:[#allocation2 + $0xc10] ss:$80 sps:$4 sm:$0xff]  }
 0x2f1   :  { %7062 = vmatpush1.bf16.msra.mxu0 %v11437_v62  ;;  %7209 = vmatprep.subr.bf16.mxu1 %v11442_v63  ;;  %v11511_v62 = vld [vmem:[#allocation2 + $0xcb4] ss:$80 sps:$4 sm:$0xff]   ;;  %v11494_v63 = vld [vmem:[#allocation2 + $0x5d8] ss:$80 sps:$4 sm:$0xff]  }
 0x2f2   :  { %7063 = vmatprep.subr.bf16.mxu0 %v11445_v3  ;;  %v11502_v3 = vld [vmem:[#allocation2 + $0x67c] ss:$80 sps:$4 sm:$0xff]  }
 0x2f5   :  { %7064 = vmatpush1.bf16.msra.mxu0 %v11443_v4  ;;  %v11509_v4 = vld [vmem:[#allocation2 + $0xcb0] ss:$80 sps:$4 sm:$0xff]  }
 0x2f6   :  { %7065 = vmatprep.subr.bf16.mxu0 %v11451_v5  ;;  %v11517_v5 = vld [vmem:[#allocation2 + $0xd54] ss:$80 sps:$4 sm:$0xff]  }
 0x2f9   :  { %7066 = vmatpush1.bf16.msra.mxu0 %v11449_v7  ;;  %v11500_v7 = vld [vmem:[#allocation2 + $0x678] ss:$80 sps:$4 sm:$0xff]  }
 0x2fa   :  { %7067 = vmatprep.subr.bf16.mxu0 %v11457_v9  ;;  %v11508_v9 = vld [vmem:[#allocation2 + $0x71c] ss:$80 sps:$4 sm:$0xff]  }
 0x2fb   :  { %10161 = vmatmul.mubr.msk.bf16.vlgmr.msra.gmra.mrb[16].mxu1 %vm6057_vm0, %v12615_v27 }
 0x2fc   :  { %7210 = vmatpush1.bf16.msra.mxu1 %v11440_v11  ;;  %7241 = vmatprep.mubr.bf16.mxu1 %v12611_v25  ;;  %v11515_v11 = vld [vmem:[#allocation2 + $0xd50] ss:$80 sps:$4 sm:$0xff]  }
 0x2fd   :  { %7211 = vmatprep.subr.bf16.mxu1 %v11448_v13  ;;  %7068 = vmatpush1.bf16.msra.mxu0 %v11455_v14  ;;  %v11523_v13 = vld [vmem:[#allocation2 + $0xdf4] ss:$80 sps:$4 sm:$0xff]   ;;  %v11506_v14 = vld [vmem:[#allocation2 + $0x718] ss:$80 sps:$4 sm:$0xff]  }
 0x2fe   :  { %7069 = vmatprep.subr.bf16.mxu0 %v11463_v15  ;;  %v11514_v15 = vld [vmem:[#allocation2 + $0x7bc] ss:$80 sps:$4 sm:$0xff]  }
 0x300   :  { %7212 = vmatpush1.bf16.msra.mxu1 %v11446_v16  ;;  %v11521_v16 = vld [vmem:[#allocation2 + $0xdf0] ss:$80 sps:$4 sm:$0xff]  }
 0x301   :  { %7213 = vmatprep.subr.bf16.mxu1 %v11454_v22  ;;  %7070 = vmatpush1.bf16.msra.mxu0 %v11461_v26  ;;  %v11529_v22 = vld [vmem:[#allocation2 + $0xe94] ss:$80 sps:$4 sm:$0xff]   ;;  %v11512_v26 = vld [vmem:[#allocation2 + $0x7b8] ss:$80 sps:$4 sm:$0xff]  }
 0x302   :  { %v12715_v32 = vpop.f32.mrb[12].mxu1  ;;  %7071 = vmatprep.subr.bf16.mxu0 %v11469_v28  ;;  %v11520_v28 = vld [vmem:[#allocation2 + $0x85c] ss:$80 sps:$4 sm:$0xff]  }
 0x303   :  { %v7702_v35 = vmax.f32 %v12674_v44, %v12715_v32  ;;  %v12719_v36 = vpop.f32.mrb[13].mxu1  ;;  %v11764_v44 = vld [vmem:[#allocation2 + $0x368] ss:$80 sps:$4 sm:$0xff]   ;;  %v11772_v32 = vld [vmem:[#allocation2 + $0x40c] ss:$80 sps:$4 sm:$0xff]  }
 0x304   :  { %7214 = vmatpush1.bf16.msra.mxu1 %v11452_v29  ;;  %v7703_v37 = vmax.f32 %v12678_v1, %v12719_v36  ;;  %v6714_v19 = vpop.f32.mrb[14].mxu1  ;;  %v11527_v29 = vld [vmem:[#allocation2 + $0xe90] ss:$80 sps:$4 sm:$0xff]   ;;  %v11991_v1 = vld [vmem:[#allocation2 + $0x1c6c] ss:$80 sps:$4 sm:$0xff]  }
 0x305   :  { %v6715_v39 = vpop.f32.mrb[15].mxu1  ;;  %7215 = vmatprep.subr.bf16.mxu1 %v11460_v17  ;;  %7072 = vmatpush1.bf16.msra.mxu0 %v11467_v30  ;;  %v11535_v17 = vld [vmem:[#allocation2 + $0xf34] ss:$80 sps:$4 sm:$0xff]   ;;  %v11518_v30 = vld [vmem:[#allocation2 + $0x858] ss:$80 sps:$4 sm:$0xff]  }
 0x306   :  { %7073 = vmatprep.subr.bf16.mxu0 %v11475_v33  ;;  %v11526_v33 = vld [vmem:[#allocation2 + $0x8fc] ss:$80 sps:$4 sm:$0xff]   ;;  %v11533_v19 = vld [vmem:[#allocation2 + $0xf30] ss:$80 sps:$4 sm:$0xff]   ;;  %v11524_v39 = vld [vmem:[#allocation2 + $0x8f8] ss:$80 sps:$4 sm:$0xff]  }
 0x307   :  { %v12025_v36 = vld [vmem:[#allocation7 + $0x80] ss:$16 sps:$4 sm:$0xff]  }
 0x308   :  { %7216 = vmatpush1.bf16.msra.mxu1 %v11458_v38  ;;  %v11541_v38 = vld [vmem:[#allocation2 + $0xfd4] ss:$80 sps:$4 sm:$0xff]  }
 0x309   :  { %7217 = vmatprep.subr.bf16.mxu1 %v11466_v40  ;;  %7074 = vmatpush1.bf16.msra.mxu0 %v11473_v43  ;;  %v11532_v40 = vld [vmem:[#allocation2 + $0x99c] ss:$80 sps:$4 sm:$0xff]   ;;  %v11539_v43 = vld [vmem:[#allocation2 + $0xfd0] ss:$80 sps:$4 sm:$0xff]  }
 0x30a   :  { %7075 = vmatprep.subr.bf16.mxu0 %v11481_v45  ;;  %v11547_v45 = vld [vmem:[#allocation2 + $0x1074] ss:$80 sps:$4 sm:$0xff]  }
 0x30c   :  { %7218 = vmatpush1.bf16.msra.mxu1 %v11464_v46  ;;  %v11530_v46 = vld [vmem:[#allocation2 + $0x998] ss:$80 sps:$4 sm:$0xff]  }
 0x30d   :  { %7219 = vmatprep.subr.bf16.mxu1 %v11472_v47  ;;  %7076 = vmatpush1.bf16.msra.mxu0 %v11479_v49  ;;  %v11538_v47 = vld [vmem:[#allocation2 + $0xa3c] ss:$80 sps:$4 sm:$0xff]   ;;  %v11545_v49 = vld [vmem:[#allocation2 + $0x1070] ss:$80 sps:$4 sm:$0xff]  }
 0x30e   :  { %7086 = vmatprep.subr.bf16.mxu0 %v11487_v50  ;;  %v11553_v50 = vld [vmem:[#allocation2 + $0x1114] ss:$80 sps:$4 sm:$0xff]  }
 0x310   :  { %7220 = vmatpush1.bf16.msra.mxu1 %v11470_v18  ;;  %7078 = vmatmul.mubr.bf16.vlgmr.msra.gmra.mrb[12].mxu0 %v12623_v20  ;;  %v11536_v18 = vld [vmem:[#allocation2 + $0xa38] ss:$80 sps:$4 sm:$0xff]  }
 0x311   :  { %7221 = vmatprep.subr.bf16.mxu1 %v11478_v51  ;;  %7087 = vmatpush1.bf16.msra.mxu0 %v11485_v21  ;;  %v11544_v51 = vld [vmem:[#allocation2 + $0xadc] ss:$80 sps:$4 sm:$0xff]   ;;  %v11551_v21 = vld [vmem:[#allocation2 + $0x1110] ss:$80 sps:$4 sm:$0xff]  }
 0x312   :  { %7088 = vmatprep.subr.bf16.mxu0 %v11493_v8  ;;  %7118 = vmatprep.mubr.bf16.mxu0 %v12627_v24  ;;  %v11559_v8 = vld [vmem:[#allocation2 + $0x11b4] ss:$80 sps:$4 sm:$0xff]  }
 0x314   :  { %7222 = vmatpush1.bf16.msra.mxu1 %v11476_v52  ;;  %v11542_v52 = vld [vmem:[#allocation2 + $0xad8] ss:$80 sps:$4 sm:$0xff]  }
 0x315   :  { %7223 = vmatprep.subr.bf16.mxu1 %v11484_v53  ;;  %7089 = vmatpush1.bf16.msra.mxu0 %v11491_v10  ;;  %v11550_v53 = vld [vmem:[#allocation2 + $0xb7c] ss:$80 sps:$4 sm:$0xff]   ;;  %v11557_v10 = vld [vmem:[#allocation2 + $0x11b0] ss:$80 sps:$4 sm:$0xff]  }
 0x316   :  { %7090 = vmatprep.subr.bf16.mxu0 %v11499_v54  ;;  %v11565_v54 = vld [vmem:[#allocation2 + $0x1254] ss:$80 sps:$4 sm:$0xff]  }
 0x318   :  { %7224 = vmatpush1.bf16.msra.mxu1 %v11482_v55  ;;  %v11548_v55 = vld [vmem:[#allocation2 + $0xb78] ss:$80 sps:$4 sm:$0xff]  }
 0x319   :  { %7225 = vmatprep.subr.bf16.mxu1 %v11490_v56  ;;  %7091 = vmatpush1.bf16.msra.mxu0 %v11497_v57  ;;  %v11556_v56 = vld [vmem:[#allocation2 + $0xc1c] ss:$80 sps:$4 sm:$0xff]   ;;  %v11563_v57 = vld [vmem:[#allocation2 + $0x1250] ss:$80 sps:$4 sm:$0xff]  }
 0x31a   :  { %7092 = vmatprep.subr.bf16.mxu0 %v11505_v58  ;;  %v11571_v58 = vld [vmem:[#allocation2 + $0x12f4] ss:$80 sps:$4 sm:$0xff]  }
 0x31c   :  { %7226 = vmatpush1.bf16.msra.mxu1 %v11488_v59  ;;  %v11554_v59 = vld [vmem:[#allocation2 + $0xc18] ss:$80 sps:$4 sm:$0xff]  }
 0x31d   :  { %7227 = vmatprep.subr.bf16.mxu1 %v11496_v60  ;;  %7093 = vmatpush1.bf16.msra.mxu0 %v11503_v61  ;;  %v11562_v60 = vld [vmem:[#allocation2 + $0xcbc] ss:$80 sps:$4 sm:$0xff]   ;;  %v11569_v61 = vld [vmem:[#allocation2 + $0x12f0] ss:$80 sps:$4 sm:$0xff]  }
 0x31e   :  { %7094 = vmatprep.subr.bf16.mxu0 %v11511_v62  ;;  %v11577_v62 = vld [vmem:[#allocation2 + $0x1394] ss:$80 sps:$4 sm:$0xff]  }
 0x320   :  { %7228 = vmatpush1.bf16.msra.mxu1 %v11494_v63  ;;  %v11560_v63 = vld [vmem:[#allocation2 + $0xcb8] ss:$80 sps:$4 sm:$0xff]  }
 0x321   :  { %7229 = vmatprep.subr.bf16.mxu1 %v11502_v3  ;;  %7095 = vmatpush1.bf16.msra.mxu0 %v11509_v4  ;;  %v11568_v3 = vld [vmem:[#allocation2 + $0xd5c] ss:$80 sps:$4 sm:$0xff]   ;;  %v11575_v4 = vld [vmem:[#allocation2 + $0x1390] ss:$80 sps:$4 sm:$0xff]  }
 0x322   :  { %7096 = vmatprep.subr.bf16.mxu0 %v11517_v5  ;;  %v11583_v5 = vld [vmem:[#allocation2 + $0x1434] ss:$80 sps:$4 sm:$0xff]  }
 0x324   :  { %7230 = vmatpush1.bf16.msra.mxu1 %v11500_v7  ;;  %v11566_v7 = vld [vmem:[#allocation2 + $0xd58] ss:$80 sps:$4 sm:$0xff]  }
 0x325   :  { %7231 = vmatprep.subr.bf16.mxu1 %v11508_v9  ;;  %7097 = vmatpush1.bf16.msra.mxu0 %v11515_v11  ;;  %v11574_v9 = vld [vmem:[#allocation2 + $0xdfc] ss:$80 sps:$4 sm:$0xff]   ;;  %v11581_v11 = vld [vmem:[#allocation2 + $0x1430] ss:$80 sps:$4 sm:$0xff]  }
 0x326   :  { %7098 = vmatprep.subr.bf16.mxu0 %v11523_v13  ;;  %v11589_v13 = vld [vmem:[#allocation2 + $0x14d4] ss:$80 sps:$4 sm:$0xff]  }
 0x328   :  { %7232 = vmatpush1.bf16.msra.mxu1 %v11506_v14  ;;  %v11572_v14 = vld [vmem:[#allocation2 + $0xdf8] ss:$80 sps:$4 sm:$0xff]  }
 0x329   :  { %7233 = vmatprep.subr.bf16.mxu1 %v11514_v15  ;;  %7099 = vmatpush1.bf16.msra.mxu0 %v11521_v16  ;;  %v11580_v15 = vld [vmem:[#allocation2 + $0xe9c] ss:$80 sps:$4 sm:$0xff]   ;;  %v11587_v16 = vld [vmem:[#allocation2 + $0x14d0] ss:$80 sps:$4 sm:$0xff]  }
 0x32a   :  { %7100 = vmatprep.subr.bf16.mxu0 %v11529_v22  ;;  %v11595_v22 = vld [vmem:[#allocation2 + $0x1574] ss:$80 sps:$4 sm:$0xff]  }
 0x32c   :  { %7234 = vmatpush1.bf16.msra.mxu1 %v11512_v26  ;;  %v11578_v26 = vld [vmem:[#allocation2 + $0xe98] ss:$80 sps:$4 sm:$0xff]  }
 0x32d   :  { %7235 = vmatprep.subr.bf16.mxu1 %v11520_v28  ;;  %7101 = vmatpush1.bf16.msra.mxu0 %v11527_v29  ;;  %v11586_v28 = vld [vmem:[#allocation2 + $0xf3c] ss:$80 sps:$4 sm:$0xff]   ;;  %v11593_v29 = vld [vmem:[#allocation2 + $0x1570] ss:$80 sps:$4 sm:$0xff]  }
 0x32e   :  { %7102 = vmatprep.subr.bf16.mxu0 %v11535_v17  ;;  %v11601_v17 = vld [vmem:[#allocation2 + $0x1614] ss:$80 sps:$4 sm:$0xff]  }
 0x330   :  { %7236 = vmatpush1.bf16.msra.mxu1 %v11518_v30  ;;  %v11584_v30 = vld [vmem:[#allocation2 + $0xf38] ss:$80 sps:$4 sm:$0xff]  }
 0x331   :  { %7237 = vmatprep.subr.bf16.mxu1 %v11526_v33  ;;  %7103 = vmatpush1.bf16.msra.mxu0 %v11533_v19  ;;  %v11592_v33 = vld [vmem:[#allocation2 + $0xfdc] ss:$80 sps:$4 sm:$0xff]   ;;  %v11599_v19 = vld [vmem:[#allocation2 + $0x1610] ss:$80 sps:$4 sm:$0xff]  }
 0x332   :  { %7104 = vmatprep.subr.bf16.mxu0 %v11541_v38  ;;  %v11607_v38 = vld [vmem:[#allocation2 + $0x16b4] ss:$80 sps:$4 sm:$0xff]  }
 0x334   :  { %7238 = vmatpush1.bf16.msra.mxu1 %v11524_v39  ;;  %v11590_v39 = vld [vmem:[#allocation2 + $0xfd8] ss:$80 sps:$4 sm:$0xff]  }
 0x335   :  { %7239 = vmatprep.subr.bf16.mxu1 %v11532_v40  ;;  %7105 = vmatpush1.bf16.msra.mxu0 %v11539_v43  ;;  %v11598_v40 = vld [vmem:[#allocation2 + $0x107c] ss:$80 sps:$4 sm:$0xff]   ;;  %v11605_v43 = vld [vmem:[#allocation2 + $0x16b0] ss:$80 sps:$4 sm:$0xff]  }
 0x336   :  { %7106 = vmatprep.subr.bf16.mxu0 %v11547_v45  ;;  %v11613_v45 = vld [vmem:[#allocation2 + $0x1754] ss:$80 sps:$4 sm:$0xff]  }
 0x338   :  { %7240 = vmatpush1.bf16.msra.mxu1 %v11530_v46  ;;  %v11596_v46 = vld [vmem:[#allocation2 + $0x1078] ss:$80 sps:$4 sm:$0xff]  }
 0x339   :  { %7250 = vmatprep.subr.bf16.mxu1 %v11538_v47  ;;  %7107 = vmatpush1.bf16.msra.mxu0 %v11545_v49  ;;  %v11604_v47 = vld [vmem:[#allocation2 + $0x111c] ss:$80 sps:$4 sm:$0xff]   ;;  %v11611_v49 = vld [vmem:[#allocation2 + $0x1750] ss:$80 sps:$4 sm:$0xff]  }
 0x33a   :  { %7108 = vmatprep.subr.bf16.mxu0 %v11553_v50  ;;  %v11619_v50 = vld [vmem:[#allocation2 + $0x17f4] ss:$80 sps:$4 sm:$0xff]  }
 0x33b   :  { %7242 = vmatmul.mubr.bf16.vlgmr.msra.gmra.mrb[20].mxu1 %v12623_v20 }
 0x33c   :  { %7251 = vmatpush1.bf16.msra.mxu1 %v11536_v18  ;;  %7282 = vmatprep.mubr.bf16.mxu1 %v12627_v24  ;;  %v11602_v18 = vld [vmem:[#allocation2 + $0x1118] ss:$80 sps:$4 sm:$0xff]  }
 0x33d   :  { %7252 = vmatprep.subr.bf16.mxu1 %v11544_v51  ;;  %7109 = vmatpush1.bf16.msra.mxu0 %v11551_v21  ;;  %v11610_v51 = vld [vmem:[#allocation2 + $0x11bc] ss:$80 sps:$4 sm:$0xff]   ;;  %v11617_v21 = vld [vmem:[#allocation2 + $0x17f0] ss:$80 sps:$4 sm:$0xff]  }
 0x33e   :  { %7110 = vmatprep.subr.bf16.mxu0 %v11559_v8  ;;  %v11625_v8 = vld [vmem:[#allocation2 + $0x1894] ss:$80 sps:$4 sm:$0xff]  }
 0x340   :  { %7253 = vmatpush1.bf16.msra.mxu1 %v11542_v52  ;;  %v11608_v52 = vld [vmem:[#allocation2 + $0x11b8] ss:$80 sps:$4 sm:$0xff]  }
 0x341   :  { %7254 = vmatprep.subr.bf16.mxu1 %v11550_v53  ;;  %7111 = vmatpush1.bf16.msra.mxu0 %v11557_v10  ;;  %v11616_v53 = vld [vmem:[#allocation2 + $0x125c] ss:$80 sps:$4 sm:$0xff]   ;;  %v11623_v10 = vld [vmem:[#allocation2 + $0x1890] ss:$80 sps:$4 sm:$0xff]  }
 0x342   :  { %7112 = vmatprep.subr.bf16.mxu0 %v11565_v54  ;;  %v11631_v54 = vld [vmem:[#allocation2 + $0x1934] ss:$80 sps:$4 sm:$0xff]  }
 0x344   :  { %7255 = vmatpush1.bf16.msra.mxu1 %v11548_v55  ;;  %v11614_v55 = vld [vmem:[#allocation2 + $0x1258] ss:$80 sps:$4 sm:$0xff]  }
 0x345   :  { %7256 = vmatprep.subr.bf16.mxu1 %v11556_v56  ;;  %7113 = vmatpush1.bf16.msra.mxu0 %v11563_v57  ;;  %v11622_v56 = vld [vmem:[#allocation2 + $0x12fc] ss:$80 sps:$4 sm:$0xff]   ;;  %v11629_v57 = vld [vmem:[#allocation2 + $0x1930] ss:$80 sps:$4 sm:$0xff]  }
 0x346   :  { %7114 = vmatprep.subr.bf16.mxu0 %v11571_v58  ;;  %v11637_v58 = vld [vmem:[#allocation2 + $0x19d4] ss:$80 sps:$4 sm:$0xff]  }
 0x348   :  { %7257 = vmatpush1.bf16.msra.mxu1 %v11554_v59  ;;  %v11620_v59 = vld [vmem:[#allocation2 + $0x12f8] ss:$80 sps:$4 sm:$0xff]  }
 0x349   :  { %7258 = vmatprep.subr.bf16.mxu1 %v11562_v60  ;;  %7115 = vmatpush1.bf16.msra.mxu0 %v11569_v61  ;;  %v11628_v60 = vld [vmem:[#allocation2 + $0x139c] ss:$80 sps:$4 sm:$0xff]   ;;  %v11635_v61 = vld [vmem:[#allocation2 + $0x19d0] ss:$80 sps:$4 sm:$0xff]  }
 0x34a   :  { %7116 = vmatprep.subr.bf16.mxu0 %v11577_v62  ;;  %v11643_v62 = vld [vmem:[#allocation2 + $0x1a74] ss:$80 sps:$4 sm:$0xff]  }
 0x34c   :  { %7259 = vmatpush1.bf16.msra.mxu1 %v11560_v63  ;;  %v11626_v63 = vld [vmem:[#allocation2 + $0x1398] ss:$80 sps:$4 sm:$0xff]  }
 0x34d   :  { %7260 = vmatprep.subr.bf16.mxu1 %v11568_v3  ;;  %7117 = vmatpush1.bf16.msra.mxu0 %v11575_v4  ;;  %v11634_v3 = vld [vmem:[#allocation2 + $0x143c] ss:$80 sps:$4 sm:$0xff]   ;;  %v11641_v4 = vld [vmem:[#allocation2 + $0x1a70] ss:$80 sps:$4 sm:$0xff]  }
 0x34e   :  { %7127 = vmatprep.subr.bf16.mxu0 %v11583_v5  ;;  %v11649_v5 = vld [vmem:[#allocation2 + $0x1b14] ss:$80 sps:$4 sm:$0xff]  }
 0x350   :  { %7261 = vmatpush1.bf16.msra.mxu1 %v11566_v7  ;;  %7119 = vmatmul.mubr.bf16.vlgmr.msra.gmra.mrb[12].mxu0 %v12640_v34  ;;  %v11632_v7 = vld [vmem:[#allocation2 + $0x1438] ss:$80 sps:$4 sm:$0xff]  }
 0x351   :  { %7262 = vmatprep.subr.bf16.mxu1 %v11574_v9  ;;  %7128 = vmatpush1.bf16.msra.mxu0 %v11581_v11  ;;  %v11640_v9 = vld [vmem:[#allocation2 + $0x14dc] ss:$80 sps:$4 sm:$0xff]   ;;  %v11647_v11 = vld [vmem:[#allocation2 + $0x1b10] ss:$80 sps:$4 sm:$0xff]  }
 0x352   :  { %7129 = vmatprep.subr.bf16.mxu0 %v11589_v13  ;;  %7159 = vmatprep.mubr.bf16.mxu0 %v12634_v31  ;;  %v11655_v13 = vld [vmem:[#allocation2 + $0x1bb4] ss:$80 sps:$4 sm:$0xff]  }
 0x354   :  { %7263 = vmatpush1.bf16.msra.mxu1 %v11572_v14  ;;  %v11638_v14 = vld [vmem:[#allocation2 + $0x14d8] ss:$80 sps:$4 sm:$0xff]  }
 0x355   :  { %7264 = vmatprep.subr.bf16.mxu1 %v11580_v15  ;;  %7130 = vmatpush1.bf16.msra.mxu0 %v11587_v16  ;;  %v11646_v15 = vld [vmem:[#allocation2 + $0x157c] ss:$80 sps:$4 sm:$0xff]   ;;  %v11653_v16 = vld [vmem:[#allocation2 + $0x1bb0] ss:$80 sps:$4 sm:$0xff]  }
 0x356   :  { %7131 = vmatprep.subr.bf16.mxu0 %v11595_v22  ;;  %v11661_v22 = vld [vmem:[#allocation2 + $0x1c54] ss:$80 sps:$4 sm:$0xff]  }
 0x358   :  { %7265 = vmatpush1.bf16.msra.mxu1 %v11578_v26  ;;  %v11644_v26 = vld [vmem:[#allocation2 + $0x1578] ss:$80 sps:$4 sm:$0xff]  }
 0x359   :  { %7266 = vmatprep.subr.bf16.mxu1 %v11586_v28  ;;  %7132 = vmatpush1.bf16.msra.mxu0 %v11593_v29  ;;  %v11652_v28 = vld [vmem:[#allocation2 + $0x161c] ss:$80 sps:$4 sm:$0xff]   ;;  %v11659_v29 = vld [vmem:[#allocation2 + $0x1c50] ss:$80 sps:$4 sm:$0xff]  }
 0x35a   :  { %7133 = vmatprep.subr.bf16.mxu0 %v11601_v17  ;;  %v11667_v17 = vld [vmem:[#allocation2 + $0x1cf4] ss:$80 sps:$4 sm:$0xff]  }
 0x35c   :  { %7267 = vmatpush1.bf16.msra.mxu1 %v11584_v30  ;;  %v11650_v30 = vld [vmem:[#allocation2 + $0x1618] ss:$80 sps:$4 sm:$0xff]  }
 0x35d   :  { %7268 = vmatprep.subr.bf16.mxu1 %v11592_v33  ;;  %7134 = vmatpush1.bf16.msra.mxu0 %v11599_v19  ;;  %v11658_v33 = vld [vmem:[#allocation2 + $0x16bc] ss:$80 sps:$4 sm:$0xff]   ;;  %v11665_v19 = vld [vmem:[#allocation2 + $0x1cf0] ss:$80 sps:$4 sm:$0xff]  }
 0x35e   :  { %7135 = vmatprep.subr.bf16.mxu0 %v11607_v38  ;;  %v11673_v38 = vld [vmem:[#allocation2 + $0x1d94] ss:$80 sps:$4 sm:$0xff]  }
 0x360   :  { %7269 = vmatpush1.bf16.msra.mxu1 %v11590_v39  ;;  %v11656_v39 = vld [vmem:[#allocation2 + $0x16b8] ss:$80 sps:$4 sm:$0xff]  }
 0x361   :  { %7270 = vmatprep.subr.bf16.mxu1 %v11598_v40  ;;  %7136 = vmatpush1.bf16.msra.mxu0 %v11605_v43  ;;  %v11664_v40 = vld [vmem:[#allocation2 + $0x175c] ss:$80 sps:$4 sm:$0xff]   ;;  %v11671_v43 = vld [vmem:[#allocation2 + $0x1d90] ss:$80 sps:$4 sm:$0xff]  }
 0x362   :  { %7137 = vmatprep.subr.bf16.mxu0 %v11613_v45  ;;  %v11679_v45 = vld [vmem:[#allocation2 + $0x1e34] ss:$80 sps:$4 sm:$0xff]  }
 0x364   :  { %7271 = vmatpush1.bf16.msra.mxu1 %v11596_v46  ;;  %v11662_v46 = vld [vmem:[#allocation2 + $0x1758] ss:$80 sps:$4 sm:$0xff]  }
 0x365   :  { %7272 = vmatprep.subr.bf16.mxu1 %v11604_v47  ;;  %7138 = vmatpush1.bf16.msra.mxu0 %v11611_v49  ;;  %v11670_v47 = vld [vmem:[#allocation2 + $0x17fc] ss:$80 sps:$4 sm:$0xff]   ;;  %v11677_v49 = vld [vmem:[#allocation2 + $0x1e30] ss:$80 sps:$4 sm:$0xff]  }
 0x366   :  { %7139 = vmatprep.subr.bf16.mxu0 %v11619_v50  ;;  %v11691_v50 = vld [vmem:[#allocation2 + $0x44] ss:$80 sps:$4 sm:$0xff]  }
 0x368   :  { %7273 = vmatpush1.bf16.msra.mxu1 %v11602_v18  ;;  %v11668_v18 = vld [vmem:[#allocation2 + $0x17f8] ss:$80 sps:$4 sm:$0xff]  }
 0x369   :  { %7274 = vmatprep.subr.bf16.mxu1 %v11610_v51  ;;  %7140 = vmatpush1.bf16.msra.mxu0 %v11617_v21  ;;  %v11676_v51 = vld [vmem:[#allocation2 + $0x189c] ss:$80 sps:$4 sm:$0xff]   ;;  %v11674_v21 = vld [vmem:[#allocation2 + $0x1898] ss:$80 sps:$4 sm:$0xff]  }
 0x36a   :  { %7141 = vmatprep.subr.bf16.mxu0 %v11625_v8  ;;  %v11682_v8 = vld [vmem:[#allocation2 + $0x193c] ss:$80 sps:$4 sm:$0xff]  }
 0x36c   :  { %7275 = vmatpush1.bf16.msra.mxu1 %v11608_v52  ;;  %v11680_v52 = vld [vmem:[#allocation2 + $0x1938] ss:$80 sps:$4 sm:$0xff]  }
 0x36d   :  { %7276 = vmatprep.subr.bf16.mxu1 %v11616_v53  ;;  %7142 = vmatpush1.bf16.msra.mxu0 %v11623_v10  ;;  %v11685_v53 = vld [vmem:[#allocation2 + $0x19dc] ss:$80 sps:$4 sm:$0xff]   ;;  %v11689_v10 = vld [vmem:[#allocation2 + $0x40] ss:$80 sps:$4 sm:$0xff]  }
 0x36e   :  { %7143 = vmatprep.subr.bf16.mxu0 %v11631_v54  ;;  %v11697_v54 = vld [vmem:[#allocation2 + $0xe4] ss:$80 sps:$4 sm:$0xff]  }
 0x370   :  { %7277 = vmatpush1.bf16.msra.mxu1 %v11614_v55  ;;  %v11683_v55 = vld [vmem:[#allocation2 + $0x19d8] ss:$80 sps:$4 sm:$0xff]  }
 0x371   :  { %7278 = vmatprep.subr.bf16.mxu1 %v11622_v56  ;;  %7144 = vmatpush1.bf16.msra.mxu0 %v11629_v57  ;;  %v11688_v56 = vld [vmem:[#allocation2 + $0x1a7c] ss:$80 sps:$4 sm:$0xff]   ;;  %v11695_v57 = vld [vmem:[#allocation2 + $0xe0] ss:$80 sps:$4 sm:$0xff]  }
 0x372   :  { %7145 = vmatprep.subr.bf16.mxu0 %v11637_v58  ;;  %v11703_v58 = vld [vmem:[#allocation2 + $0x184] ss:$80 sps:$4 sm:$0xff]  }
 0x374   :  { %7279 = vmatpush1.bf16.msra.mxu1 %v11620_v59  ;;  %v11686_v59 = vld [vmem:[#allocation2 + $0x1a78] ss:$80 sps:$4 sm:$0xff]  }
 0x375   :  { %7280 = vmatprep.subr.bf16.mxu1 %v11628_v60  ;;  %7146 = vmatpush1.bf16.msra.mxu0 %v11635_v61  ;;  %v11694_v60 = vld [vmem:[#allocation2 + $0x1b1c] ss:$80 sps:$4 sm:$0xff]   ;;  %v11701_v61 = vld [vmem:[#allocation2 + $0x180] ss:$80 sps:$4 sm:$0xff]  }
 0x376   :  { %7147 = vmatprep.subr.bf16.mxu0 %v11643_v62  ;;  %v11709_v62 = vld [vmem:[#allocation2 + $0x224] ss:$80 sps:$4 sm:$0xff]  }
 0x378   :  { %7281 = vmatpush1.bf16.msra.mxu1 %v11626_v63 }
 0x379   :  { %7291 = vmatprep.subr.bf16.mxu1 %v11634_v3  ;;  %7148 = vmatpush1.bf16.msra.mxu0 %v11641_v4  ;;  %v11692_v3 = vld [vmem:[#allocation2 + $0x1b18] ss:$80 sps:$4 sm:$0xff]  }
 0x37a   :  { %7149 = vmatprep.subr.bf16.mxu0 %v11649_v5 }
 0x37b   :  { %7283 = vmatmul.mubr.bf16.vlgmr.msra.gmra.mrb[20].mxu1 %v12640_v34 }
 0x37c   :  { %7292 = vmatpush1.bf16.msra.mxu1 %v11632_v7  ;;  %7323 = vmatprep.mubr.bf16.mxu1 %v12634_v31  ;;  %v11700_v7 = vld [vmem:[#allocation2 + $0x1bbc] ss:$80 sps:$4 sm:$0xff]  }
 0x37d   :  { %7293 = vmatprep.subr.bf16.mxu1 %v11640_v9  ;;  %7150 = vmatpush1.bf16.msra.mxu0 %v11647_v11 }
 0x37e   :  { %7151 = vmatprep.subr.bf16.mxu0 %v11655_v13  ;;  %v11707_v13 = vld [vmem:[#allocation2 + $0x220] ss:$80 sps:$4 sm:$0xff]  }
 0x380   :  { %7294 = vmatpush1.bf16.msra.mxu1 %v11638_v14 }
 0x381   :  { %7295 = vmatprep.subr.bf16.mxu1 %v11646_v15  ;;  %7152 = vmatpush1.bf16.msra.mxu0 %v11653_v16  ;;  %v11715_v15 = vld [vmem:[#allocation2 + $0x2c4] ss:$80 sps:$4 sm:$0xff]   ;;  %v11698_v16 = vld [vmem:[#allocation2 + $0x1bb8] ss:$80 sps:$4 sm:$0xff]  }
 0x382   :  { %7153 = vmatprep.subr.bf16.mxu0 %v11661_v22  ;;  %v11706_v22 = vld [vmem:[#allocation2 + $0x1c5c] ss:$80 sps:$4 sm:$0xff]  }
 0x384   :  { %7296 = vmatpush1.bf16.msra.mxu1 %v11644_v26  ;;  %v11713_v26 = vld [vmem:[#allocation2 + $0x2c0] ss:$80 sps:$4 sm:$0xff]  }
 0x385   :  { %7297 = vmatprep.subr.bf16.mxu1 %v11652_v28  ;;  %7154 = vmatpush1.bf16.msra.mxu0 %v11659_v29  ;;  %v11721_v28 = vld [vmem:[#allocation2 + $0x364] ss:$80 sps:$4 sm:$0xff]   ;;  %v11704_v29 = vld [vmem:[#allocation2 + $0x1c58] ss:$80 sps:$4 sm:$0xff]  }
 0x386   :  { %7155 = vmatprep.subr.bf16.mxu0 %v11667_v17  ;;  %v11712_v17 = vld [vmem:[#allocation2 + $0x1cfc] ss:$80 sps:$4 sm:$0xff]  }
 0x388   :  { %7298 = vmatpush1.bf16.msra.mxu1 %v11650_v30  ;;  %v11719_v30 = vld [vmem:[#allocation2 + $0x360] ss:$80 sps:$4 sm:$0xff]  }
 0x389   :  { %7299 = vmatprep.subr.bf16.mxu1 %v11658_v33  ;;  %7156 = vmatpush1.bf16.msra.mxu0 %v11665_v19  ;;  %v11724_v33 = vld [vmem:[#allocation2 + $0x404] ss:$80 sps:$4 sm:$0xff]   ;;  %v11710_v19 = vld [vmem:[#allocation2 + $0x1cf8] ss:$80 sps:$4 sm:$0xff]  }
 0x38a   :  { %7157 = vmatprep.subr.bf16.mxu0 %v11673_v38  ;;  %v11718_v38 = vld [vmem:[#allocation2 + $0x1d9c] ss:$80 sps:$4 sm:$0xff]  }
 0x38c   :  { %7300 = vmatpush1.bf16.msra.mxu1 %v11656_v39  ;;  %v11722_v39 = vld [vmem:[#allocation2 + $0x400] ss:$80 sps:$4 sm:$0xff]  }
 0x38d   :  { %7301 = vmatprep.subr.bf16.mxu1 %v11664_v40  ;;  %7158 = vmatpush1.bf16.msra.mxu0 %v11671_v43  ;;  %v11727_v40 = vld [vmem:[#allocation2 + $0x4a4] ss:$80 sps:$4 sm:$0xff]   ;;  %v11716_v43 = vld [vmem:[#allocation2 + $0x1d98] ss:$80 sps:$4 sm:$0xff]  }
 0x38e   :  { %7168 = vmatprep.subr.bf16.mxu0 %v11679_v45  ;;  %v11725_v45 = vld [vmem:[#allocation2 + $0x4a0] ss:$80 sps:$4 sm:$0xff]  }
 0x390   :  { %7302 = vmatpush1.bf16.msra.mxu1 %v11662_v46  ;;  %7160 = vmatmul.mubr.bf16.vlgmr.msra.gmra.mrb[12].mxu0 %v12608_v23  ;;  %v11730_v46 = vld [vmem:[#allocation2 + $0x1e3c] ss:$80 sps:$4 sm:$0xff]  }
 0x391   :  { %7303 = vmatprep.subr.bf16.mxu1 %v11670_v47  ;;  %7169 = vmatpush1.bf16.msra.mxu0 %v11677_v49  ;;  %v11733_v47 = vld [vmem:[#allocation2 + $0x544] ss:$80 sps:$4 sm:$0xff]   ;;  %v11728_v49 = vld [vmem:[#allocation2 + $0x1e38] ss:$80 sps:$4 sm:$0xff]  }
 0x392   :  { %7200 = vmatprep.mubr.bf16.mxu0 %v12450_v0  ;;  %7373 = vmatprep.subr.bf16.mxu0 %v11691_v50  ;;  %v11731_v50 = vld [vmem:[#allocation2 + $0x540] ss:$80 sps:$4 sm:$0xff]  }
 0x394   :  { %7304 = vmatpush1.bf16.msra.mxu1 %v11668_v18  ;;  %v11736_v18 = vld [vmem:[#allocation2 + $0x4c] ss:$80 sps:$4 sm:$0xff]  }
 0x395   :  { %7305 = vmatprep.subr.bf16.mxu1 %v11676_v51  ;;  %v11739_v51 = vld [vmem:[#allocation2 + $0x5e4] ss:$80 sps:$4 sm:$0xff]  }
 0x398   :  { %7306 = vmatpush1.bf16.msra.mxu1 %v11674_v21  ;;  %v11737_v21 = vld [vmem:[#allocation2 + $0x5e0] ss:$80 sps:$4 sm:$0xff]  }
 0x399   :  { %7307 = vmatprep.subr.bf16.mxu1 %v11682_v8  ;;  %v11745_v8 = vld [vmem:[#allocation2 + $0x684] ss:$80 sps:$4 sm:$0xff]  }
 0x39c   :  { %7308 = vmatpush1.bf16.msra.mxu1 %v11680_v52  ;;  %10162 = vmatmul.mubr.msk.bf16.vlgmr.msra.gmra.mrb[12].mxu0 %vm6057_vm0, %v12615_v27  ;;  %v11743_v52 = vld [vmem:[#allocation2 + $0x680] ss:$80 sps:$4 sm:$0xff]  }
 0x39d   :  { %7309 = vmatprep.subr.bf16.mxu1 %v11685_v53  ;;  %7374 = vmatpush1.bf16.msra.mxu0 %v11689_v10  ;;  %v11751_v53 = vld [vmem:[#allocation2 + $0x724] ss:$80 sps:$4 sm:$0xff]   ;;  %v11734_v10 = vld [vmem:[#allocation2 + $0x48] ss:$80 sps:$4 sm:$0xff]  }
 0x39e   :  { %7375 = vmatprep.subr.bf16.mxu0 %v11697_v54  ;;  %7405 = vmatprep.mubr.bf16.mxu0 %v12611_v25  ;;  %v11742_v54 = vld [vmem:[#allocation2 + $0xec] ss:$80 sps:$4 sm:$0xff]  }
 0x3a0   :  { %7310 = vmatpush1.bf16.msra.mxu1 %v11683_v55  ;;  %v11749_v55 = vld [vmem:[#allocation2 + $0x720] ss:$80 sps:$4 sm:$0xff]  }
 0x3a1   :  { %7311 = vmatprep.subr.bf16.mxu1 %v11688_v56  ;;  %7376 = vmatpush1.bf16.msra.mxu0 %v11695_v57  ;;  %v11757_v56 = vld [vmem:[#allocation2 + $0x7c4] ss:$80 sps:$4 sm:$0xff]   ;;  %v11740_v57 = vld [vmem:[#allocation2 + $0xe8] ss:$80 sps:$4 sm:$0xff]  }
 0x3a2   :  { %7377 = vmatprep.subr.bf16.mxu0 %v11703_v58  ;;  %v11748_v58 = vld [vmem:[#allocation2 + $0x18c] ss:$80 sps:$4 sm:$0xff]  }
 0x3a3   :  { %v12736_v63 = vpop.f32.mrb[8].mxu0 }
 0x3a4   :  { %7312 = vmatpush1.bf16.msra.mxu1 %v11686_v59  ;;  %v7704_v4 = vmax.f32 %v12682_v2, %v12736_v63  ;;  %v12740_v5 = vpop.f32.mrb[9].mxu0  ;;  %v11755_v59 = vld [vmem:[#allocation2 + $0x7c0] ss:$80 sps:$4 sm:$0xff]   ;;  %v11994_v2 = vld [vmem:[#allocation2 + $0x1d0c] ss:$80 sps:$4 sm:$0xff]  }
 0x3a5   :  { %7313 = vmatprep.subr.bf16.mxu1 %v11694_v60  ;;  %7378 = vmatpush1.bf16.msra.mxu0 %v11701_v61  ;;  %v7705_v9 = vmax.f32 %v12703_v12, %v12740_v5  ;;  %v6878_v11 = vpop.f32.mrb[10].mxu0  ;;  %v11763_v60 = vld [vmem:[#allocation2 + $0x864] ss:$80 sps:$4 sm:$0xff]   ;;  %v11746_v61 = vld [vmem:[#allocation2 + $0x188] ss:$80 sps:$4 sm:$0xff]  }
 0x3a6   :  { %v6879_v14 = vpop.f32.mrb[11].mxu0  ;;  %7379 = vmatprep.subr.bf16.mxu0 %v11709_v62  ;;  %v11754_v62 = vld [vmem:[#allocation2 + $0x22c] ss:$80 sps:$4 sm:$0xff]   ;;  %v11769_v11 = vld [vmem:[#allocation2 + $0x904] ss:$80 sps:$4 sm:$0xff]  }
 0x3a7   :  { %v12031_v63 = vld [vmem:[#allocation7 + $0xa0] ss:$16 sps:$4 sm:$0xff]   ;;  %v12034_v12 = vld [vmem:[#allocation7 + $0xa8] ss:$16 sps:$4 sm:$0xff]   ;;  %v12042_v5 = vld [vmem:[#allocation7 + $0xcc] ss:$16 sps:$4 sm:$0xff]  }
 0x3a8   :  { %7314 = vmatpush1.bf16.msra.mxu1 %v11692_v3  ;;  %v11761_v3 = vld [vmem:[#allocation2 + $0x860] ss:$80 sps:$4 sm:$0xff]  }
 0x3a9   :  { %7315 = vmatprep.subr.bf16.mxu1 %v11700_v7  ;;  %7380 = vmatpush1.bf16.msra.mxu0 %v11707_v13 }
 0x3aa   :  { %7381 = vmatprep.subr.bf16.mxu0 %v11715_v15 }
 0x3ac   :  { %7316 = vmatpush1.bf16.msra.mxu1 %v11698_v16  ;;  %v11752_v16 = vld [vmem:[#allocation2 + $0x228] ss:$80 sps:$4 sm:$0xff]  }
 0x3ad   :  { %7317 = vmatprep.subr.bf16.mxu1 %v11706_v22  ;;  %7382 = vmatpush1.bf16.msra.mxu0 %v11713_v26  ;;  %v11760_v26 = vld [vmem:[#allocation2 + $0x2cc] ss:$80 sps:$4 sm:$0xff]  }
 0x3ae   :  { %7383 = vmatprep.subr.bf16.mxu0 %v11721_v28  ;;  %v11767_v28 = vld [vmem:[#allocation2 + $0x900] ss:$80 sps:$4 sm:$0xff]  }
 0x3b0   :  { %7318 = vmatpush1.bf16.msra.mxu1 %v11704_v29  ;;  %v11775_v29 = vld [vmem:[#allocation2 + $0x9a4] ss:$80 sps:$4 sm:$0xff]  }
 0x3b1   :  { %7319 = vmatprep.subr.bf16.mxu1 %v11712_v17  ;;  %7384 = vmatpush1.bf16.msra.mxu0 %v11719_v30  ;;  %v11781_v17 = vld [vmem:[#allocation2 + $0xa44] ss:$80 sps:$4 sm:$0xff]  }
 0x3b2   :  { %7385 = vmatprep.subr.bf16.mxu0 %v11724_v33  ;;  %v11787_v30 = vld [vmem:[#allocation2 + $0xae4] ss:$80 sps:$4 sm:$0xff]   ;;  %v11770_v33 = vld [vmem:[#allocation2 + $0x408] ss:$80 sps:$4 sm:$0xff]  }
 0x3b4   :  { %7320 = vmatpush1.bf16.msra.mxu1 %v11710_v19  ;;  %v11778_v19 = vld [vmem:[#allocation2 + $0x4ac] ss:$80 sps:$4 sm:$0xff]  }
 0x3b5   :  { %7321 = vmatprep.subr.bf16.mxu1 %v11718_v38  ;;  %7386 = vmatpush1.bf16.msra.mxu0 %v11722_v39  ;;  %v11785_v38 = vld [vmem:[#allocation2 + $0xae0] ss:$80 sps:$4 sm:$0xff]   ;;  %v11793_v39 = vld [vmem:[#allocation2 + $0xb84] ss:$80 sps:$4 sm:$0xff]  }
 0x3b6   :  { %7387 = vmatprep.subr.bf16.mxu0 %v11727_v40  ;;  %v11776_v40 = vld [vmem:[#allocation2 + $0x4a8] ss:$80 sps:$4 sm:$0xff]  }
 0x3b8   :  { %7322 = vmatpush1.bf16.msra.mxu1 %v11716_v43  ;;  %v11784_v43 = vld [vmem:[#allocation2 + $0x54c] ss:$80 sps:$4 sm:$0xff]  }
 0x3b9   :  { %7388 = vmatpush1.bf16.msra.mxu0 %v11725_v45  ;;  %7332 = vmatprep.subr.bf16.mxu1 %v11730_v46  ;;  %v11791_v45 = vld [vmem:[#allocation2 + $0xb80] ss:$80 sps:$4 sm:$0xff]   ;;  %v11799_v46 = vld [vmem:[#allocation2 + $0xc24] ss:$80 sps:$4 sm:$0xff]  }
 0x3ba   :  { %7389 = vmatprep.subr.bf16.mxu0 %v11733_v47  ;;  %v11782_v47 = vld [vmem:[#allocation2 + $0x548] ss:$80 sps:$4 sm:$0xff]  }
 0x3bb   :  { %7324 = vmatmul.mubr.bf16.vlgmr.msra.gmra.mrb[20].mxu1 %v12608_v23 }
 0x3bc   :  { %7333 = vmatpush1.bf16.msra.mxu1 %v11728_v49  ;;  %7364 = vmatprep.mubr.bf16.mxu1 %v12450_v0  ;;  %v11790_v49 = vld [vmem:[#allocation2 + $0x5ec] ss:$80 sps:$4 sm:$0xff]  }
 0x3bd   :  { %7390 = vmatpush1.bf16.msra.mxu0 %v11731_v50  ;;  %7537 = vmatprep.subr.bf16.mxu1 %v11736_v18  ;;  %v11797_v50 = vld [vmem:[#allocation2 + $0xc20] ss:$80 sps:$4 sm:$0xff]   ;;  %v11805_v18 = vld [vmem:[#allocation2 + $0xcc4] ss:$80 sps:$4 sm:$0xff]  }
 0x3be   :  { %7391 = vmatprep.subr.bf16.mxu0 %v11739_v51  ;;  %v11788_v51 = vld [vmem:[#allocation2 + $0x5e8] ss:$80 sps:$4 sm:$0xff]  }
 0x3c1   :  { %7392 = vmatpush1.bf16.msra.mxu0 %v11737_v21  ;;  %v11796_v21 = vld [vmem:[#allocation2 + $0x68c] ss:$80 sps:$4 sm:$0xff]  }
 0x3c2   :  { %7393 = vmatprep.subr.bf16.mxu0 %v11745_v8  ;;  %v11803_v8 = vld [vmem:[#allocation2 + $0xcc0] ss:$80 sps:$4 sm:$0xff]  }
 0x3c5   :  { %7394 = vmatpush1.bf16.msra.mxu0 %v11743_v52  ;;  %v11811_v52 = vld [vmem:[#allocation2 + $0xd64] ss:$80 sps:$4 sm:$0xff]  }
 0x3c6   :  { %7395 = vmatprep.subr.bf16.mxu0 %v11751_v53  ;;  %v11794_v53 = vld [vmem:[#allocation2 + $0x688] ss:$80 sps:$4 sm:$0xff]  }
 0x3c7   :  { %10163 = vmatmul.mubr.msk.bf16.vlgmr.msra.gmra.mrb[20].mxu1 %vm6057_vm0, %v12615_v27 }
 0x3c8   :  { %7538 = vmatpush1.bf16.msra.mxu1 %v11734_v10  ;;  %7569 = vmatprep.mubr.bf16.mxu1 %v12611_v25  ;;  %v11802_v10 = vld [vmem:[#allocation2 + $0x72c] ss:$80 sps:$4 sm:$0xff]  }
 0x3c9   :  { %7539 = vmatprep.subr.bf16.mxu1 %v11742_v54  ;;  %7396 = vmatpush1.bf16.msra.mxu0 %v11749_v55  ;;  %v11809_v54 = vld [vmem:[#allocation2 + $0xd60] ss:$80 sps:$4 sm:$0xff]   ;;  %v11817_v55 = vld [vmem:[#allocation2 + $0xe04] ss:$80 sps:$4 sm:$0xff]  }
 0x3ca   :  { %7397 = vmatprep.subr.bf16.mxu0 %v11757_v56  ;;  %v11800_v56 = vld [vmem:[#allocation2 + $0x728] ss:$80 sps:$4 sm:$0xff]  }
 0x3cc   :  { %7540 = vmatpush1.bf16.msra.mxu1 %v11740_v57  ;;  %v11808_v57 = vld [vmem:[#allocation2 + $0x7cc] ss:$80 sps:$4 sm:$0xff]  }
 0x3cd   :  { %7541 = vmatprep.subr.bf16.mxu1 %v11748_v58  ;;  %7398 = vmatpush1.bf16.msra.mxu0 %v11755_v59  ;;  %v11815_v58 = vld [vmem:[#allocation2 + $0xe00] ss:$80 sps:$4 sm:$0xff]   ;;  %v11823_v59 = vld [vmem:[#allocation2 + $0xea4] ss:$80 sps:$4 sm:$0xff]  }
 0x3ce   :  { %v7038_v7 = vpop.f32.mrb[16].mxu1  ;;  %7399 = vmatprep.subr.bf16.mxu0 %v11763_v60  ;;  %v11806_v60 = vld [vmem:[#allocation2 + $0x7c8] ss:$80 sps:$4 sm:$0xff]  }
 0x3cf   :  { %v12752_v13 = vmax.f32 %v7701_v48, %v7038_v7  ;;  %v7040_v25 = vpop.f32.mrb[17].mxu1  ;;  %v11773_v48 = vld [vmem:[#allocation2 + $0x9a0] ss:$80 sps:$4 sm:$0xff]   ;;  %v11812_v7 = vld [vmem:[#allocation2 + $0x868] ss:$80 sps:$4 sm:$0xff]  }
 0x3d0   :  { %7542 = vmatpush1.bf16.msra.mxu1 %v11746_v61  ;;  %v12757_v14 = vmax.f32 %v7702_v35, %v7040_v25  ;;  %v7042_v15 = vpop.f32.mrb[18].mxu1  ;;  %v11779_v35 = vld [vmem:[#allocation2 + $0xa40] ss:$80 sps:$4 sm:$0xff]   ;;  %v11814_v61 = vld [vmem:[#allocation2 + $0x86c] ss:$80 sps:$4 sm:$0xff]  }
 0x3d1   :  { %v7043_v22 = vpop.f32.mrb[19].mxu1  ;;  %7543 = vmatprep.subr.bf16.mxu1 %v11754_v62  ;;  %7400 = vmatpush1.bf16.msra.mxu0 %v11761_v3  ;;  %v11821_v62 = vld [vmem:[#allocation2 + $0xea0] ss:$80 sps:$4 sm:$0xff]   ;;  %v11829_v3 = vld [vmem:[#allocation2 + $0xf44] ss:$80 sps:$4 sm:$0xff]  }
 0x3d2   :  { %7401 = vmatprep.subr.bf16.mxu0 %v11769_v11  ;;  %v11820_v11 = vld [vmem:[#allocation2 + $0x90c] ss:$80 sps:$4 sm:$0xff]   ;;  %v11827_v25 = vld [vmem:[#allocation2 + $0xf40] ss:$80 sps:$4 sm:$0xff]   ;;  %v11835_v15 = vld [vmem:[#allocation2 + $0xfe4] ss:$80 sps:$4 sm:$0xff]  }
 0x3d3   :  { %v11826_v22 = vld [vmem:[#allocation2 + $0x9ac] ss:$80 sps:$4 sm:$0xff]  }
 0x3d4   :  { %7544 = vmatpush1.bf16.msra.mxu1 %v11752_v16  ;;  %v11818_v16 = vld [vmem:[#allocation2 + $0x908] ss:$80 sps:$4 sm:$0xff]  }
 0x3d5   :  { %7545 = vmatprep.subr.bf16.mxu1 %v11760_v26  ;;  %7402 = vmatpush1.bf16.msra.mxu0 %v11767_v28  ;;  %v11833_v26 = vld [vmem:[#allocation2 + $0xfe0] ss:$80 sps:$4 sm:$0xff]   ;;  %v11841_v28 = vld [vmem:[#allocation2 + $0x1084] ss:$80 sps:$4 sm:$0xff]  }
 0x3d6   :  { %7403 = vmatprep.subr.bf16.mxu0 %v11775_v29  ;;  %v11824_v29 = vld [vmem:[#allocation2 + $0x9a8] ss:$80 sps:$4 sm:$0xff]  }
 0x3d8   :  { %7546 = vmatpush1.bf16.msra.mxu1 %v11758_v41  ;;  %v11832_v41 = vld [vmem:[#allocation2 + $0xa4c] ss:$80 sps:$4 sm:$0xff]  }
 0x3d9   :  { %7547 = vmatprep.subr.bf16.mxu1 %v11766_v42  ;;  %7404 = vmatpush1.bf16.msra.mxu0 %v11773_v48  ;;  %v11839_v42 = vld [vmem:[#allocation2 + $0x1080] ss:$80 sps:$4 sm:$0xff]   ;;  %v11847_v48 = vld [vmem:[#allocation2 + $0x1124] ss:$80 sps:$4 sm:$0xff]  }
 0x3da   :  { %7414 = vmatprep.subr.bf16.mxu0 %v11781_v17  ;;  %v11830_v17 = vld [vmem:[#allocation2 + $0xa48] ss:$80 sps:$4 sm:$0xff]  }
 0x3dc   :  { %7548 = vmatpush1.bf16.msra.mxu1 %v11764_v44  ;;  %7406 = vmatmul.mubr.bf16.vlgmr.msra.gmra.mrb[16].mxu0 %v12623_v20  ;;  %v11838_v44 = vld [vmem:[#allocation2 + $0xaec] ss:$80 sps:$4 sm:$0xff]  }
 0x3dd   :  { %7549 = vmatprep.subr.bf16.mxu1 %v11772_v32  ;;  %7415 = vmatpush1.bf16.msra.mxu0 %v11779_v35  ;;  %v11845_v32 = vld [vmem:[#allocation2 + $0x1120] ss:$80 sps:$4 sm:$0xff]   ;;  %v11853_v35 = vld [vmem:[#allocation2 + $0x11c4] ss:$80 sps:$4 sm:$0xff]  }
 0x3de   :  { %7416 = vmatprep.subr.bf16.mxu0 %v11787_v30  ;;  %7446 = vmatprep.mubr.bf16.mxu0 %v12627_v24  ;;  %v11836_v30 = vld [vmem:[#allocation2 + $0xae8] ss:$80 sps:$4 sm:$0xff]  }
 0x3e0   :  { %7550 = vmatpush1.bf16.msra.mxu1 %v11770_v33  ;;  %v11844_v33 = vld [vmem:[#allocation2 + $0xb8c] ss:$80 sps:$4 sm:$0xff]  }
 0x3e1   :  { %7551 = vmatprep.subr.bf16.mxu1 %v11778_v19  ;;  %7417 = vmatpush1.bf16.msra.mxu0 %v11785_v38  ;;  %v11851_v19 = vld [vmem:[#allocation2 + $0x11c0] ss:$80 sps:$4 sm:$0xff]   ;;  %v11859_v38 = vld [vmem:[#allocation2 + $0x1264] ss:$80 sps:$4 sm:$0xff]  }
 0x3e2   :  { %7418 = vmatprep.subr.bf16.mxu0 %v11793_v39  ;;  %v11842_v39 = vld [vmem:[#allocation2 + $0xb88] ss:$80 sps:$4 sm:$0xff]  }
 0x3e4   :  { %7552 = vmatpush1.bf16.msra.mxu1 %v11776_v40  ;;  %v11850_v40 = vld [vmem:[#allocation2 + $0xc2c] ss:$80 sps:$4 sm:$0xff]  }
 0x3e5   :  { %7553 = vmatprep.subr.bf16.mxu1 %v11784_v43  ;;  %7419 = vmatpush1.bf16.msra.mxu0 %v11791_v45  ;;  %v11857_v43 = vld [vmem:[#allocation2 + $0x1260] ss:$80 sps:$4 sm:$0xff]   ;;  %v11865_v45 = vld [vmem:[#allocation2 + $0x1304] ss:$80 sps:$4 sm:$0xff]  }
 0x3e6   :  { %7420 = vmatprep.subr.bf16.mxu0 %v11799_v46  ;;  %v11856_v46 = vld [vmem:[#allocation2 + $0xccc] ss:$80 sps:$4 sm:$0xff]  }
 0x3e8   :  { %7554 = vmatpush1.bf16.msra.mxu1 %v11782_v47  ;;  %v11871_v47 = vld [vmem:[#allocation2 + $0x13a4] ss:$80 sps:$4 sm:$0xff]  }
 0x3e9   :  { %7555 = vmatprep.subr.bf16.mxu1 %v11790_v49  ;;  %7421 = vmatpush1.bf16.msra.mxu0 %v11797_v50  ;;  %v11854_v49 = vld [vmem:[#allocation2 + $0xcc8] ss:$80 sps:$4 sm:$0xff]   ;;  %v11862_v50 = vld [vmem:[#allocation2 + $0xd6c] ss:$80 sps:$4 sm:$0xff]  }
 0x3ea   :  { %7422 = vmatprep.subr.bf16.mxu0 %v11805_v18  ;;  %v11869_v18 = vld [vmem:[#allocation2 + $0x13a0] ss:$80 sps:$4 sm:$0xff]  }
 0x3ec   :  { %7556 = vmatpush1.bf16.msra.mxu1 %v11788_v51  ;;  %v11877_v51 = vld [vmem:[#allocation2 + $0x1444] ss:$80 sps:$4 sm:$0xff]  }
 0x3ed   :  { %7557 = vmatprep.subr.bf16.mxu1 %v11796_v21  ;;  %7423 = vmatpush1.bf16.msra.mxu0 %v11803_v8  ;;  %v11860_v21 = vld [vmem:[#allocation2 + $0xd68] ss:$80 sps:$4 sm:$0xff]   ;;  %v11868_v8 = vld [vmem:[#allocation2 + $0xe0c] ss:$80 sps:$4 sm:$0xff]  }
 0x3ee   :  { %7424 = vmatprep.subr.bf16.mxu0 %v11811_v52  ;;  %v11875_v52 = vld [vmem:[#allocation2 + $0x1440] ss:$80 sps:$4 sm:$0xff]  }
 0x3f0   :  { %7558 = vmatpush1.bf16.msra.mxu1 %v11794_v53  ;;  %v11883_v53 = vld [vmem:[#allocation2 + $0x14e4] ss:$80 sps:$4 sm:$0xff]  }
 0x3f1   :  { %7559 = vmatprep.subr.bf16.mxu1 %v11802_v10  ;;  %7425 = vmatpush1.bf16.msra.mxu0 %v11809_v54  ;;  %v11866_v10 = vld [vmem:[#allocation2 + $0xe08] ss:$80 sps:$4 sm:$0xff]   ;;  %v11874_v54 = vld [vmem:[#allocation2 + $0xeac] ss:$80 sps:$4 sm:$0xff]  }
 0x3f2   :  { %7426 = vmatprep.subr.bf16.mxu0 %v11817_v55  ;;  %v11881_v55 = vld [vmem:[#allocation2 + $0x14e0] ss:$80 sps:$4 sm:$0xff]  }
 0x3f4   :  { %7560 = vmatpush1.bf16.msra.mxu1 %v11800_v56  ;;  %v11889_v56 = vld [vmem:[#allocation2 + $0x1584] ss:$80 sps:$4 sm:$0xff]  }
 0x3f5   :  { %7561 = vmatprep.subr.bf16.mxu1 %v11808_v57  ;;  %7427 = vmatpush1.bf16.msra.mxu0 %v11815_v58  ;;  %v11872_v57 = vld [vmem:[#allocation2 + $0xea8] ss:$80 sps:$4 sm:$0xff]   ;;  %v11880_v58 = vld [vmem:[#allocation2 + $0xf4c] ss:$80 sps:$4 sm:$0xff]  }
 0x3f6   :  { %7428 = vmatprep.subr.bf16.mxu0 %v11823_v59  ;;  %v11887_v59 = vld [vmem:[#allocation2 + $0x1580] ss:$80 sps:$4 sm:$0xff]  }
 0x3f8   :  { %7562 = vmatpush1.bf16.msra.mxu1 %v11806_v60  ;;  %v11895_v60 = vld [vmem:[#allocation2 + $0x1624] ss:$80 sps:$4 sm:$0xff]  }
 0x3f9   :  { %7563 = vmatprep.subr.bf16.mxu1 %v11814_v61  ;;  %7429 = vmatpush1.bf16.msra.mxu0 %v11821_v62  ;;  %v11878_v61 = vld [vmem:[#allocation2 + $0xf48] ss:$80 sps:$4 sm:$0xff]   ;;  %v11886_v62 = vld [vmem:[#allocation2 + $0xfec] ss:$80 sps:$4 sm:$0xff]  }
 0x3fa   :  { %7430 = vmatprep.subr.bf16.mxu0 %v11829_v3  ;;  %v11893_v3 = vld [vmem:[#allocation2 + $0x1620] ss:$80 sps:$4 sm:$0xff]  }
 0x3fc   :  { %7564 = vmatpush1.bf16.msra.mxu1 %v11812_v7  ;;  %v11901_v7 = vld [vmem:[#allocation2 + $0x16c4] ss:$80 sps:$4 sm:$0xff]  }
 0x3fd   :  { %7565 = vmatprep.subr.bf16.mxu1 %v11820_v11  ;;  %7431 = vmatpush1.bf16.msra.mxu0 %v11827_v25  ;;  %v11884_v11 = vld [vmem:[#allocation2 + $0xfe8] ss:$80 sps:$4 sm:$0xff]   ;;  %v11892_v25 = vld [vmem:[#allocation2 + $0x108c] ss:$80 sps:$4 sm:$0xff]  }
 0x3fe   :  { %7432 = vmatprep.subr.bf16.mxu0 %v11835_v15  ;;  %v11899_v15 = vld [vmem:[#allocation2 + $0x16c0] ss:$80 sps:$4 sm:$0xff]  }
 0x400   :  { %7566 = vmatpush1.bf16.msra.mxu1 %v11818_v16  ;;  %v11907_v16 = vld [vmem:[#allocation2 + $0x1764] ss:$80 sps:$4 sm:$0xff]  }
 0x401   :  { %7567 = vmatprep.subr.bf16.mxu1 %v11826_v22  ;;  %7433 = vmatpush1.bf16.msra.mxu0 %v11833_v26  ;;  %v11890_v22 = vld [vmem:[#allocation2 + $0x1088] ss:$80 sps:$4 sm:$0xff]   ;;  %v11898_v26 = vld [vmem:[#allocation2 + $0x112c] ss:$80 sps:$4 sm:$0xff]  }
 0x402   :  { %7434 = vmatprep.subr.bf16.mxu0 %v11841_v28  ;;  %v11905_v28 = vld [vmem:[#allocation2 + $0x1760] ss:$80 sps:$4 sm:$0xff]  }
 0x404   :  { %7568 = vmatpush1.bf16.msra.mxu1 %v11824_v29  ;;  %v11913_v29 = vld [vmem:[#allocation2 + $0x1804] ss:$80 sps:$4 sm:$0xff]  }
 0x405   :  { %7578 = vmatprep.subr.bf16.mxu1 %v11832_v41  ;;  %7435 = vmatpush1.bf16.msra.mxu0 %v11839_v42  ;;  %v11896_v41 = vld [vmem:[#allocation2 + $0x1128] ss:$80 sps:$4 sm:$0xff]   ;;  %v11904_v42 = vld [vmem:[#allocation2 + $0x11cc] ss:$80 sps:$4 sm:$0xff]  }
 0x406   :  { %7436 = vmatprep.subr.bf16.mxu0 %v11847_v48  ;;  %v11911_v48 = vld [vmem:[#allocation2 + $0x1800] ss:$80 sps:$4 sm:$0xff]  }
 0x407   :  { %7570 = vmatmul.mubr.bf16.vlgmr.msra.gmra.mrb[24].mxu1 %v12623_v20  ;;  %v11848_v20 = vld [vmem:[#allocation2 + $0xc28] ss:$80 sps:$4 sm:$0xff]  }
 0x408   :  { %7579 = vmatpush1.bf16.msra.mxu1 %v11830_v17  ;;  %7610 = vmatprep.mubr.bf16.mxu1 %v12627_v24  ;;  %v11863_v24 = vld [vmem:[#allocation2 + $0x1300] ss:$80 sps:$4 sm:$0xff]   ;;  %v11919_v17 = vld [vmem:[#allocation2 + $0x18a4] ss:$80 sps:$4 sm:$0xff]  }
 0x409   :  { %7580 = vmatprep.subr.bf16.mxu1 %v11838_v44  ;;  %7437 = vmatpush1.bf16.msra.mxu0 %v11845_v32  ;;  %v11902_v44 = vld [vmem:[#allocation2 + $0x11c8] ss:$80 sps:$4 sm:$0xff]   ;;  %v11910_v32 = vld [vmem:[#allocation2 + $0x126c] ss:$80 sps:$4 sm:$0xff]  }
 0x40a   :  { %7438 = vmatprep.subr.bf16.mxu0 %v11853_v35  ;;  %v11917_v35 = vld [vmem:[#allocation2 + $0x18a0] ss:$80 sps:$4 sm:$0xff]  }
 0x40c   :  { %7581 = vmatpush1.bf16.msra.mxu1 %v11836_v30  ;;  %v11925_v30 = vld [vmem:[#allocation2 + $0x1944] ss:$80 sps:$4 sm:$0xff]  }
 0x40d   :  { %7582 = vmatprep.subr.bf16.mxu1 %v11844_v33  ;;  %7439 = vmatpush1.bf16.msra.mxu0 %v11851_v19  ;;  %v11908_v33 = vld [vmem:[#allocation2 + $0x1268] ss:$80 sps:$4 sm:$0xff]   ;;  %v11916_v19 = vld [vmem:[#allocation2 + $0x130c] ss:$80 sps:$4 sm:$0xff]  }
 0x40e   :  { %7440 = vmatprep.subr.bf16.mxu0 %v11859_v38  ;;  %v11923_v38 = vld [vmem:[#allocation2 + $0x1940] ss:$80 sps:$4 sm:$0xff]  }
 0x410   :  { %7583 = vmatpush1.bf16.msra.mxu1 %v11842_v39  ;;  %v11931_v39 = vld [vmem:[#allocation2 + $0x19e4] ss:$80 sps:$4 sm:$0xff]  }
 0x411   :  { %7584 = vmatprep.subr.bf16.mxu1 %v11850_v40  ;;  %7441 = vmatpush1.bf16.msra.mxu0 %v11857_v43  ;;  %v11914_v40 = vld [vmem:[#allocation2 + $0x1308] ss:$80 sps:$4 sm:$0xff]   ;;  %v11922_v43 = vld [vmem:[#allocation2 + $0x13ac] ss:$80 sps:$4 sm:$0xff]  }
 0x412   :  { %7442 = vmatprep.subr.bf16.mxu0 %v11865_v45  ;;  %v11929_v45 = vld [vmem:[#allocation2 + $0x19e0] ss:$80 sps:$4 sm:$0xff]  }
 0x414   :  { %7585 = vmatpush1.bf16.msra.mxu1 %v11848_v20  ;;  %v11937_v20 = vld [vmem:[#allocation2 + $0x1a84] ss:$80 sps:$4 sm:$0xff]  }
 0x415   :  { %7586 = vmatprep.subr.bf16.mxu1 %v11856_v46  ;;  %7443 = vmatpush1.bf16.msra.mxu0 %v11863_v24  ;;  %v11920_v46 = vld [vmem:[#allocation2 + $0x13a8] ss:$80 sps:$4 sm:$0xff]   ;;  %v11928_v24 = vld [vmem:[#allocation2 + $0x144c] ss:$80 sps:$4 sm:$0xff]  }
 0x416   :  { %7444 = vmatprep.subr.bf16.mxu0 %v11871_v47  ;;  %v11935_v47 = vld [vmem:[#allocation2 + $0x1a80] ss:$80 sps:$4 sm:$0xff]  }
 0x418   :  { %7587 = vmatpush1.bf16.msra.mxu1 %v11854_v49  ;;  %v11943_v49 = vld [vmem:[#allocation2 + $0x1b24] ss:$80 sps:$4 sm:$0xff]  }
 0x419   :  { %7588 = vmatprep.subr.bf16.mxu1 %v11862_v50  ;;  %7445 = vmatpush1.bf16.msra.mxu0 %v11869_v18  ;;  %v11926_v50 = vld [vmem:[#allocation2 + $0x1448] ss:$80 sps:$4 sm:$0xff]   ;;  %v11934_v18 = vld [vmem:[#allocation2 + $0x14ec] ss:$80 sps:$4 sm:$0xff]  }
 0x41a   :  { %7455 = vmatprep.subr.bf16.mxu0 %v11877_v51  ;;  %v11941_v51 = vld [vmem:[#allocation2 + $0x1b20] ss:$80 sps:$4 sm:$0xff]  }
 0x41c   :  { %7589 = vmatpush1.bf16.msra.mxu1 %v11860_v21  ;;  %7447 = vmatmul.mubr.bf16.vlgmr.msra.gmra.mrb[16].mxu0 %v12640_v34  ;;  %v11949_v21 = vld [vmem:[#allocation2 + $0x1bc4] ss:$80 sps:$4 sm:$0xff]  }
 0x41d   :  { %7590 = vmatprep.subr.bf16.mxu1 %v11868_v8  ;;  %7456 = vmatpush1.bf16.msra.mxu0 %v11875_v52  ;;  %v11932_v8 = vld [vmem:[#allocation2 + $0x14e8] ss:$80 sps:$4 sm:$0xff]   ;;  %v11940_v52 = vld [vmem:[#allocation2 + $0x158c] ss:$80 sps:$4 sm:$0xff]  }
 0x41e   :  { %7457 = vmatprep.subr.bf16.mxu0 %v11883_v53  ;;  %7487 = vmatprep.mubr.bf16.mxu0 %v12634_v31  ;;  %v11947_v53 = vld [vmem:[#allocation2 + $0x1bc0] ss:$80 sps:$4 sm:$0xff]  }
 0x420   :  { %7591 = vmatpush1.bf16.msra.mxu1 %v11866_v10  ;;  %v11955_v10 = vld [vmem:[#allocation2 + $0x1c64] ss:$80 sps:$4 sm:$0xff]  }
 0x421   :  { %7592 = vmatprep.subr.bf16.mxu1 %v11874_v54  ;;  %7458 = vmatpush1.bf16.msra.mxu0 %v11881_v55  ;;  %v11938_v54 = vld [vmem:[#allocation2 + $0x1588] ss:$80 sps:$4 sm:$0xff]   ;;  %v11946_v55 = vld [vmem:[#allocation2 + $0x162c] ss:$80 sps:$4 sm:$0xff]  }
 0x422   :  { %7459 = vmatprep.subr.bf16.mxu0 %v11889_v56  ;;  %v11953_v56 = vld [vmem:[#allocation2 + $0x1c60] ss:$80 sps:$4 sm:$0xff]  }
 0x424   :  { %7593 = vmatpush1.bf16.msra.mxu1 %v11872_v57  ;;  %v11961_v57 = vld [vmem:[#allocation2 + $0x1d04] ss:$80 sps:$4 sm:$0xff]  }
 0x425   :  { %7594 = vmatprep.subr.bf16.mxu1 %v11880_v58  ;;  %7460 = vmatpush1.bf16.msra.mxu0 %v11887_v59  ;;  %v11952_v58 = vld [vmem:[#allocation2 + $0x16cc] ss:$80 sps:$4 sm:$0xff]   ;;  %v11967_v59 = vld [vmem:[#allocation2 + $0x1da4] ss:$80 sps:$4 sm:$0xff]  }
 0x426   :  { %7461 = vmatprep.subr.bf16.mxu0 %v11895_v60  ;;  %v11950_v60 = vld [vmem:[#allocation2 + $0x16c8] ss:$80 sps:$4 sm:$0xff]  }
 0x428   :  { %7595 = vmatpush1.bf16.msra.mxu1 %v11878_v61  ;;  %v11958_v61 = vld [vmem:[#allocation2 + $0x176c] ss:$80 sps:$4 sm:$0xff]  }
 0x429   :  { %7596 = vmatprep.subr.bf16.mxu1 %v11886_v62  ;;  %7462 = vmatpush1.bf16.msra.mxu0 %v11893_v3  ;;  %v11965_v62 = vld [vmem:[#allocation2 + $0x1da0] ss:$80 sps:$4 sm:$0xff]   ;;  %v11973_v3 = vld [vmem:[#allocation2 + $0x1e44] ss:$80 sps:$4 sm:$0xff]  }
 0x42a   :  { %7463 = vmatprep.subr.bf16.mxu0 %v11901_v7  ;;  %v11956_v7 = vld [vmem:[#allocation2 + $0x1768] ss:$80 sps:$4 sm:$0xff]  }
 0x42c   :  { %7597 = vmatpush1.bf16.msra.mxu1 %v11884_v11  ;;  %v11964_v11 = vld [vmem:[#allocation2 + $0x180c] ss:$80 sps:$4 sm:$0xff]  }
 0x42d   :  { %7598 = vmatprep.subr.bf16.mxu1 %v11892_v25  ;;  %7464 = vmatpush1.bf16.msra.mxu0 %v11899_v15  ;;  %v11971_v25 = vld [vmem:[#allocation2 + $0x1e40] ss:$80 sps:$4 sm:$0xff]   ;;  %v12003_v15 = vld [vmem:[#allocation7 + $0x4] ss:$16 sps:$4 sm:$0xff]  }
 0x42e   :  { %7465 = vmatprep.subr.bf16.mxu0 %v11907_v16  ;;  %v11962_v16 = vld [vmem:[#allocation2 + $0x1808] ss:$80 sps:$4 sm:$0xff]  }
 0x430   :  { %7599 = vmatpush1.bf16.msra.mxu1 %v11890_v22  ;;  %v11970_v22 = vld [vmem:[#allocation2 + $0x18ac] ss:$80 sps:$4 sm:$0xff]  }
 0x431   :  { %7600 = vmatprep.subr.bf16.mxu1 %v11898_v26  ;;  %7466 = vmatpush1.bf16.msra.mxu0 %v11905_v28  ;;  %v11968_v26 = vld [vmem:[#allocation2 + $0x18a8] ss:$80 sps:$4 sm:$0xff]   ;;  %v11976_v28 = vld [vmem:[#allocation2 + $0x194c] ss:$80 sps:$4 sm:$0xff]  }
 0x432   :  { %7467 = vmatprep.subr.bf16.mxu0 %v11913_v29  ;;  %v11974_v29 = vld [vmem:[#allocation2 + $0x1948] ss:$80 sps:$4 sm:$0xff]  }
 0x434   :  { %7601 = vmatpush1.bf16.msra.mxu1 %v11896_v41  ;;  %v11979_v41 = vld [vmem:[#allocation2 + $0x19ec] ss:$80 sps:$4 sm:$0xff]  }
 0x435   :  { %7602 = vmatprep.subr.bf16.mxu1 %v11904_v42  ;;  %7468 = vmatpush1.bf16.msra.mxu0 %v11911_v48  ;;  %v12001_v42 = vld [vmem:[#allocation7] ss:$16 sps:$4 sm:$0xff]   ;;  %v12009_v48 = vld [vmem:[#allocation7 + $0x24] ss:$16 sps:$4 sm:$0xff]  }
 0x436   :  { %7469 = vmatprep.subr.bf16.mxu0 %v11919_v17  ;;  %v11977_v17 = vld [vmem:[#allocation2 + $0x19e8] ss:$80 sps:$4 sm:$0xff]  }
 0x438   :  { %7603 = vmatpush1.bf16.msra.mxu1 %v11902_v44  ;;  %v11982_v44 = vld [vmem:[#allocation2 + $0x1a8c] ss:$80 sps:$4 sm:$0xff]  }
 0x439   :  { %7604 = vmatprep.subr.bf16.mxu1 %v11910_v32  ;;  %7470 = vmatpush1.bf16.msra.mxu0 %v11917_v35  ;;  %v12007_v32 = vld [vmem:[#allocation7 + $0x20] ss:$16 sps:$4 sm:$0xff]   ;;  %v12015_v35 = vld [vmem:[#allocation7 + $0x44] ss:$16 sps:$4 sm:$0xff]  }
 0x43a   :  { %7471 = vmatprep.subr.bf16.mxu0 %v11925_v30  ;;  %v11980_v30 = vld [vmem:[#allocation2 + $0x1a88] ss:$80 sps:$4 sm:$0xff]  }
 0x43c   :  { %7605 = vmatpush1.bf16.msra.mxu1 %v11908_v33  ;;  %v11985_v33 = vld [vmem:[#allocation2 + $0x1b2c] ss:$80 sps:$4 sm:$0xff]  }
 0x43d   :  { %7606 = vmatprep.subr.bf16.mxu1 %v11916_v19  ;;  %7472 = vmatpush1.bf16.msra.mxu0 %v11923_v38  ;;  %v12013_v19 = vld [vmem:[#allocation7 + $0x40] ss:$16 sps:$4 sm:$0xff]   ;;  %v12021_v38 = vld [vmem:[#allocation7 + $0x64] ss:$16 sps:$4 sm:$0xff]  }
 0x43e   :  { %7473 = vmatprep.subr.bf16.mxu0 %v11931_v39 }
 0x440   :  { %7607 = vmatpush1.bf16.msra.mxu1 %v11914_v40  ;;  %v11983_v40 = vld [vmem:[#allocation2 + $0x1b28] ss:$80 sps:$4 sm:$0xff]  }
 0x441   :  { %7608 = vmatprep.subr.bf16.mxu1 %v11922_v43  ;;  %7474 = vmatpush1.bf16.msra.mxu0 %v11929_v45 }
 0x442   :  { %7475 = vmatprep.subr.bf16.mxu0 %v11937_v20  ;;  %v11988_v20 = vld [vmem:[#allocation2 + $0x1bcc] ss:$80 sps:$4 sm:$0xff]  }
 0x444   :  { %7609 = vmatpush1.bf16.msra.mxu1 %v11920_v46 }
 0x445   :  { %7619 = vmatprep.subr.bf16.mxu1 %v11928_v24  ;;  %7476 = vmatpush1.bf16.msra.mxu0 %v11935_v47  ;;  %v12019_v47 = vld [vmem:[#allocation7 + $0x60] ss:$16 sps:$4 sm:$0xff]  }
 0x446   :  { %7477 = vmatprep.subr.bf16.mxu0 %v11943_v49 }
 0x447   :  { %7611 = vmatmul.mubr.bf16.vlgmr.msra.gmra.mrb[24].mxu1 %v12640_v34  ;;  %v11944_v34 = vld [vmem:[#allocation2 + $0x1628] ss:$80 sps:$4 sm:$0xff]  }
 0x448   :  { %7620 = vmatpush1.bf16.msra.mxu1 %v11926_v50  ;;  %7651 = vmatprep.mubr.bf16.mxu1 %v12634_v31  ;;  %v11959_v31 = vld [vmem:[#allocation2 + $0x1d00] ss:$80 sps:$4 sm:$0xff]   ;;  %v12027_v50 = vld [vmem:[#allocation7 + $0x84] ss:$16 sps:$4 sm:$0xff]  }
 0x449   :  { %7621 = vmatprep.subr.bf16.mxu1 %v11934_v18  ;;  %7478 = vmatpush1.bf16.msra.mxu0 %v11941_v51  ;;  %v11986_v18 = vld [vmem:[#allocation2 + $0x1bc8] ss:$80 sps:$4 sm:$0xff]  }
 0x44a   :  { %7479 = vmatprep.subr.bf16.mxu0 %v11949_v21  ;;  %v11989_v51 = vld [vmem:[#allocation2 + $0x1c68] ss:$80 sps:$4 sm:$0xff]  }
 0x44b   :  { %v11992_v21 = vld [vmem:[#allocation2 + $0x1d08] ss:$80 sps:$4 sm:$0xff]  }
 0x44c   :  { %7622 = vmatpush1.bf16.msra.mxu1 %v11932_v8  ;;  %v11997_v8 = vld [vmem:[#allocation2 + $0x1dac] ss:$80 sps:$4 sm:$0xff]  }
 0x44d   :  { %7623 = vmatprep.subr.bf16.mxu1 %v11940_v52  ;;  %7480 = vmatpush1.bf16.msra.mxu0 %v11947_v53  ;;  %v12037_v52 = vld [vmem:[#allocation7 + $0xc0] ss:$16 sps:$4 sm:$0xff]   ;;  %v12045_v53 = vld [vmem:[#allocation7 + $0xe4] ss:$16 sps:$4 sm:$0xff]  }
 0x44e   :  { %7481 = vmatprep.subr.bf16.mxu0 %v11955_v10  ;;  %v11995_v10 = vld [vmem:[#allocation2 + $0x1da8] ss:$80 sps:$4 sm:$0xff]  }
 0x450   :  { %7624 = vmatpush1.bf16.msra.mxu1 %v11938_v54  ;;  %v12000_v54 = vld [vmem:[#allocation2 + $0x1e4c] ss:$80 sps:$4 sm:$0xff]  }
 0x451   :  { %7625 = vmatprep.subr.bf16.mxu1 %v11946_v55  ;;  %7482 = vmatpush1.bf16.msra.mxu0 %v11953_v56  ;;  %v12043_v55 = vld [vmem:[#allocation7 + $0xe0] ss:$16 sps:$4 sm:$0xff]   ;;  %v12051_v56 = vld [vmem:[#allocation7 + $0x104] ss:$16 sps:$4 sm:$0xff]  }
 0x452   :  { %7483 = vmatprep.subr.bf16.mxu0 %v11961_v57  ;;  %v11998_v57 = vld [vmem:[#allocation2 + $0x1e48] ss:$80 sps:$4 sm:$0xff]  }
 0x454   :  { %7626 = vmatpush1.bf16.msra.mxu1 %v11944_v34  ;;  %v12006_v34 = vld [vmem:[#allocation7 + $0xc] ss:$16 sps:$4 sm:$0xff]  }
 0x455   :  { %7627 = vmatprep.subr.bf16.mxu1 %v11952_v58  ;;  %7484 = vmatpush1.bf16.msra.mxu0 %v11959_v31  ;;  %v12049_v58 = vld [vmem:[#allocation7 + $0x100] ss:$16 sps:$4 sm:$0xff]   ;;  %v12057_v31 = vld [vmem:[#allocation7 + $0x124] ss:$16 sps:$4 sm:$0xff]  }
 0x456   :  { %7485 = vmatprep.subr.bf16.mxu0 %v11967_v59  ;;  %v12055_v59 = vld [vmem:[#allocation7 + $0x120] ss:$16 sps:$4 sm:$0xff]  }
 0x458   :  { %7628 = vmatpush1.bf16.msra.mxu1 %v11950_v60  ;;  %v12063_v60 = vld [vmem:[#allocation7 + $0x144] ss:$16 sps:$4 sm:$0xff]  }
 0x459   :  { %7629 = vmatprep.subr.bf16.mxu1 %v11958_v61  ;;  %7486 = vmatpush1.bf16.msra.mxu0 %v11965_v62  ;;  %v12061_v61 = vld [vmem:[#allocation7 + $0x140] ss:$16 sps:$4 sm:$0xff]   ;;  %v12069_v62 = vld [vmem:[#allocation7 + $0x164] ss:$16 sps:$4 sm:$0xff]  }
 0x45a   :  { %7496 = vmatprep.subr.bf16.mxu0 %v11973_v3  ;;  %v12004_v3 = vld [vmem:[#allocation7 + $0x8] ss:$16 sps:$4 sm:$0xff]  }
 0x45c   :  { %7630 = vmatpush1.bf16.msra.mxu1 %v11956_v7  ;;  %7488 = vmatmul.mubr.bf16.vlgmr.msra.gmra.mrb[16].mxu0 %v12608_v23  ;;  %v12012_v7 = vld [vmem:[#allocation7 + $0x2c] ss:$16 sps:$4 sm:$0xff]  }
 0x45d   :  { %7631 = vmatprep.subr.bf16.mxu1 %v11964_v11  ;;  %7497 = vmatpush1.bf16.msra.mxu0 %v11971_v25  ;;  %v12067_v11 = vld [vmem:[#allocation7 + $0x160] ss:$16 sps:$4 sm:$0xff]   ;;  %v12075_v25 = vld [vmem:[#allocation7 + $0x184] ss:$16 sps:$4 sm:$0xff]  }
 0x45e   :  { %7528 = vmatprep.mubr.bf16.mxu0 %v12450_v0  ;;  %8718 = vmatprep.subr.bf16.mxu0 %v12003_v15  ;;  %v12018_v15 = vld [vmem:[#allocation7 + $0x4c] ss:$16 sps:$4 sm:$0xff]  }
 0x460   :  { %7632 = vmatpush1.bf16.msra.mxu1 %v11962_v16  ;;  %v12073_v16 = vld [vmem:[#allocation7 + $0x180] ss:$16 sps:$4 sm:$0xff]  }
 0x461   :  { %7633 = vmatprep.subr.bf16.mxu1 %v11970_v22  ;;  %v12081_v22 = vld [vmem:[#allocation7 + $0x1a4] ss:$16 sps:$4 sm:$0xff]  }
 0x464   :  { %7634 = vmatpush1.bf16.msra.mxu1 %v11968_v26  ;;  %v12016_v26 = vld [vmem:[#allocation7 + $0x48] ss:$16 sps:$4 sm:$0xff]  }
 0x465   :  { %7635 = vmatprep.subr.bf16.mxu1 %v11976_v28  ;;  %v12024_v28 = vld [vmem:[#allocation7 + $0x6c] ss:$16 sps:$4 sm:$0xff]  }
 0x468   :  { %7636 = vmatpush1.bf16.msra.mxu1 %v11974_v29  ;;  %10164 = vmatmul.mubr.msk.bf16.vlgmr.msra.gmra.mrb[16].mxu0 %vm6057_vm0, %v12615_v27  ;;  %v12079_v29 = vld [vmem:[#allocation7 + $0x1a0] ss:$16 sps:$4 sm:$0xff]  }
 0x469   :  { %7637 = vmatprep.subr.bf16.mxu1 %v11979_v41  ;;  %8719 = vmatpush1.bf16.msra.mxu0 %v12001_v42 }
 0x46a   :  { %8720 = vmatprep.subr.bf16.mxu0 %v12009_v48 }
 0x46c   :  { %7638 = vmatpush1.bf16.msra.mxu1 %v11977_v17 }
 0x46d   :  { %7639 = vmatprep.subr.bf16.mxu1 %v11982_v44  ;;  %8721 = vmatpush1.bf16.msra.mxu0 %v12007_v32  ;;  %v12022_v44 = vld [vmem:[#allocation7 + $0x68] ss:$16 sps:$4 sm:$0xff]  }
 0x46e   :  { %8722 = vmatprep.subr.bf16.mxu0 %v12015_v35  ;;  %v12030_v35 = vld [vmem:[#allocation7 + $0x8c] ss:$16 sps:$4 sm:$0xff]  }
 0x46f   :  { %v7202_v39 = vpop.f32.mrb[12].mxu0 }
 0x470   :  { %7640 = vmatpush1.bf16.msra.mxu1 %v11980_v30  ;;  %v12774_v43 = vmax.f32 %v7703_v37, %v7202_v39  ;;  %v7204_v45 = vpop.f32.mrb[13].mxu0  ;;  %v12033_v37 = vld [vmem:[#allocation7 + $0xa4] ss:$16 sps:$4 sm:$0xff]   ;;  %v12028_v30 = vld [vmem:[#allocation7 + $0x88] ss:$16 sps:$4 sm:$0xff]  }
 0x471   :  { %7641 = vmatprep.subr.bf16.mxu1 %v11985_v33  ;;  %v12779_v46 = vmax.f32 %v7704_v4, %v7204_v45  ;;  %v7206_v24 = vpop.f32.mrb[14].mxu0  ;;  %8723 = vmatpush1.bf16.msra.mxu0 %v12013_v19  ;;  %v12039_v4 = vld [vmem:[#allocation7 + $0xc4] ss:$16 sps:$4 sm:$0xff]   ;;  %v12036_v33 = vld [vmem:[#allocation7 + $0xac] ss:$16 sps:$4 sm:$0xff]  }
 0x472   :  { %v7207_v49 = vpop.f32.mrb[15].mxu0  ;;  %8724 = vmatprep.subr.bf16.mxu0 %v12021_v38  ;;  %v12048_v19 = vld [vmem:[#allocation7 + $0xec] ss:$16 sps:$4 sm:$0xff]   ;;  %v12046_v38 = vld [vmem:[#allocation7 + $0xe8] ss:$16 sps:$4 sm:$0xff]  }
 0x473   :  { %v12054_v39 = vld [vmem:[#allocation7 + $0x10c] ss:$16 sps:$4 sm:$0xff]  }
 0x474   :  { %7642 = vmatpush1.bf16.msra.mxu1 %v11983_v40  ;;  %v12052_v40 = vld [vmem:[#allocation7 + $0x108] ss:$16 sps:$4 sm:$0xff]   ;;  %v12060_v45 = vld [vmem:[#allocation7 + $0x12c] ss:$16 sps:$4 sm:$0xff]  }
 0x475   :  { %7643 = vmatprep.subr.bf16.mxu1 %v11988_v20  ;;  %8725 = vmatpush1.bf16.msra.mxu0 %v12019_v47  ;;  %v12058_v20 = vld [vmem:[#allocation7 + $0x128] ss:$16 sps:$4 sm:$0xff]   ;;  %v12066_v24 = vld [vmem:[#allocation7 + $0x14c] ss:$16 sps:$4 sm:$0xff]  }
 0x476   :  { %8726 = vmatprep.subr.bf16.mxu0 %v12027_v50  ;;  %v12064_v47 = vld [vmem:[#allocation7 + $0x148] ss:$16 sps:$4 sm:$0xff]   ;;  %v12072_v49 = vld [vmem:[#allocation7 + $0x16c] ss:$16 sps:$4 sm:$0xff]  }
 0x477   :  { %v12070_v50 = vld [vmem:[#allocation7 + $0x168] ss:$16 sps:$4 sm:$0xff]  }
 0x478   :  { %7644 = vmatpush1.bf16.msra.mxu1 %v11986_v18  ;;  %v12078_v18 = vld [vmem:[#allocation7 + $0x18c] ss:$16 sps:$4 sm:$0xff]  }
 0x479   :  { %7645 = vmatprep.subr.bf16.mxu1 %v11991_v1  ;;  %8727 = vmatpush1.bf16.msra.mxu0 %v12025_v36  ;;  %v12076_v1 = vld [vmem:[#allocation7 + $0x188] ss:$16 sps:$4 sm:$0xff]   ;;  %v12084_v36 = vld [vmem:[#allocation7 + $0x1ac] ss:$16 sps:$4 sm:$0xff]  }
 0x47a   :  { %8728 = vmatprep.subr.bf16.mxu0 %v12033_v37  ;;  %v12087_v37 = vld [vmem:[#allocation7 + $0x1c4] ss:$16 sps:$4 sm:$0xff]  }
 0x47c   :  { %7646 = vmatpush1.bf16.msra.mxu1 %v11989_v51  ;;  %v12085_v51 = vld [vmem:[#allocation7 + $0x1c0] ss:$16 sps:$4 sm:$0xff]  }
 0x47d   :  { %7647 = vmatprep.subr.bf16.mxu1 %v11994_v2  ;;  %8729 = vmatpush1.bf16.msra.mxu0 %v12031_v63  ;;  %v12093_v2 = vld [vmem:[#allocation7 + $0x1e4] ss:$16 sps:$4 sm:$0xff]   ;;  %v12082_v63 = vld [vmem:[#allocation7 + $0x1a8] ss:$16 sps:$4 sm:$0xff]  }
 0x47e   :  { %8730 = vmatprep.subr.bf16.mxu0 %v12039_v4  ;;  %v12091_v4 = vld [vmem:[#allocation7 + $0x1e0] ss:$16 sps:$4 sm:$0xff]  }
 0x480   :  { %7648 = vmatpush1.bf16.msra.mxu1 %v11992_v21  ;;  %v12090_v21 = vld [vmem:[#allocation7 + $0x1cc] ss:$16 sps:$4 sm:$0xff]  }
 0x481   :  { %7649 = vmatprep.subr.bf16.mxu1 %v11997_v8  ;;  %8731 = vmatpush1.bf16.msra.mxu0 %v12037_v52  ;;  %v12099_v8 = vld [vmem:[#allocation7 + $0x204] ss:$16 sps:$4 sm:$0xff]   ;;  %v12088_v52 = vld [vmem:[#allocation7 + $0x1c8] ss:$16 sps:$4 sm:$0xff]  }
 0x482   :  { %8732 = vmatprep.subr.bf16.mxu0 %v12045_v53  ;;  %v12096_v53 = vld [vmem:[#allocation7 + $0x1ec] ss:$16 sps:$4 sm:$0xff]  }
 0x484   :  { %7650 = vmatpush1.bf16.msra.mxu1 %v11995_v10  ;;  %v12094_v10 = vld [vmem:[#allocation7 + $0x1e8] ss:$16 sps:$4 sm:$0xff]  }
 0x485   :  { %7660 = vmatprep.subr.bf16.mxu1 %v12000_v54  ;;  %8733 = vmatpush1.bf16.msra.mxu0 %v12043_v55  ;;  %v12102_v54 = vld [vmem:[#allocation7 + $0x20c] ss:$16 sps:$4 sm:$0xff]   ;;  %v7720_v55 = vsub.s32 0, %v12590_v6 }
 0x486   :  { %8734 = vmatprep.subr.bf16.mxu0 %v12051_v56  ;;  %v12795_v56 = vld [vmem:[#allocation5] sm:$0x1f] }
 0x487   :  { %7652 = vmatmul.mubr.bf16.vlgmr.msra.gmra.mrb[24].mxu1 %v12608_v23  ;;  %v12010_v23 = vld [vmem:[#allocation7 + $0x28] ss:$16 sps:$4 sm:$0xff]  }
 0x488   :  { %7661 = vmatpush1.bf16.msra.mxu1 %v11998_v57  ;;  %7692 = vmatprep.mubr.bf16.mxu1 %v12450_v0  ;;  %v7724_v57 = vsub.s32 1, %v12590_v6 }
 0x489   :  { %8841 = vmatprep.subr.bf16.mxu1 %v12006_v34  ;;  %8735 = vmatpush1.bf16.msra.mxu0 %v12049_v58  ;;  %v7721_v34 = vrot.slane %v12795_v56, %v7720_v55 }
 0x48a   :  { %8736 = vmatprep.subr.bf16.mxu0 %v12057_v31  ;;  %v7725_v58 = vrot.slane %v12795_v56, %v7724_v57  ;;  %v12159_v57 = vld [vmem:[#allocation7 + $0x344] ss:$16 sps:$4 sm:$0xff]  }
 0x48d   :  { %8737 = vmatpush1.bf16.msra.mxu0 %v12055_v59 }
 0x48e   :  { %8738 = vmatprep.subr.bf16.mxu0 %v12063_v60 }
 0x491   :  { %8739 = vmatpush1.bf16.msra.mxu0 %v12061_v61 }
 0x492   :  { %8740 = vmatprep.subr.bf16.mxu0 %v12069_v62 }
 0x493   :  { %10165 = vmatmul.mubr.msk.bf16.vlgmr.msra.gmra.mrb[24].mxu1 %vm6057_vm0, %v12615_v27 }
 0x494   :  { %8842 = vmatpush1.bf16.msra.mxu1 %v12004_v3 }
 0x495   :  { %8843 = vmatprep.subr.bf16.mxu1 %v12012_v7  ;;  %8741 = vmatpush1.bf16.msra.mxu0 %v12067_v11 }
 0x496   :  { %8742 = vmatprep.subr.bf16.mxu0 %v12075_v25 }
 0x498   :  { %8844 = vmatpush1.bf16.msra.mxu1 %v12010_v23 }
 0x499   :  { %8845 = vmatprep.subr.bf16.mxu1 %v12018_v15  ;;  %8743 = vmatpush1.bf16.msra.mxu0 %v12073_v16  ;;  %v12097_v16 = vld [vmem:[#allocation7 + $0x200] ss:$16 sps:$4 sm:$0xff]  }
 0x49a   :  { %v7366_v41 = vpop.f32.mrb[20].mxu1  ;;  %8744 = vmatprep.subr.bf16.mxu0 %v12081_v22  ;;  %v12100_v22 = vld [vmem:[#allocation7 + $0x208] ss:$16 sps:$4 sm:$0xff]  }
 0x49b   :  { %v12788_v27 = vmax.f32 %v7705_v9, %v7366_v41  ;;  %v12790_v42 = vpop.f32.mrb[21].mxu1  ;;  %v12040_v9 = vld [vmem:[#allocation7 + $0xc8] ss:$16 sps:$4 sm:$0xff]   ;;  %v12111_v41 = vld [vmem:[#allocation7 + $0x244] ss:$16 sps:$4 sm:$0xff]  }
 0x49c   :  { %v7711_v48 = vmax.f32 %v12752_v13, %v12790_v42  ;;  %v7370_v17 = vpop.f32.mrb[22].mxu1  ;;  %8846 = vmatpush1.bf16.msra.mxu1 %v12016_v26  ;;  %v12108_v13 = vld [vmem:[#allocation7 + $0x22c] ss:$16 sps:$4 sm:$0xff]  }
 0x49d   :  { %v7371_v32 = vpop.f32.mrb[23].mxu1  ;;  %8847 = vmatprep.subr.bf16.mxu1 %v12024_v28  ;;  %8745 = vmatpush1.bf16.msra.mxu0 %v12079_v29  ;;  %v12105_v28 = vld [vmem:[#allocation7 + $0x224] ss:$16 sps:$4 sm:$0xff]   ;;  %v12106_v29 = vld [vmem:[#allocation7 + $0x228] ss:$16 sps:$4 sm:$0xff]  }
 0x49e   :  { %8746 = vmatprep.subr.bf16.mxu0 %v12087_v37  ;;  %v7743_v31 = vadd.f32 %v7721_v34, %v7711_v48  ;;  %v12114_v42 = vld [vmem:[#allocation7 + $0x24c] ss:$16 sps:$4 sm:$0xff]   ;;  %v12109_v48 = vld [vmem:[#allocation7 + $0x240] ss:$16 sps:$4 sm:$0xff]   ;;  %v12112_v17 = vld [vmem:[#allocation7 + $0x248] ss:$16 sps:$4 sm:$0xff]  }
 0x49f   :  { %v12120_v32 = vld [vmem:[#allocation7 + $0x26c] ss:$16 sps:$4 sm:$0xff]  }
 0x4a0   :  { %8848 = vmatpush1.bf16.msra.mxu1 %v12022_v44  ;;  %v7748_v25 = vmax.f32 %v7743_v31, 0.0  ;;  %v12117_v44 = vld [vmem:[#allocation7 + $0x264] ss:$16 sps:$4 sm:$0xff]   ;;  %v12150_v37 = vld [vmem:[#allocation7 + $0x30c] ss:$16 sps:$4 sm:$0xff]  }
 0x4a1   :  { %8849 = vmatprep.subr.bf16.mxu1 %v12030_v35  ;;  %8747 = vmatpush1.bf16.msra.mxu0 %v12085_v51  ;;  %v12115_v35 = vld [vmem:[#allocation7 + $0x260] ss:$16 sps:$4 sm:$0xff]   ;;  %v7732_v51 = vsub.s32 3, %v12590_v6  ;;  %v12162_v34 = vld [vmem:[#allocation7 + $0x34c] ss:$16 sps:$4 sm:$0xff]  }
 0x4a2   :  { %8748 = vmatprep.subr.bf16.mxu0 %v12093_v2  ;;  %v7753_v26 = vpack.c.bf16 %v7748_v25, %v7748_v25  ;;  %v12145_v2 = vld [vmem:[#allocation7 + $0x300] ss:$16 sps:$4 sm:$0xff]   ;;  %v12168_v25 = vld [vmem:[#allocation7 + $0x36c] ss:$16 sps:$4 sm:$0xff]  }
 0x4a4   :  { %8850 = vmatpush1.bf16.msra.mxu1 %v12028_v30  ;;  %v12118_v30 = vld [vmem:[#allocation7 + $0x268] ss:$16 sps:$4 sm:$0xff]  }
 0x4a5   :  { %8851 = vmatprep.subr.bf16.mxu1 %v12036_v33  ;;  %8749 = vmatpush1.bf16.msra.mxu0 %v12091_v4  ;;  %v12123_v33 = vld [vmem:[#allocation7 + $0x284] ss:$16 sps:$4 sm:$0xff]  }
 0x4a6   :  { %8759 = vmatprep.subr.bf16.mxu0 %v12099_v8  ;;  %v12153_v4 = vld [vmem:[#allocation7 + $0x324] ss:$16 sps:$4 sm:$0xff]   ;;  %v7733_v8 = vrot.slane %v12795_v56, %v7732_v51  ;;  %v12211_v51 = vld [vmem:[#allocation7 + $0x460] ss:$16 sps:$4 sm:$0xff]  }
 0x4a8   :  { %8852 = vmatpush1.bf16.msra.mxu1 %v12034_v12  ;;  %v12126_v12 = vld [vmem:[#allocation7 + $0x28c] ss:$16 sps:$4 sm:$0xff]  }
 0x4a9   :  { %8853 = vmatprep.subr.bf16.mxu1 %v12042_v5  ;;  %v12121_v5 = vld [vmem:[#allocation7 + $0x280] ss:$16 sps:$4 sm:$0xff]  }
 0x4ac   :  { %8854 = vmatpush1.bf16.msra.mxu1 %v12040_v9  ;;  %v12124_v9 = vld [vmem:[#allocation7 + $0x288] ss:$16 sps:$4 sm:$0xff]  }
 0x4ad   :  { %8855 = vmatprep.subr.bf16.mxu1 %v12048_v19  ;;  %v12129_v19 = vld [vmem:[#allocation7 + $0x2a4] ss:$16 sps:$4 sm:$0xff]  }
 0x4b0   :  { %8856 = vmatpush1.bf16.msra.mxu1 %v12046_v38  ;;  %v12132_v38 = vld [vmem:[#allocation7 + $0x2ac] ss:$16 sps:$4 sm:$0xff]  }
 0x4b1   :  { %8857 = vmatprep.subr.bf16.mxu1 %v12054_v39  ;;  %v12127_v39 = vld [vmem:[#allocation7 + $0x2a0] ss:$16 sps:$4 sm:$0xff]  }
 0x4b4   :  { %8858 = vmatpush1.bf16.msra.mxu1 %v12052_v40  ;;  %v12130_v40 = vld [vmem:[#allocation7 + $0x2a8] ss:$16 sps:$4 sm:$0xff]  }
 0x4b5   :  { %8859 = vmatprep.subr.bf16.mxu1 %v12060_v45  ;;  %v12135_v45 = vld [vmem:[#allocation7 + $0x2c4] ss:$16 sps:$4 sm:$0xff]  }
 0x4b8   :  { %8860 = vmatpush1.bf16.msra.mxu1 %v12058_v20  ;;  %v12138_v20 = vld [vmem:[#allocation7 + $0x2cc] ss:$16 sps:$4 sm:$0xff]  }
 0x4b9   :  { %8861 = vmatprep.subr.bf16.mxu1 %v12066_v24  ;;  %v12133_v24 = vld [vmem:[#allocation7 + $0x2c0] ss:$16 sps:$4 sm:$0xff]  }
 0x4bc   :  { %8862 = vmatpush1.bf16.msra.mxu1 %v12064_v47  ;;  %v12136_v47 = vld [vmem:[#allocation7 + $0x2c8] ss:$16 sps:$4 sm:$0xff]  }
 0x4bd   :  { %8863 = vmatprep.subr.bf16.mxu1 %v12072_v49  ;;  %v12141_v49 = vld [vmem:[#allocation7 + $0x2e4] ss:$16 sps:$4 sm:$0xff]  }
 0x4c0   :  { %8864 = vmatpush1.bf16.msra.mxu1 %v12070_v50  ;;  %v12144_v50 = vld [vmem:[#allocation7 + $0x2ec] ss:$16 sps:$4 sm:$0xff]  }
 0x4c1   :  { %8865 = vmatprep.subr.bf16.mxu1 %v12078_v18  ;;  %v12139_v18 = vld [vmem:[#allocation7 + $0x2e0] ss:$16 sps:$4 sm:$0xff]  }
 0x4c4   :  { %8866 = vmatpush1.bf16.msra.mxu1 %v12076_v1  ;;  %v12142_v1 = vld [vmem:[#allocation7 + $0x2e8] ss:$16 sps:$4 sm:$0xff]  }
 0x4c5   :  { %8867 = vmatprep.subr.bf16.mxu1 %v12084_v36  ;;  %v12147_v36 = vld [vmem:[#allocation7 + $0x304] ss:$16 sps:$4 sm:$0xff]  }
 0x4c8   :  { %8868 = vmatpush1.bf16.msra.mxu1 %v12082_v63  ;;  %v12148_v63 = vld [vmem:[#allocation7 + $0x308] ss:$16 sps:$4 sm:$0xff]  }
 0x4c9   :  { %8869 = vmatprep.subr.bf16.mxu1 %v12090_v21  ;;  %v12156_v21 = vld [vmem:[#allocation7 + $0x32c] ss:$16 sps:$4 sm:$0xff]  }
 0x4cc   :  { %8870 = vmatpush1.bf16.msra.mxu1 %v12088_v52 }
 0x4cd   :  { %8871 = vmatprep.subr.bf16.mxu1 %v12096_v53  ;;  %v12151_v53 = vld [vmem:[#allocation7 + $0x320] ss:$16 sps:$4 sm:$0xff]  }
 0x4d0   :  { %8872 = vmatpush1.bf16.msra.mxu1 %v12094_v10  ;;  %v12154_v10 = vld [vmem:[#allocation7 + $0x328] ss:$16 sps:$4 sm:$0xff]  }
 0x4d1   :  { %8882 = vmatprep.subr.bf16.mxu1 %v12102_v54 }
 0x53b   :  { %v7530_v59 = vpop.f32.mrb[16].mxu0 }
 0x53c   :  { %v7712_v60 = vmax.f32 %v12757_v14, %v7530_v59  ;;  %v12804_v61 = vpop.f32.mrb[17].mxu0  ;;  %v12103_v14 = vld [vmem:[#allocation7 + $0x220] ss:$16 sps:$4 sm:$0xff]  }
 0x53d   :  { %v7713_v62 = vmax.f32 %v12774_v43, %v12804_v61  ;;  %v7534_v3 = vpop.f32.mrb[18].mxu0  ;;  %v12201_v43 = vld [vmem:[#allocation7 + $0x424] ss:$16 sps:$4 sm:$0xff]   ;;  %v12204_v61 = vld [vmem:[#allocation7 + $0x42c] ss:$16 sps:$4 sm:$0xff]  }
 0x53e   :  { %v7744_v7 = vadd.f32 %v7725_v58, %v7712_v60  ;;  %v7535_v11 = vpop.f32.mrb[19].mxu0  ;;  %v12157_v3 = vld [vmem:[#allocation7 + $0x340] ss:$16 sps:$4 sm:$0xff]  }
 0x540   :  { %v7749_v23 = vmax.f32 %v7744_v7, 0.0  ;;  %v12160_v7 = vld [vmem:[#allocation7 + $0x348] ss:$16 sps:$4 sm:$0xff]  }
 0x542   :  { %v7754_v15 = vpack.c.bf16 %v7749_v23, %v7749_v23 }
 0x544   :  { %8750 = vmatprep.mubr.bf16.mxu0 %v7754_v15  ;;  %8873 = vmatprep.mubr.bf16.mxu1 %v7754_v15  ;;  %v12163_v15 = vld [vmem:[#allocation7 + $0x360] ss:$16 sps:$4 sm:$0xff]  }
 0x545   :  { %8751 = vmatmul.mubr.bf16.vlgmr.msra.gmra.mrb[20].mxu0 %v7753_v26  ;;  %8874 = vmatmul.mubr.bf16.vlgmr.msra.gmra.mrb[28].mxu1 %v7753_v26  ;;  %v12174_v26 = vld [vmem:[#allocation7 + $0x38c] ss:$16 sps:$4 sm:$0xff]  }
 0x546   :  { %8760 = vmatpush1.bf16.msra.mxu0 %v12097_v16  ;;  %8883 = vmatpush1.bf16.msra.mxu1 %v12100_v22  ;;  %v12166_v16 = vld [vmem:[#allocation7 + $0x368] ss:$16 sps:$4 sm:$0xff]   ;;  %v12171_v22 = vld [vmem:[#allocation7 + $0x384] ss:$16 sps:$4 sm:$0xff]  }
 0x547   :  { %8761 = vmatprep.subr.bf16.mxu0 %v12105_v28  ;;  %8884 = vmatprep.subr.bf16.mxu1 %v12108_v13  ;;  %v12169_v28 = vld [vmem:[#allocation7 + $0x380] ss:$16 sps:$4 sm:$0xff]   ;;  %v12172_v13 = vld [vmem:[#allocation7 + $0x388] ss:$16 sps:$4 sm:$0xff]  }
 0x54a   :  { %8762 = vmatpush1.bf16.msra.mxu0 %v12103_v14  ;;  %8885 = vmatpush1.bf16.msra.mxu1 %v12106_v29  ;;  %v7728_v14 = vsub.s32 2, %v12590_v6  ;;  %v12177_v29 = vld [vmem:[#allocation7 + $0x3a4] ss:$16 sps:$4 sm:$0xff]  }
 0x54b   :  { %8763 = vmatprep.subr.bf16.mxu0 %v12111_v41  ;;  %8886 = vmatprep.subr.bf16.mxu1 %v12114_v42  ;;  %v12180_v41 = vld [vmem:[#allocation7 + $0x3ac] ss:$16 sps:$4 sm:$0xff]   ;;  %v12175_v42 = vld [vmem:[#allocation7 + $0x3a0] ss:$16 sps:$4 sm:$0xff]  }
 0x54e   :  { %8764 = vmatpush1.bf16.msra.mxu0 %v12109_v48  ;;  %8887 = vmatpush1.bf16.msra.mxu1 %v12112_v17  ;;  %v12178_v48 = vld [vmem:[#allocation7 + $0x3a8] ss:$16 sps:$4 sm:$0xff]   ;;  %v7729_v17 = vrot.slane %v12795_v56, %v7728_v14 }
 0x54f   :  { %8765 = vmatprep.subr.bf16.mxu0 %v12117_v44  ;;  %8888 = vmatprep.subr.bf16.mxu1 %v12120_v32  ;;  %v12183_v44 = vld [vmem:[#allocation7 + $0x3c4] ss:$16 sps:$4 sm:$0xff]   ;;  %v12186_v32 = vld [vmem:[#allocation7 + $0x3cc] ss:$16 sps:$4 sm:$0xff]  }
 0x552   :  { %8766 = vmatpush1.bf16.msra.mxu0 %v12115_v35  ;;  %8889 = vmatpush1.bf16.msra.mxu1 %v12118_v30  ;;  %v12181_v35 = vld [vmem:[#allocation7 + $0x3c0] ss:$16 sps:$4 sm:$0xff]   ;;  %v12184_v30 = vld [vmem:[#allocation7 + $0x3c8] ss:$16 sps:$4 sm:$0xff]  }
 0x553   :  { %8767 = vmatprep.subr.bf16.mxu0 %v12123_v33  ;;  %8890 = vmatprep.subr.bf16.mxu1 %v12126_v12  ;;  %v7745_v33 = vadd.f32 %v7729_v17, %v7713_v62  ;;  %v12189_v12 = vld [vmem:[#allocation7 + $0x3e4] ss:$16 sps:$4 sm:$0xff]   ;;  %v12199_v62 = vld [vmem:[#allocation7 + $0x420] ss:$16 sps:$4 sm:$0xff]  }
 0x556   :  { %8768 = vmatpush1.bf16.msra.mxu0 %v12121_v5  ;;  %8891 = vmatpush1.bf16.msra.mxu1 %v12124_v9  ;;  %v12192_v5 = vld [vmem:[#allocation7 + $0x3ec] ss:$16 sps:$4 sm:$0xff]   ;;  %v12187_v9 = vld [vmem:[#allocation7 + $0x3e0] ss:$16 sps:$4 sm:$0xff]  }
 0x557   :  { %8769 = vmatprep.subr.bf16.mxu0 %v12129_v19  ;;  %8892 = vmatprep.subr.bf16.mxu1 %v12132_v38  ;;  %v12190_v19 = vld [vmem:[#allocation7 + $0x3e8] ss:$16 sps:$4 sm:$0xff]   ;;  %v7750_v38 = vmax.f32 %v7745_v33, 0.0 }
 0x55a   :  { %8770 = vmatpush1.bf16.msra.mxu0 %v12127_v39  ;;  %8893 = vmatpush1.bf16.msra.mxu1 %v12130_v40  ;;  %v12195_v39 = vld [vmem:[#allocation7 + $0x404] ss:$16 sps:$4 sm:$0xff]   ;;  %v12198_v40 = vld [vmem:[#allocation7 + $0x40c] ss:$16 sps:$4 sm:$0xff]  }
 0x55b   :  { %8771 = vmatprep.subr.bf16.mxu0 %v12135_v45  ;;  %8894 = vmatprep.subr.bf16.mxu1 %v12138_v20  ;;  %v12193_v45 = vld [vmem:[#allocation7 + $0x400] ss:$16 sps:$4 sm:$0xff]   ;;  %v12196_v20 = vld [vmem:[#allocation7 + $0x408] ss:$16 sps:$4 sm:$0xff]  }
 0x55e   :  { %8772 = vmatpush1.bf16.msra.mxu0 %v12133_v24  ;;  %8895 = vmatpush1.bf16.msra.mxu1 %v12136_v47  ;;  %v7755_v24 = vpack.c.bf16 %v7750_v38, %v7750_v38  ;;  %v12202_v47 = vld [vmem:[#allocation7 + $0x428] ss:$16 sps:$4 sm:$0xff]   ;;  %v12250_v38 = vld [vmem:[#allocation11 + $0x8] sm:$0xff]  }
 0x55f   :  { %8773 = vmatprep.subr.bf16.mxu0 %v12141_v49  ;;  %8896 = vmatprep.subr.bf16.mxu1 %v12144_v50  ;;  %v12207_v49 = vld [vmem:[#allocation7 + $0x444] ss:$16 sps:$4 sm:$0xff]   ;;  %v12210_v50 = vld [vmem:[#allocation7 + $0x44c] ss:$16 sps:$4 sm:$0xff]  }
 0x562   :  { %8774 = vmatpush1.bf16.msra.mxu0 %v12139_v18  ;;  %8897 = vmatpush1.bf16.msra.mxu1 %v12142_v1  ;;  %v12205_v18 = vld [vmem:[#allocation7 + $0x440] ss:$16 sps:$4 sm:$0xff]   ;;  %v12208_v1 = vld [vmem:[#allocation7 + $0x448] ss:$16 sps:$4 sm:$0xff]  }
 0x563   :  { %8775 = vmatprep.subr.bf16.mxu0 %v12147_v36  ;;  %8898 = vmatprep.subr.bf16.mxu1 %v12150_v37  ;;  %v12213_v36 = vld [vmem:[#allocation7 + $0x464] ss:$16 sps:$4 sm:$0xff]   ;;  %v12216_v37 = vld [vmem:[#allocation7 + $0x46c] ss:$16 sps:$4 sm:$0xff]  }
 0x566   :  { %v7694_v52 = vpop.f32.mrb[24].mxu1  ;;  %8776 = vmatpush1.bf16.msra.mxu0 %v12145_v2  ;;  %8899 = vmatpush1.bf16.msra.mxu1 %v12148_v63  ;;  %v12214_v2 = vld [vmem:[#allocation7 + $0x468] ss:$16 sps:$4 sm:$0xff]   ;;  %v12219_v63 = vld [vmem:[#allocation7 + $0x484] ss:$16 sps:$4 sm:$0xff]  }
 0x567   :  { %v7714_v54 = vmax.f32 %v12779_v46, %v7694_v52  ;;  %v12811_v55 = vpop.f32.mrb[25].mxu1  ;;  %8777 = vmatprep.subr.bf16.mxu0 %v12153_v4  ;;  %8900 = vmatprep.subr.bf16.mxu1 %v12156_v21  ;;  %v12165_v46 = vld [vmem:[#allocation7 + $0x364] ss:$16 sps:$4 sm:$0xff]   ;;  %v12222_v4 = vld [vmem:[#allocation7 + $0x48c] ss:$16 sps:$4 sm:$0xff]  }
 0x568   :  { %v7715_v58 = vmax.f32 %v12788_v27, %v12811_v55  ;;  %v7698_v31 = vpop.f32.mrb[26].mxu1  ;;  %v12217_v21 = vld [vmem:[#allocation7 + $0x480] ss:$16 sps:$4 sm:$0xff]   ;;  %v12225_v52 = vld [vmem:[#allocation7 + $0x4a4] ss:$16 sps:$4 sm:$0xff]   ;;  %v12452_v27 = vmov 0.0  }
 0x569   :  { %v7746_v59 = vadd.f32 %v7733_v8, %v7714_v54  ;;  %v7699_v60 = vpop.f32.mrb[27].mxu1  ;;  %v7736_v8 = vsub.s32 4, %v12590_v6  ;;  %v12226_v54 = vld [vmem:[#allocation7 + $0x4a8] ss:$16 sps:$4 sm:$0xff]   ;;  %v12234_v31 = vld [vmem:[#allocation7 + $0x4cc] ss:$16 sps:$4 sm:$0xff]  }
 0x56a   :  { %8778 = vmatpush1.bf16.msra.mxu0 %v12151_v53  ;;  %8901 = vmatpush1.bf16.msra.mxu1 %v12154_v10  ;;  %v12228_v53 = vld [vmem:[#allocation7 + $0x4ac] ss:$16 sps:$4 sm:$0xff]   ;;  %v12223_v10 = vld [vmem:[#allocation7 + $0x4a0] ss:$16 sps:$4 sm:$0xff]   ;;  %v12232_v60 = vld [vmem:[#allocation7 + $0x4c8] ss:$16 sps:$4 sm:$0xff]  }
 0x56b   :  { %v7751_v11 = vmax.f32 %v7746_v59, 0.0  ;;  %8779 = vmatprep.subr.bf16.mxu0 %v12159_v57  ;;  %8902 = vmatprep.subr.bf16.mxu1 %v12162_v34  ;;  %v7737_v57 = vrot.slane %v12795_v56, %v7736_v8  ;;  %v12231_v34 = vld [vmem:[#allocation7 + $0x4c4] ss:$16 sps:$4 sm:$0xff]   ;;  %v12229_v59 = vld [vmem:[#allocation7 + $0x4c0] ss:$16 sps:$4 sm:$0xff]  }
 0x56c   :  { %v12238_v56 = vld [vmem:[#allocation7 + $0x4e8] ss:$16 sps:$4 sm:$0xff]  }
 0x56d   :  { %v7756_v23 = vpack.c.bf16 %v7751_v11, %v7751_v11  ;;  %v7747_v6 = vadd.f32 %v7737_v57, %v7715_v58  ;;  %v12235_v11 = vld [vmem:[#allocation7 + $0x4e0] ss:$16 sps:$4 sm:$0xff]  }
 0x56e   :  { %8780 = vmatpush1.bf16.msra.mxu0 %v12157_v3  ;;  %8903 = vmatpush1.bf16.msra.mxu1 %v12160_v7  ;;  %v12237_v3 = vld [vmem:[#allocation7 + $0x4e4] ss:$16 sps:$4 sm:$0xff]   ;;  %v12240_v7 = vld [vmem:[#allocation7 + $0x4ec] ss:$16 sps:$4 sm:$0xff]  }
 0x56f   :  { %8791 = vmatprep.mubr.bf16.mxu0 %v7756_v23  ;;  %8914 = vmatprep.mubr.bf16.mxu1 %v7756_v23  ;;  %v12242_v55 = vld [vmem:[%s12868_s5 + $0x8] sm:$0xff]   ;;  %v12243_v58 = vld [vmem:[%s12868_s5 + $0x10] sm:$0xff]  }
 0x570   :  { %8781 = vmatprep.subr.bf16.mxu0 %v12165_v46  ;;  %8904 = vmatprep.subr.bf16.mxu1 %v12168_v25  ;;  %v7752_v46 = vmax.f32 %v7747_v6, 0.0  ;;  %v12241_v25 = vld [vmem:[%s12868_s5] sm:$0xff]  }
 0x572   :  { %8782 = vmatpush1.bf16.msra.mxu0 %v12163_v15  ;;  %8905 = vmatpush1.bf16.msra.mxu1 %v12166_v16  ;;  %v7757_v23 = vpack.c.bf16 %v7752_v46, %v7752_v46  ;;  %v12244_v15 = vld [vmem:[%s12868_s5 + $0x18] sm:$0xff]   ;;  %v12245_v16 = vld [vmem:[%s12868_s5 + $0x20] sm:$0xff]  }
 0x573   :  { %8783 = vmatprep.subr.bf16.mxu0 %v12171_v22  ;;  %8906 = vmatprep.subr.bf16.mxu1 %v12174_v26  ;;  %v12246_v22 = vld [vmem:[%s12868_s5 + $0x28] sm:$0xff]   ;;  %v12247_v26 = vld [vmem:[%s12868_s5 + $0x30] sm:$0xff]  }
 0x576   :  { %8784 = vmatpush1.bf16.msra.mxu0 %v12169_v28  ;;  %8907 = vmatpush1.bf16.msra.mxu1 %v12172_v13  ;;  %v12248_v28 = vld [vmem:[%s12868_s5 + $0x38] sm:$0xff]   ;;  %s12454_s5 = smov [#allocation14]  }
 0x577   :  { %8785 = vmatprep.subr.bf16.mxu0 %v12177_v29  ;;  %8908 = vmatprep.subr.bf16.mxu1 %v12180_v41  ;;  %s9164_s21 = sshll.u32 %s12454_s5, 4  ;;  %s9165_s21 = int_to_ptr.vmem [resolvable:$true] %s9164_s21 }
 0x578   :  { %s12405_s22 = scalar_lea.vmem %s9165_s21, 32  ;;  %p12410_p1 = scmp.lt.s32.totalorder %s9165_s21, %s9165_s21 }
 0x579   :  { %p12406_p0 = scmp.ne.s32.totalorder %s9165_s21, %s12405_s22  ;;  %p12411_p2 = scmp.lt.s32.totalorder %s12405_s22, %s12405_s22 }
 0x57a   :  { %8786 = vmatpush1.bf16.msra.mxu0 %v12175_v42  ;;  %8909 = vmatpush1.bf16.msra.mxu1 %v12178_v48 }
 0x57b   :  { %8787 = vmatprep.subr.bf16.mxu0 %v12183_v44  ;;  %8910 = vmatprep.subr.bf16.mxu1 %v12186_v32  ;;  %p12412_p3 = por %p12411_p2, %p12410_p1 }
 0x57d   :  { %p12413_p4 = pnand %p12412_p3, %p12406_p0 }
 0x57e   :  { %8788 = vmatpush1.bf16.msra.mxu0 %v12181_v35  ;;  %8911 = vmatpush1.bf16.msra.mxu1 %v12184_v30  ;;  %v10326_v30 = vld [vmem:[#allocation8] ss:$0 sm:$0xff] }
 0x57f   :  { %8789 = vmatprep.subr.bf16.mxu0 %v12189_v12  ;;  %8912 = vmatprep.subr.bf16.mxu1 %v12192_v5 }
 0x582   :  { %8790 = vmatpush1.bf16.msra.mxu0 %v12187_v9  ;;  %8913 = vmatpush1.bf16.msra.mxu1 %v12190_v19  ;;  %v12249_v19 = vld [vmem:[#allocation11] sm:$0xff]  }
 0x583   :  { %8800 = vmatprep.subr.bf16.mxu0 %v12195_v39  ;;  %8923 = vmatprep.subr.bf16.mxu1 %v12198_v40  ;;  %v10327_v39 = vld [vmem:[#allocation10] ss:$0 sm:$0xff] }
 0x585   :  { %8792 = vmatmul.mubr.bf16.vlgmr.msra.gmra.mrb[20].mxu0 %v7755_v24  ;;  %8915 = vmatmul.mubr.bf16.vlgmr.msra.gmra.mrb[28].mxu1 %v7755_v24 }
 0x586   :  { %8801 = vmatpush1.bf16.msra.mxu0 %v12193_v45  ;;  %8924 = vmatpush1.bf16.msra.mxu1 %v12196_v20 }
 0x587   :  { %8802 = vmatprep.subr.bf16.mxu0 %v12201_v43  ;;  %8925 = vmatprep.subr.bf16.mxu1 %v12204_v61 }
 0x588   :  { %8832 = vmatprep.mubr.bf16.mxu0 %v12450_v0  ;;  %8955 = vmatprep.mubr.bf16.mxu1 %v12450_v0  ;;  %v12220_v0 = vld [vmem:[#allocation7 + $0x488] ss:$16 sps:$4 sm:$0xff]  }
 0x58a   :  { %8803 = vmatpush1.bf16.msra.mxu0 %v12199_v62  ;;  %8926 = vmatpush1.bf16.msra.mxu1 %v12202_v47  ;;  %v10336_v47 = vld [vmem:[#allocation13] ss:$0 sm:$0xff] }
 0x58b   :  { %8804 = vmatprep.subr.bf16.mxu0 %v12207_v49  ;;  %8927 = vmatprep.subr.bf16.mxu1 %v12210_v50 }
 0x58e   :  { %8805 = vmatpush1.bf16.msra.mxu0 %v12205_v18  ;;  %8928 = vmatpush1.bf16.msra.mxu1 %v12208_v1 }
 0x58f   :  { %8806 = vmatprep.subr.bf16.mxu0 %v12213_v36  ;;  %8929 = vmatprep.subr.bf16.mxu1 %v12216_v37 }
 0x592   :  { %8807 = vmatpush1.bf16.msra.mxu0 %v12211_v51  ;;  %8930 = vmatpush1.bf16.msra.mxu1 %v12214_v2 }
 0x593   :  { %8808 = vmatprep.subr.bf16.mxu0 %v12219_v63  ;;  %8931 = vmatprep.subr.bf16.mxu1 %v12222_v4 }
 0x596   :  { %8809 = vmatpush1.bf16.msra.mxu0 %v12217_v21  ;;  %8932 = vmatpush1.bf16.msra.mxu1 %v12220_v0 }
 0x597   :  { %8810 = vmatprep.subr.bf16.mxu0 %v12225_v52  ;;  %8933 = vmatprep.subr.bf16.mxu1 %v12228_v53 }
 0x59a   :  { %8811 = vmatpush1.bf16.msra.mxu0 %v12223_v10  ;;  %8934 = vmatpush1.bf16.msra.mxu1 %v12226_v54 }
 0x59b   :  { %8812 = vmatprep.subr.bf16.mxu0 %v12231_v34  ;;  %8935 = vmatprep.subr.bf16.mxu1 %v12234_v31 }
 0x59e   :  { %8813 = vmatpush1.bf16.msra.mxu0 %v12229_v59  ;;  %8936 = vmatpush1.bf16.msra.mxu1 %v12232_v60 }
 0x59f   :  { %8814 = vmatprep.subr.bf16.mxu0 %v12237_v3  ;;  %8937 = vmatprep.subr.bf16.mxu1 %v12240_v7 }
 0x5a2   :  { %8815 = vmatpush1.bf16.msra.mxu0 %v12235_v11  ;;  %8938 = vmatpush1.bf16.msra.mxu1 %v12238_v56 }
 0x5a3   :  { %10352 = vmatprep.subr.bf16.mxu0 %v12452_v27  ;;  %10372 = vmatprep.subr.bf16.mxu1 %v12452_v27 }
 0x5a5   :  { %8833 = vmatmul.mubr.bf16.vlgmr.msra.gmra.mrb[20].mxu0 %v7757_v23  ;;  %8956 = vmatmul.mubr.bf16.vlgmr.msra.gmra.mrb[28].mxu1 %v7757_v23 }
 0x5a6   :  { %10353 = vmatpush3.bf16.msra.mxu0 %v12241_v25  ;;  %10368 = vmatprep.mubr.msk.bf16.mxu0 %vm12453_vm1, %v12452_v27 }
 0x5a7   :  { %10354 = vmatprep.subr.bf16.mxu0 %v12452_v27  ;;  %10376 = vmatprep.mubr.msk.bf16.mxu1 %vm12453_vm1, %v12452_v27 }
 0x5a8   :  { %10373 = vmatpush3.bf16.msra.mxu1 %v12249_v19 }
 0x5a9   :  { %10374 = vmatprep.subr.bf16.mxu1 %v12452_v27 }
 0x5aa   :  { %10355 = vmatpush3.bf16.msra.mxu0 %v12242_v55 }
 0x5ab   :  { %10356 = vmatprep.subr.bf16.mxu0 %v12452_v27 }
 0x5ac   :  { %10375 = vmatpush3.bf16.msra.mxu1 %v12250_v38 }
 0x5ae   :  { %10357 = vmatpush3.bf16.msra.mxu0 %v12243_v58 }
 0x5af   :  { %10358 = vmatprep.subr.bf16.mxu0 %v12452_v27 }
 0x5b2   :  { %10359 = vmatpush3.bf16.msra.mxu0 %v12244_v15 }
 0x5b3   :  { %10360 = vmatprep.subr.bf16.mxu0 %v12452_v27 }
 0x5b6   :  { %10361 = vmatpush3.bf16.msra.mxu0 %v12245_v16 }
 0x5b7   :  { %10362 = vmatprep.subr.bf16.mxu0 %v12452_v27 }
 0x5ba   :  { %10363 = vmatpush3.bf16.msra.mxu0 %v12246_v22 }
 0x5bb   :  { %10364 = vmatprep.subr.bf16.mxu0 %v12452_v27 }
 0x5be   :  { %10365 = vmatpush3.bf16.msra.mxu0 %v12247_v26 }
 0x5bf   :  { %10366 = vmatprep.subr.bf16.mxu0 %v12452_v27 }
 0x5c2   :  { %10367 = vmatpush3.bf16.msra.mxu0 %v12248_v28 }
 0x678   :  { %v8834_v13 = vpop.f32.mrb[20].mxu0  ;;  %v8957_v14 = vpop.f32.mrb[28].mxu1 }
 0x679   :  { %v8836_v29 = vpop.f32.mrb[21].mxu0  ;;  %v8959_v41 = vpop.f32.mrb[29].mxu1 }
 0x67a   :  { %v8964_v42 = vmax.f32 %v8834_v13, %v8836_v29  ;;  %v8838_v48 = vpop.f32.mrb[22].mxu0  ;;  %v8961_v17 = vpop.f32.mrb[30].mxu1 }
 0x67b   :  { %v8839_v44 = vpop.f32.mrb[23].mxu0  ;;  %v8962_v32 = vpop.f32.mrb[31].mxu1 }
 0x67c   :  { %v8965_v35 = vmax.f32 %v8964_v42, %v8957_v14 }
 0x67e   :  { %v8966_v33 = vmax.f32 %v8965_v35, %v8959_v41 }
 0x680   :  { %v8974_v12 = vadd.f32 %v10326_v30, %v8966_v33 }
 0x682   :  { %v8975_v5 = vmax.f32 %v8974_v12, 0.0 }
 0x684   :  { %v8976_v9 = vpack.c.bf16 %v8975_v5, %v8975_v5 }
 0x686   :  { %10369 = vmatmul.mubr.bf16.vlgmr.msra.gmra.mrb[24].mxu0 %v8976_v9 }
 0x759   :  { %v9082_v40 = vpop.f32.mrb[24].mxu0 }
 0x75a   :  { %v9083_v45 = vadd.f32 %v10327_v39, %v9082_v40  ;;  %v10370_v20 = vpop.f32.mrb[25].mxu0 }
 0x75b   :  { %v9085_v24 = vpop.f32.mrb[26].mxu0 }
 0x75c   :  { %v9088_v43 = vmax.f32 %v9083_v45, 0.0  ;;  %v10371_v61 = vpop.f32.mrb[27].mxu0 }
 0x75e   :  { %v9089_v62 = vpack.c.bf16 %v9088_v43, %v9088_v43 }
 0x760   :  { %10377 = vmatmul.mubr.msk.bf16.vlgmr.msra.gmra.mrb[32].mxu1 %vm9113_vm2, %v9089_v62 }
 0x833   :  { %v9151_v49 = vpop.f32.mrb[32].mxu1 }
 0x834   :  { %v9152_v50 = vadd.f32 %v10336_v47, %v9151_v49  ;;  %v10378_v18 = vpop.f32.mrb[33].mxu1 }
 0x835   :  { %v9154_v1 = vpop.f32.mrb[34].mxu1 }
 0x836   :  { %9157 = vst [vmem:[#allocation14] sm:$0x3] %v9152_v50  ;;  %v10379_v36 = vpop.f32.mrb[35].mxu1 }
 0x837   :  { %12416 = shalt.err (!%p12413_p4)
}
 0x838   :  { %s12417_s12 = scalar_lea.hbm %s12872_s9, 32 }
 0x839   :  { %p12418_p5 = scmp.ne.s32.totalorder %s12872_s9, %s12417_s12  ;;  %p12421_p6 = scmp.lt.u32.totalorder %s12417_s12, %s12872_s9 }
 0x83b   :  { %p12423_p7 = pnand %p12421_p6, %p12418_p5 }
 0x83d   :  { %12426 = shalt.err (!%p12423_p7)
}
 0x83e   :  { %9167 = dma.vmem_to_hbm [thread:$0]  %s9165_s21, 32, %s12872_s9, [#allocation4]  }
 0x83f   :  { %12435 = dma.done.wait [#allocation4], 32  }
 0x840   :  { %12436 = vsyncadd [#allocation4], 4294967264 }
 0x841   :  { %9171 = vsyncpa [#allocation3], 1 }
 0x842   :  { %9172 = vsyncpa [#allocation6], 1 }
 0x843   :  { %9173 = vsyncpa [#allocation9], 1 }
 0x844   :  { %9174 = vsyncpa [#allocation12], 1 }
 0x845   :  { %9175 = vsyncpa [#allocation4], 1 }

</bundles_post_ra>
